<compile_context>
chip_gen: v7x
topology: tpu7x:2x2x1
jax: 0.10.0
libtpu: 0.0.40
codegen_flags: <defaults>
</compile_context>

<pallas_src>
import functools

import jax
import jax.numpy as jnp
from jax.experimental import pallas as pl
from jax.experimental.pallas import tpu as pltpu

LN_EPS = 1e-5          # PyTorch nn.LayerNorm default eps
COS_EPS = 1e-8         # PyTorch F.cosine_similarity default eps


def _round_up(x, m):
    return ((x + m - 1) // m) * m


def _tile_config():
    """(tile_rows, vmem_limit_bytes) chosen per TPU generation."""
    try:
        kind = jax.devices()[0].device_kind.lower()
    except Exception:  # pragma: no cover - non-TPU / interpret fallback
        return 256, None
    if "v6" in kind or "v7" in kind:
        # Larger tiles amortize the ~0.35us/step grid overhead; ~15 MiB of
        # VMEM at 512 rows, so raise the scoped limit explicitly.
        return 512, 32 * 1024 * 1024
    # v5e (16 MiB default scoped VMEM, MXU-bound) and older parts: keep 256.
    return 256, None


def _layernorm(v):
    """Pure normalize (affine folded into the following linear)."""
    mu = jnp.mean(v, axis=-1, keepdims=True)
    d = v - mu
    var = jnp.mean(d * d, axis=-1, keepdims=True)
    return d * jax.lax.rsqrt(var + LN_EPS)


def _out_layernorm(v, g, b, true_d):
    """LayerNorm over the first `true_d` lanes; pad lanes of v are exactly 0,
    so plain sums give the correct statistics without any mask."""
    inv_d = 1.0 / true_d
    mu = jnp.sum(v, axis=-1, keepdims=True) * inv_d
    var = jnp.sum(v * v, axis=-1, keepdims=True) * inv_d - mu * mu
    var = jnp.maximum(var, 0.0)  # guard tiny negative from cancellation
    return (v - mu) * jax.lax.rsqrt(var + LN_EPS) * g + b


def _mlp_kernel(x_ref, w0_ref, b0_ref, w1_ref, b1_ref, w2_ref, b2_ref,
                w3_ref, b3_ref, g3_ref, be3_ref, out_ref, *, true_dout):
    # Hoist all (1, F) parameter reads once; implicit broadcast over rows.
    b0 = b0_ref[...]
    b1 = b1_ref[...]
    b2 = b2_ref[...]
    b3 = b3_ref[...]
    g3 = g3_ref[...]
    be3 = be3_ref[...]

    x = x_ref[...]                                       # bf16 rows
    # input_proj: Linear -> ReLU (-> Dropout == identity at inference)
    h = jnp.maximum(
        jnp.dot(x, w0_ref[...], preferred_element_type=jnp.float32) + b0, 0.0)
    # ffn: LN -> Linear -> ReLU -> LN -> Linear -> ReLU (Dropout == identity).
    # LN affines are pre-folded into w1/b1 and w2/b2.
    t = _layernorm(h)
    t = jnp.maximum(
        jnp.dot(t.astype(jnp.bfloat16), w1_ref[...],
                preferred_element_type=jnp.float32) + b1, 0.0)
    t = _layernorm(t)
    t = jnp.maximum(
        jnp.dot(t.astype(jnp.bfloat16), w2_ref[...],
                preferred_element_type=jnp.float32) + b2, 0.0)
    # residual: ffn(hidden) + hidden
    f = t + h
    # output: Linear -> LayerNorm over the TRUE output width
    o = jnp.dot(f.astype(jnp.bfloat16), w3_ref[...],
                preferred_element_type=jnp.float32) + b3
    out_ref[...] = _out_layernorm(o, g3, be3, true_dout)


_PARAM_ORDER = ("w0", "b0", "w1", "b1", "w2", "b2", "w3", "b3", "g3", "be3")


def prepare_params(params):
    """Fold LN1/LN2 affines into the next linears, pad the output feature dim
    to a multiple of 128, and cast matmul weights to bf16.  Call once."""
    f32 = lambda k: params[k].astype(jnp.float32)
    w0, b0 = f32("w0"), f32("b0")
    g1, be1 = f32("g1"), f32("be1")
    w1, b1 = f32("w1"), f32("b1")
    g2, be2 = f32("g2"), f32("be2")
    w2, b2 = f32("w2"), f32("b2")
    w3, b3 = f32("w3"), f32("b3")
    g3, be3 = f32("g3"), f32("be3")

    # (norm * g + beta) @ W + b  ==  norm @ (diag(g) @ W) + (beta @ W + b)
    w1f = w1 * g1.T
    b1f = b1 + be1 @ w1
    w2f = w2 * g2.T
    b2f = b2 + be2 @ w2

    dout = w3.shape[1]
    dout_pad = max(128, _round_up(dout, 128))
    pad = dout_pad - dout
    if pad:
        w3 = jnp.pad(w3, ((0, 0), (0, pad)))
        b3 = jnp.pad(b3, ((0, 0), (0, pad)))
        g3 = jnp.pad(g3, ((0, 0), (0, pad)))
        be3 = jnp.pad(be3, ((0, 0), (0, pad)))

    return dict(w0=w0.astype(jnp.bfloat16), b0=b0,
                w1=w1f.astype(jnp.bfloat16), b1=b1f,
                w2=w2f.astype(jnp.bfloat16), b2=b2f,
                w3=w3.astype(jnp.bfloat16), b3=b3, g3=g3, be3=be3)


def disambiguator_mlp(parts, pparams, output_dim):
    """Run the shared MLP on the row-concatenation of `parts`.

    parts: list of (n_i, input_dim) arrays.  Returns list of (n_i, output_dim).
    """
    din = parts[0].shape[-1]
    hid = pparams["w0"].shape[1]
    dout_pad = pparams["w3"].shape[1]
    sizes = [int(p.shape[0]) for p in parts]
    n_total = sum(sizes)

    tile_rows, vmem_limit = _tile_config()
    n_tiles = pl.cdiv(n_total, tile_rows)
    np_rows = n_tiles * tile_rows
    pad_rows = np_rows - n_total

    # concat + row-pad fused into a single bf16 materialization
    pieces = [p.astype(jnp.bfloat16) for p in parts]
    if pad_rows:
        pieces.append(jnp.zeros((pad_rows, din), jnp.bfloat16))
    x = pieces[0] if len(pieces) == 1 else jnp.concatenate(pieces, axis=0)

    plist = [pparams[k] for k in _PARAM_ORDER]

    def const_spec(p):
        # Grid-constant block (same (0,0) tile every step).
        # TODO(synk): pipeline_mode=pl.Buffered(1) here to halve weight VMEM
        # if 1024-row tiles are ever enabled on v7x.
        return pl.BlockSpec(p.shape, lambda i: (0, 0))

    flops = 2 * np_rows * (din * hid + 2 * hid * hid + hid * dout_pad)
    bytes_accessed = (np_rows * (din * 2 + dout_pad * 4)
                      + sum(int(p.size) * p.dtype.itemsize for p in plist))
    cost = pl.CostEstimate(flops=flops, transcendentals=4 * np_rows,
                           bytes_accessed=bytes_accessed)

    kernel = functools.partial(_mlp_kernel, true_dout=output_dim)
    out = pl.pallas_call(
        kernel,
        out_shape=jax.ShapeDtypeStruct((np_rows, dout_pad), jnp.float32),
        grid=(n_tiles,),
        in_specs=[pl.BlockSpec((tile_rows, din), lambda i: (i, 0))]
                 + [const_spec(p) for p in plist],
        out_specs=pl.BlockSpec((tile_rows, dout_pad), lambda i: (i, 0)),
        compiler_params=pltpu.CompilerParams(
            dimension_semantics=("parallel",),
            vmem_limit_bytes=vmem_limit),
        cost_estimate=cost,
    )(x, *plist)

    outs, off = [], 0
    for n in sizes:
        outs.append(out[off:off + n, :output_dim])
        off += n
    return outs


def _cosine_similarity(a, b, eps=COS_EPS):
    an = jnp.maximum(jnp.sqrt(jnp.sum(a * a, axis=-1)), eps)
    bn = jnp.maximum(jnp.sqrt(jnp.sum(b * b, axis=-1)), eps)
    return jnp.sum(a * b, axis=-1) / (an * bn)


def _calculate_loss(text_dis, image_dis, labels):
    batch_size = image_dis.shape[0]
    image_labels = labels.reshape(batch_size, 5, -1).mean(axis=1)
    text2image = text_dis.reshape(batch_size, 5, -1).mean(axis=1)
    image_loss = (1.0 - _cosine_similarity(image_dis, image_labels)).mean(axis=-1)
    text_loss = (1.0 - _cosine_similarity(text_dis, labels)).mean(axis=-1)
    alignment_loss = (1.0 - _cosine_similarity(image_dis, text2image)).mean(axis=-1)
    return image_loss + text_loss + alignment_loss


def w2v_disambiguator_forward(text_embeds, image_embeds, params, output_dim,
                              labels=None):
    # Accept raw PyTorch-style params too (fold/pad/cast on the fly).
    if "g1" in params:
        params = prepare_params(params)
    D = image_embeds.shape[-1]
    text_embeds = text_embeds.reshape(-1, D)
    # text and image share the same weights -> one kernel on the concat.
    text_dis, image_dis = disambiguator_mlp([text_embeds, image_embeds],
                                            params, output_dim)
    if labels is not None:
        labels = labels.reshape(-1, output_dim)
        return _calculate_loss(text_dis, image_dis, labels)
    return {"text_disambiguated_embeds": text_dis,
            "image_disambiguated_embeds": image_dis}


def init_params(key, input_dim, hidden_dim, output_dim):
    ks = jax.random.split(key, 4)

    def lin(k, fan_in, fan_out):
        bound = 1.0 / (fan_in ** 0.5)
        kw, kb = jax.random.split(k)
        w = jax.random.uniform(kw, (fan_in, fan_out), jnp.float32, -bound, bound)
        b = jax.random.uniform(kb, (1, fan_out), jnp.float32, -bound, bound)
        return w, b

    w0, b0 = lin(ks[0], input_dim, hidden_dim)
    w1, b1 = lin(ks[1], hidden_dim, hidden_dim)
    w2, b2 = lin(ks[2], hidden_dim, hidden_dim)
    w3, b3 = lin(ks[3], hidden_dim, output_dim)
    ones = lambda d: jnp.ones((1, d), jnp.float32)
    zeros = lambda d: jnp.zeros((1, d), jnp.float32)
    return dict(w0=w0, b0=b0,
                g1=ones(hidden_dim), be1=zeros(hidden_dim), w1=w1, b1=b1,
                g2=ones(hidden_dim), be2=zeros(hidden_dim), w2=w2, b2=b2,
                w3=w3, b3=b3, g3=ones(output_dim), be3=zeros(output_dim))


if __name__ == "__main__":
    key = jax.random.PRNGKey(0)
    B, Din, H, Dout = 2, 32, 64, 16          # small stand-ins for 768/512/300
    k1, k2, k3, kp = jax.random.split(key, 4)

    text_embeds = jax.random.normal(k1, (5 * B, Din), jnp.float32)   # (5B, D)
    image_embeds = jax.random.normal(k2, (B, Din), jnp.float32)      # (B, D)
    labels = jax.random.normal(k3, (5 * B, Dout), jnp.float32)       # (5B, Dout)

    raw_params = init_params(kp, Din, H, Dout)
    pparams = prepare_params(raw_params)      # one-time fold/pad/bf16 cast

    # inference path (returns dict of disambiguated embeddings)
    fwd = jax.jit(
        lambda t, i, p: w2v_disambiguator_forward(t, i, p, Dout))
    out = fwd(text_embeds, image_embeds, pparams)
    jax.block_until_ready(out)
    assert out["text_disambiguated_embeds"].shape == (5 * B, Dout)
    assert out["image_disambiguated_embeds"].shape == (B, Dout)

    # training path (returns scalar loss)
    loss_fn = jax.jit(
        lambda t, i, p, l: w2v_disambiguator_forward(t, i, p, Dout, labels=l))
    loss = loss_fn(text_embeds, image_embeds, pparams, labels)
    jax.block_until_ready(loss)
    assert loss.shape == ()

    print("KERNEL_OK")
</pallas_src>

<mosaic_0001>
module attributes {stable_mosaic.version = 11 : i64} {
  func.func @_mlp_kernel(%arg0: i32, %arg1: memref<256x32xbf16, #tpu.memory_space<vmem>>, %arg2: memref<32x64xbf16, #tpu.memory_space<vmem>>, %arg3: memref<1x64xf32, #tpu.memory_space<vmem>>, %arg4: memref<64x64xbf16, #tpu.memory_space<vmem>>, %arg5: memref<1x64xf32, #tpu.memory_space<vmem>>, %arg6: memref<64x64xbf16, #tpu.memory_space<vmem>>, %arg7: memref<1x64xf32, #tpu.memory_space<vmem>>, %arg8: memref<64x128xbf16, #tpu.memory_space<vmem>>, %arg9: memref<1x128xf32, #tpu.memory_space<vmem>>, %arg10: memref<1x128xf32, #tpu.memory_space<vmem>>, %arg11: memref<1x128xf32, #tpu.memory_space<vmem>>, %arg12: memref<256x128xf32, #tpu.memory_space<vmem>>) attributes {dimension_semantics = [#tpu.dimension_semantics<parallel>], iteration_bounds = array<i64: 1>, scalar_prefetch = 0 : i64, scratch_operands = 0 : i64, tpu.core_type = #tpu.core_type<tc>, window_params = [{transform_indices = @transform_0, window_bounds = array<i64: 256, 32>}, {pipeline_mode = #tpu.pipeline_mode<synchronous>, transform_indices = @transform_1, window_bounds = array<i64: 32, 64>}, {pipeline_mode = #tpu.pipeline_mode<synchronous>, transform_indices = @transform_2, window_bounds = array<i64: 1, 64>}, {pipeline_mode = #tpu.pipeline_mode<synchronous>, transform_indices = @transform_3, window_bounds = array<i64: 64, 64>}, {pipeline_mode = #tpu.pipeline_mode<synchronous>, transform_indices = @transform_4, window_bounds = array<i64: 1, 64>}, {pipeline_mode = #tpu.pipeline_mode<synchronous>, transform_indices = @transform_5, window_bounds = array<i64: 64, 64>}, {pipeline_mode = #tpu.pipeline_mode<synchronous>, transform_indices = @transform_6, window_bounds = array<i64: 1, 64>}, {pipeline_mode = #tpu.pipeline_mode<synchronous>, transform_indices = @transform_7, window_bounds = array<i64: 64, 128>}, {pipeline_mode = #tpu.pipeline_mode<synchronous>, transform_indices = @transform_8, window_bounds = array<i64: 1, 128>}, {pipeline_mode = #tpu.pipeline_mode<synchronous>, transform_indices = @transform_9, window_bounds = array<i64: 1, 128>}, {pipeline_mode = #tpu.pipeline_mode<synchronous>, transform_indices = @transform_10, window_bounds = array<i64: 1, 128>}, {transform_indices = @transform_11, window_bounds = array<i64: 256, 128>}]} {
    %c0 = arith.constant 0 : index
    %c0_0 = arith.constant 0 : index
    %0 = vector.load %arg3[%c0, %c0_0] : memref<1x64xf32, #tpu.memory_space<vmem>>, vector<1x64xf32>
    %c0_1 = arith.constant 0 : index
    %c0_2 = arith.constant 0 : index
    %1 = vector.load %arg5[%c0_1, %c0_2] : memref<1x64xf32, #tpu.memory_space<vmem>>, vector<1x64xf32>
    %c0_3 = arith.constant 0 : index
    %c0_4 = arith.constant 0 : index
    %2 = vector.load %arg7[%c0_3, %c0_4] : memref<1x64xf32, #tpu.memory_space<vmem>>, vector<1x64xf32>
    %c0_5 = arith.constant 0 : index
    %c0_6 = arith.constant 0 : index
    %3 = vector.load %arg9[%c0_5, %c0_6] : memref<1x128xf32, #tpu.memory_space<vmem>>, vector<1x128xf32>
    %c0_7 = arith.constant 0 : index
    %c0_8 = arith.constant 0 : index
    %4 = vector.load %arg10[%c0_7, %c0_8] : memref<1x128xf32, #tpu.memory_space<vmem>>, vector<1x128xf32>
    %c0_9 = arith.constant 0 : index
    %c0_10 = arith.constant 0 : index
    %5 = vector.load %arg11[%c0_9, %c0_10] : memref<1x128xf32, #tpu.memory_space<vmem>>, vector<1x128xf32>
    %c0_11 = arith.constant 0 : index
    %c0_12 = arith.constant 0 : index
    %6 = vector.load %arg1[%c0_11, %c0_12] : memref<256x32xbf16, #tpu.memory_space<vmem>>, vector<256x32xbf16>
    %c0_13 = arith.constant 0 : index
    %c0_14 = arith.constant 0 : index
    %7 = vector.load %arg2[%c0_13, %c0_14] : memref<32x64xbf16, #tpu.memory_space<vmem>>, vector<32x64xbf16>
    %cst = arith.constant dense<0.000000e+00> : vector<256x64xf32>
    %8 = tpu.matmul %6, %7, %cst {dimension_numbers = #tpu.dot_dimension_numbers<[1], [0], [0], [1], [0, 0, 1, 1], [], []>} : vector<256x32xbf16>, vector<32x64xbf16>, vector<256x64xf32> -> vector<256x64xf32>
    %9 = vector.broadcast %0 : vector<1x64xf32> to vector<256x64xf32>
    %10 = arith.addf %8, %9 : vector<256x64xf32>
    %cst_15 = arith.constant 0.000000e+00 : f32
    %11 = vector.broadcast %cst_15 : f32 to vector<256x64xf32>
    %12 = arith.maximumf %10, %11 : vector<256x64xf32>
    %cst_16 = arith.constant dense<0.000000e+00> : vector<256xf32>
    %13 = vector.multi_reduction <add>, %12, %cst_16 [1] : vector<256x64xf32> to vector<256xf32>
    %14 = vector.shape_cast %13 : vector<256xf32> to vector<256x1xf32>
    %cst_17 = arith.constant 6.400000e+01 : f32
    %15 = vector.broadcast %cst_17 : f32 to vector<256x1xf32>
    %16 = arith.divf %14, %15 : vector<256x1xf32>
    %17 = vector.broadcast %16 : vector<256x1xf32> to vector<256x64xf32>
    %18 = arith.subf %12, %17 : vector<256x64xf32>
    %19 = arith.mulf %18, %18 : vector<256x64xf32>
    %cst_18 = arith.constant dense<0.000000e+00> : vector<256xf32>
    %20 = vector.multi_reduction <add>, %19, %cst_18 [1] : vector<256x64xf32> to vector<256xf32>
    %21 = vector.shape_cast %20 : vector<256xf32> to vector<256x1xf32>
    %cst_19 = arith.constant 6.400000e+01 : f32
    %22 = vector.broadcast %cst_19 : f32 to vector<256x1xf32>
    %23 = arith.divf %21, %22 : vector<256x1xf32>
    %cst_20 = arith.constant 9.99999974E-6 : f32
    %24 = vector.broadcast %cst_20 : f32 to vector<256x1xf32>
    %25 = arith.addf %23, %24 : vector<256x1xf32>
    %26 = math.rsqrt %25 : vector<256x1xf32>
    %27 = vector.broadcast %26 : vector<256x1xf32> to vector<256x64xf32>
    %28 = arith.mulf %18, %27 : vector<256x64xf32>
    %29 = arith.truncf %28 : vector<256x64xf32> to vector<256x64xbf16>
    %c0_21 = arith.constant 0 : index
    %c0_22 = arith.constant 0 : index
    %30 = vector.load %arg4[%c0_21, %c0_22] : memref<64x64xbf16, #tpu.memory_space<vmem>>, vector<64x64xbf16>
    %cst_23 = arith.constant dense<0.000000e+00> : vector<256x64xf32>
    %31 = tpu.matmul %29, %30, %cst_23 {dimension_numbers = #tpu.dot_dimension_numbers<[1], [0], [0], [1], [0, 0, 1, 1], [], []>} : vector<256x64xbf16>, vector<64x64xbf16>, vector<256x64xf32> -> vector<256x64xf32>
    %32 = vector.broadcast %1 : vector<1x64xf32> to vector<256x64xf32>
    %33 = arith.addf %31, %32 : vector<256x64xf32>
    %cst_24 = arith.constant 0.000000e+00 : f32
    %34 = vector.broadcast %cst_24 : f32 to vector<256x64xf32>
    %35 = arith.maximumf %33, %34 : vector<256x64xf32>
    %cst_25 = arith.constant dense<0.000000e+00> : vector<256xf32>
    %36 = vector.multi_reduction <add>, %35, %cst_25 [1] : vector<256x64xf32> to vector<256xf32>
    %37 = vector.shape_cast %36 : vector<256xf32> to vector<256x1xf32>
    %cst_26 = arith.constant 6.400000e+01 : f32
    %38 = vector.broadcast %cst_26 : f32 to vector<256x1xf32>
    %39 = arith.divf %37, %38 : vector<256x1xf32>
    %40 = vector.broadcast %39 : vector<256x1xf32> to vector<256x64xf32>
    %41 = arith.subf %35, %40 : vector<256x64xf32>
    %42 = arith.mulf %41, %41 : vector<256x64xf32>
    %cst_27 = arith.constant dense<0.000000e+00> : vector<256xf32>
    %43 = vector.multi_reduction <add>, %42, %cst_27 [1] : vector<256x64xf32> to vector<256xf32>
    %44 = vector.shape_cast %43 : vector<256xf32> to vector<256x1xf32>
    %cst_28 = arith.constant 6.400000e+01 : f32
    %45 = vector.broadcast %cst_28 : f32 to vector<256x1xf32>
    %46 = arith.divf %44, %45 : vector<256x1xf32>
    %cst_29 = arith.constant 9.99999974E-6 : f32
    %47 = vector.broadcast %cst_29 : f32 to vector<256x1xf32>
    %48 = arith.addf %46, %47 : vector<256x1xf32>
    %49 = math.rsqrt %48 : vector<256x1xf32>
    %50 = vector.broadcast %49 : vector<256x1xf32> to vector<256x64xf32>
    %51 = arith.mulf %41, %50 : vector<256x64xf32>
    %52 = arith.truncf %51 : vector<256x64xf32> to vector<256x64xbf16>
    %c0_30 = arith.constant 0 : index
    %c0_31 = arith.constant 0 : index
    %53 = vector.load %arg6[%c0_30, %c0_31] : memref<64x64xbf16, #tpu.memory_space<vmem>>, vector<64x64xbf16>
    %cst_32 = arith.constant dense<0.000000e+00> : vector<256x64xf32>
    %54 = tpu.matmul %52, %53, %cst_32 {dimension_numbers = #tpu.dot_dimension_numbers<[1], [0], [0], [1], [0, 0, 1, 1], [], []>} : vector<256x64xbf16>, vector<64x64xbf16>, vector<256x64xf32> -> vector<256x64xf32>
    %55 = vector.broadcast %2 : vector<1x64xf32> to vector<256x64xf32>
    %56 = arith.addf %54, %55 : vector<256x64xf32>
    %cst_33 = arith.constant 0.000000e+00 : f32
    %57 = vector.broadcast %cst_33 : f32 to vector<256x64xf32>
    %58 = arith.maximumf %56, %57 : vector<256x64xf32>
    %59 = arith.addf %58, %12 : vector<256x64xf32>
    %60 = arith.truncf %59 : vector<256x64xf32> to vector<256x64xbf16>
    %c0_34 = arith.constant 0 : index
    %c0_35 = arith.constant 0 : index
    %61 = vector.load %arg8[%c0_34, %c0_35] : memref<64x128xbf16, #tpu.memory_space<vmem>>, vector<64x128xbf16>
    %cst_36 = arith.constant dense<0.000000e+00> : vector<256x128xf32>
    %62 = tpu.matmul %60, %61, %cst_36 {dimension_numbers = #tpu.dot_dimension_numbers<[1], [0], [0], [1], [0, 0, 1, 1], [], []>} : vector<256x64xbf16>, vector<64x128xbf16>, vector<256x128xf32> -> vector<256x128xf32>
    %63 = vector.broadcast %3 : vector<1x128xf32> to vector<256x128xf32>
    %64 = arith.addf %62, %63 : vector<256x128xf32>
    %cst_37 = arith.constant dense<0.000000e+00> : vector<256xf32>
    %65 = vector.multi_reduction <add>, %64, %cst_37 [1] : vector<256x128xf32> to vector<256xf32>
    %66 = vector.shape_cast %65 : vector<256xf32> to vector<256x1xf32>
    %cst_38 = arith.constant 6.250000e-02 : f32
    %67 = vector.broadcast %cst_38 : f32 to vector<256x1xf32>
    %68 = arith.mulf %66, %67 : vector<256x1xf32>
    %69 = arith.mulf %64, %64 : vector<256x128xf32>
    %cst_39 = arith.constant dense<0.000000e+00> : vector<256xf32>
    %70 = vector.multi_reduction <add>, %69, %cst_39 [1] : vector<256x128xf32> to vector<256xf32>
    %71 = vector.shape_cast %70 : vector<256xf32> to vector<256x1xf32>
    %cst_40 = arith.constant 6.250000e-02 : f32
    %72 = vector.broadcast %cst_40 : f32 to vector<256x1xf32>
    %73 = arith.mulf %71, %72 : vector<256x1xf32>
    %74 = arith.mulf %68, %68 : vector<256x1xf32>
    %75 = arith.subf %73, %74 : vector<256x1xf32>
    %cst_41 = arith.constant 0.000000e+00 : f32
    %76 = vector.broadcast %cst_41 : f32 to vector<256x1xf32>
    %77 = arith.maximumf %75, %76 : vector<256x1xf32>
    %78 = vector.broadcast %68 : vector<256x1xf32> to vector<256x128xf32>
    %79 = arith.subf %64, %78 : vector<256x128xf32>
    %cst_42 = arith.constant 9.99999974E-6 : f32
    %80 = vector.broadcast %cst_42 : f32 to vector<256x1xf32>
    %81 = arith.addf %77, %80 : vector<256x1xf32>
    %82 = math.rsqrt %81 : vector<256x1xf32>
    %83 = vector.broadcast %82 : vector<256x1xf32> to vector<256x128xf32>
    %84 = arith.mulf %79, %83 : vector<256x128xf32>
    %85 = vector.broadcast %4 : vector<1x128xf32> to vector<256x128xf32>
    %86 = arith.mulf %84, %85 : vector<256x128xf32>
    %87 = vector.broadcast %5 : vector<1x128xf32> to vector<256x128xf32>
    %88 = arith.addf %86, %87 : vector<256x128xf32>
    %c0_43 = arith.constant 0 : index
    %c0_44 = arith.constant 0 : index
    %89 = vector.load %arg12[%c0_43, %c0_44] : memref<256x128xf32, #tpu.memory_space<vmem>>, vector<256x128xf32>
    tpu.vector_store %arg12[%c0_43, %c0_44], %88 {strides = array<i32>} : memref<256x128xf32, #tpu.memory_space<vmem>>, vector<256x128xf32>,
    return
  }
  func.func @transform_0(%arg0: i32) -> (i32, i32) {
    %c0_i32 = arith.constant 0 : i32
    %c0_i32_0 = arith.constant 0 : i32
    return %arg0, %c0_i32 : i32, i32
  }
  func.func @transform_1(%arg0: i32) -> (i32, i32) {
    %c0_i32 = arith.constant 0 : i32
    %c0_i32_0 = arith.constant 0 : i32
    %c0_i32_1 = arith.constant 0 : i32
    return %c0_i32, %c0_i32_0 : i32, i32
  }
  func.func @transform_2(%arg0: i32) -> (i32, i32) {
    %c0_i32 = arith.constant 0 : i32
    %c0_i32_0 = arith.constant 0 : i32
    %c0_i32_1 = arith.constant 0 : i32
    return %c0_i32, %c0_i32_0 : i32, i32
  }
  func.func @transform_3(%arg0: i32) -> (i32, i32) {
    %c0_i32 = arith.constant 0 : i32
    %c0_i32_0 = arith.constant 0 : i32
    %c0_i32_1 = arith.constant 0 : i32
    return %c0_i32, %c0_i32_0 : i32, i32
  }
  func.func @transform_4(%arg0: i32) -> (i32, i32) {
    %c0_i32 = arith.constant 0 : i32
    %c0_i32_0 = arith.constant 0 : i32
    %c0_i32_1 = arith.constant 0 : i32
    return %c0_i32, %c0_i32_0 : i32, i32
  }
  func.func @transform_5(%arg0: i32) -> (i32, i32) {
    %c0_i32 = arith.constant 0 : i32
    %c0_i32_0 = arith.constant 0 : i32
    %c0_i32_1 = arith.constant 0 : i32
    return %c0_i32, %c0_i32_0 : i32, i32
  }
  func.func @transform_6(%arg0: i32) -> (i32, i32) {
    %c0_i32 = arith.constant 0 : i32
    %c0_i32_0 = arith.constant 0 : i32
    %c0_i32_1 = arith.constant 0 : i32
    return %c0_i32, %c0_i32_0 : i32, i32
  }
  func.func @transform_7(%arg0: i32) -> (i32, i32) {
    %c0_i32 = arith.constant 0 : i32
    %c0_i32_0 = arith.constant 0 : i32
    %c0_i32_1 = arith.constant 0 : i32
    return %c0_i32, %c0_i32_0 : i32, i32
  }
  func.func @transform_8(%arg0: i32) -> (i32, i32) {
    %c0_i32 = arith.constant 0 : i32
    %c0_i32_0 = arith.constant 0 : i32
    %c0_i32_1 = arith.constant 0 : i32
    return %c0_i32, %c0_i32_0 : i32, i32
  }
  func.func @transform_9(%arg0: i32) -> (i32, i32) {
    %c0_i32 = arith.constant 0 : i32
    %c0_i32_0 = arith.constant 0 : i32
    %c0_i32_1 = arith.constant 0 : i32
    return %c0_i32, %c0_i32_0 : i32, i32
  }
  func.func @transform_10(%arg0: i32) -> (i32, i32) {
    %c0_i32 = arith.constant 0 : i32
    %c0_i32_0 = arith.constant 0 : i32
    %c0_i32_1 = arith.constant 0 : i32
    return %c0_i32, %c0_i32_0 : i32, i32
  }
  func.func @transform_11(%arg0: i32) -> (i32, i32) {
    %c0_i32 = arith.constant 0 : i32
    %c0_i32_0 = arith.constant 0 : i32
    return %arg0, %c0_i32 : i32, i32
  }
}

</mosaic_0001>

<bundles_post_ra>
// kernel: _lambda_.1
= control target key start
LH: loop header
LB: loop body
LE: loop exit
PB: predicated region body
PF: predicated region fallthrough
CT: control target
= control target key end

     0   :  { %vm179_vm0 = vcmask 261120   ;;  %vm421_vm1 = vcmask 523264   ;;  %s4967_s1 = inlined_call_operand.vmem [shape: bf16[32,64], index: 1, kind: input, shape index: {}]   ;;  %s4968_s0 = inlined_call_operand.vmem [shape: bf16[256,32], index: 0, kind: input, shape index: {}]   ;;  %s4969_s2 = inlined_call_operand.vmem [shape: f32[1,64], index: 2, kind: input, shape index: {}]   ;;  %s4970_s3 = inlined_call_operand.vmem [shape: bf16[64,64], index: 3, kind: input, shape index: {}]   ;;  %s4971_s4 = inlined_call_operand.vmem [shape: f32[1,64], index: 4, kind: input, shape index: {}]   ;;  %s4972_s5 = inlined_call_operand.vmem [shape: bf16[64,64], index: 5, kind: input, shape index: {}]   ;;  %s4973_s7 = inlined_call_operand.vmem [shape: bf16[64,128], index: 7, kind: input, shape index: {}]   ;;  %s4974_s6 = inlined_call_operand.vmem [shape: f32[1,64], index: 6, kind: input, shape index: {}]   ;;  %s4975_s8 = inlined_call_operand.vmem [shape: f32[1,128], index: 8, kind: input, shape index: {}]   ;;  %s4976_s9 = inlined_call_operand.vmem [shape: f32[1,128], index: 9, kind: input, shape index: {}]   ;;  %s4977_s10 = inlined_call_operand.vmem [shape: f32[1,128], index: 10, kind: input, shape index: {}]   ;;  %s4978_s11 = inlined_call_operand.vmem [shape: f32[256,128], index: 11, kind: output, shape index: {}]  }
   0x1   :  { %v3034_v0 = vld [vmem:[%s4967_s1] sm:$0xff]   ;;  %v3035_v1 = vld [vmem:[%s4967_s1 + $0x8] sm:$0xff]   ;;  %v3038_v4 = vld [vmem:[%s4968_s0 + $0x10] sm:$0xff]  }
   0x2   :  { %2878 = vmatprep.subr.bf16.mxu0 %v3034_v0  ;;  %v3036_v2 = vld [vmem:[%s4968_s0] sm:$0xff]   ;;  %v3037_v3 = vld [vmem:[%s4968_s0 + $0x8] sm:$0xff]   ;;  %v3039_v5 = vld [vmem:[%s4968_s0 + $0x18] sm:$0xff]  }
   0x3   :  { %2879 = vmatpush3.bf16.msra.mxu0 %v3034_v0  ;;  %2882 = vmatprep.mubr.msk.bf16.mxu0 %vm179_vm0, %v3036_v2  ;;  %v3040_v6 = vld [vmem:[%s4968_s0 + $0x20] sm:$0xff]   ;;  %v3041_v7 = vld [vmem:[%s4968_s0 + $0x28] sm:$0xff]   ;;  %v3042_v8 = vld [vmem:[%s4968_s0 + $0x30] sm:$0xff]  }
   0x4   :  { %2880 = vmatprep.subr.bf16.mxu0 %v3035_v1  ;;  %v3043_v9 = vld [vmem:[%s4968_s0 + $0x38] sm:$0xff]   ;;  %v3044_v10 = vld [vmem:[%s4968_s0 + $0x40] sm:$0xff]   ;;  %v3045_v11 = vld [vmem:[%s4968_s0 + $0x48] sm:$0xff]  }
   0x5   :  { %v3046_v12 = vld [vmem:[%s4968_s0 + $0x50] sm:$0xff]   ;;  %v3047_v13 = vld [vmem:[%s4968_s0 + $0x58] sm:$0xff]   ;;  %v3048_v14 = vld [vmem:[%s4968_s0 + $0x60] sm:$0xff]  }
   0x6   :  { %v3049_v15 = vld [vmem:[%s4968_s0 + $0x68] sm:$0xff]   ;;  %v3050_v16 = vld [vmem:[%s4968_s0 + $0x70] sm:$0xff]   ;;  %v3051_v17 = vld [vmem:[%s4968_s0 + $0x78] sm:$0xff]  }
   0x7   :  { %2881 = vmatpush3.bf16.msra.mxu0 %v3035_v1  ;;  %v3389_v18 = vld [vmem:[%s4969_s2] ss:$0 sm:$0xff] }
   0xa   :  { %2883 = vmatmul.mubr.msk.bf16.vlgmr.msra.gmra.mrb[0].mxu0 %vm179_vm0, %v3037_v3 }
   0xb   :  { %2886 = vmatprep.mubr.msk.bf16.mxu0 %vm179_vm0, %v3038_v4 }
  0x12   :  { %2887 = vmatmul.mubr.msk.bf16.gmra.mrb[4].mxu0 %vm179_vm0, %v3039_v5 }
  0x13   :  { %2890 = vmatprep.mubr.msk.bf16.mxu0 %vm179_vm0, %v3040_v6 }
  0x1a   :  { %2891 = vmatmul.mubr.msk.bf16.gmra.mrb[8].mxu0 %vm179_vm0, %v3041_v7 }
  0x1b   :  { %2894 = vmatprep.mubr.msk.bf16.mxu0 %vm179_vm0, %v3042_v8 }
  0x22   :  { %2895 = vmatmul.mubr.msk.bf16.gmra.mrb[12].mxu0 %vm179_vm0, %v3043_v9 }
  0x23   :  { %2898 = vmatprep.mubr.msk.bf16.mxu0 %vm179_vm0, %v3044_v10 }
  0x2a   :  { %2899 = vmatmul.mubr.msk.bf16.gmra.mrb[16].mxu0 %vm179_vm0, %v3045_v11 }
  0x2b   :  { %2902 = vmatprep.mubr.msk.bf16.mxu0 %vm179_vm0, %v3046_v12 }
  0x32   :  { %2903 = vmatmul.mubr.msk.bf16.gmra.mrb[20].mxu0 %vm179_vm0, %v3047_v13 }
  0x33   :  { %2906 = vmatprep.mubr.msk.bf16.mxu0 %vm179_vm0, %v3048_v14 }
  0x3a   :  { %2907 = vmatmul.mubr.msk.bf16.gmra.mrb[24].mxu0 %vm179_vm0, %v3049_v15 }
  0x3b   :  { %2910 = vmatprep.mubr.msk.bf16.mxu0 %vm179_vm0, %v3050_v16 }
  0x42   :  { %2911 = vmatmul.mubr.msk.bf16.gmra.mrb[28].mxu0 %vm179_vm0, %v3051_v17 }
  0xdd   :  { %v2884_v19 = vpop.f32.mrb[0].mxu0 }
  0xde   :  { %v271_v20 = vadd.f32 %v2884_v19, %v3389_v18  ;;  %v262_v21 = vpop.f32.mrb[1].mxu0 }
  0xdf   :  { %v263_v22 = vadd.f32 %v3389_v18, %v262_v21  ;;  %v2885_v23 = vpop.f32.mrb[2].mxu0 }
  0xe0   :  { %v3393_v24 = vmax.f32 %v271_v20, 0.0  ;;  %v274_v25 = vadd.f32 %v2885_v23, %v3389_v18  ;;  %v265_v26 = vpop.f32.mrb[3].mxu0 }
  0xe1   :  { %v3396_v27 = vmax.f32 %v263_v22, 0.0  ;;  %v266_v28 = vadd.f32 %v3389_v18, %v265_v26 }
  0xe2   :  { %v3399_v29 = vmax.f32 %v274_v25, 0.0  ;;  %v428_v30 = vsel %vm421_vm1, %v3393_v24, 0.0 }
  0xe3   :  { %v3403_v31 = vmax.f32 %v266_v28, 0.0  ;;  %429 = vadd.xlane.f32.xlu1 %v428_v30  ;;  %v422_v32 = vsel %vm421_vm1, %v3396_v27, 0.0 }
  0xe4   :  { %423 = vadd.xlane.f32.xlu0 %v422_v32  ;;  %v431_v36 = vsel %vm421_vm1, %v3399_v29, 0.0 }
  0xe5   :  { %v2888_v33 = vpop.f32.mrb[4].mxu0  ;;  %v425_v39 = vsel %vm421_vm1, %v3403_v31, 0.0 }
  0xe6   :  { %v287_v34 = vadd.f32 %v2888_v33, %v3389_v18  ;;  %v278_v35 = vpop.f32.mrb[5].mxu0 }
  0xe7   :  { %v279_v37 = vadd.f32 %v3389_v18, %v278_v35  ;;  %432 = vadd.xlane.f32.xlu1 %v431_v36  ;;  %v2889_v38 = vpop.f32.mrb[6].mxu0 }
  0xe8   :  { %v290_v40 = vadd.f32 %v2889_v38, %v3389_v18  ;;  %v281_v41 = vpop.f32.mrb[7].mxu0  ;;  %426 = vadd.xlane.f32.xlu0 %v425_v39  ;;  %v3414_v42 = vmax.f32 %v287_v34, 0.0 }
  0xe9   :  { %v3416_v43 = vmax.f32 %v279_v37, 0.0  ;;  %v282_v44 = vadd.f32 %v3389_v18, %v281_v41 }
  0xea   :  { %v3419_v45 = vmax.f32 %v290_v40, 0.0  ;;  %v440_v50 = vsel %vm421_vm1, %v3414_v42, 0.0 }
  0xeb   :  { %v3421_v46 = vmax.f32 %v282_v44, 0.0  ;;  %v434_v47 = vsel %vm421_vm1, %v3416_v43, 0.0 }
  0xec   :  { %435 = vadd.xlane.f32.xlu0 %v434_v47  ;;  %v443_v55 = vsel %vm421_vm1, %v3419_v45, 0.0 }
  0xed   :  { %v2892_v48 = vpop.f32.mrb[8].mxu0  ;;  %v437_v49 = vsel %vm421_vm1, %v3421_v46, 0.0 }
  0xee   :  { %v303_v51 = vadd.f32 %v2892_v48, %v3389_v18  ;;  %v294_v52 = vpop.f32.mrb[9].mxu0  ;;  %438 = vadd.xlane.f32.xlu1 %v437_v49 }
  0xef   :  { %v295_v53 = vadd.f32 %v3389_v18, %v294_v52  ;;  %v2893_v54 = vpop.f32.mrb[10].mxu0 }
  0xf0   :  { %v306_v56 = vadd.f32 %v2893_v54, %v3389_v18  ;;  %v297_v57 = vpop.f32.mrb[11].mxu0  ;;  %441 = vadd.xlane.f32.xlu0 %v440_v50  ;;  %v3434_v58 = vmax.f32 %v303_v51, 0.0 }
  0xf1   :  { %v3436_v59 = vmax.f32 %v295_v53, 0.0  ;;  %v298_v60 = vadd.f32 %v3389_v18, %v297_v57 }
  0xf2   :  { %444 = vadd.xlane.f32.xlu1 %v443_v55  ;;  %v3439_v61 = vmax.f32 %v306_v56, 0.0  ;;  %v452_v2 = vsel %vm421_vm1, %v3434_v58, 0.0 }
  0xf3   :  { %v3441_v62 = vmax.f32 %v298_v60, 0.0  ;;  %v446_v63 = vsel %vm421_vm1, %v3436_v59, 0.0 }
  0xf4   :  { %447 = vadd.xlane.f32.xlu0 %v446_v63  ;;  %v455_v7 = vsel %vm421_vm1, %v3439_v61, 0.0 }
  0xf5   :  { %v2896_v0 = vpop.f32.mrb[12].mxu0  ;;  %v449_v1 = vsel %vm421_vm1, %v3441_v62, 0.0 }
  0xf6   :  { %v319_v3 = vadd.f32 %v2896_v0, %v3389_v18  ;;  %v310_v4 = vpop.f32.mrb[13].mxu0  ;;  %450 = vadd.xlane.f32.xlu1 %v449_v1 }
  0xf7   :  { %v311_v5 = vadd.f32 %v3389_v18, %v310_v4  ;;  %v2897_v6 = vpop.f32.mrb[14].mxu0 }
  0xf8   :  { %v322_v8 = vadd.f32 %v2897_v6, %v3389_v18  ;;  %v313_v9 = vpop.f32.mrb[15].mxu0  ;;  %453 = vadd.xlane.f32.xlu0 %v452_v2  ;;  %v3454_v10 = vmax.f32 %v319_v3, 0.0 }
  0xf9   :  { %v3456_v11 = vmax.f32 %v311_v5, 0.0  ;;  %v314_v12 = vadd.f32 %v3389_v18, %v313_v9 }
  0xfa   :  { %456 = vadd.xlane.f32.xlu1 %v455_v7  ;;  %v3459_v13 = vmax.f32 %v322_v8, 0.0  ;;  %v464_v19 = vsel %vm421_vm1, %v3454_v10, 0.0 }
  0xfb   :  { %5022 = vst [vmem:[#allocation2_spill] sm:$0xff] %v3456_v11  ;;  %v3461_v14 = vmax.f32 %v314_v12, 0.0  ;;  %v458_v15 = vsel %vm421_vm1, %v3456_v11, 0.0 }
  0xfc   :  { %5023 = vst [vmem:[#allocation3_spill] sm:$0xff] %v3459_v13  ;;  %459 = vadd.xlane.f32.xlu0 %v458_v15  ;;  %v467_v25 = vsel %vm421_vm1, %v3459_v13, 0.0 }
  0xfd   :  { %5024 = vst [vmem:[#allocation4_spill] sm:$0xff] %v3461_v14  ;;  %v2900_v16 = vpop.f32.mrb[16].mxu0  ;;  %v461_v17 = vsel %vm421_vm1, %v3461_v14, 0.0 }
  0xfe   :  { %v335_v20 = vadd.f32 %v2900_v16, %v3389_v18  ;;  %v326_v21 = vpop.f32.mrb[17].mxu0  ;;  %462 = vadd.xlane.f32.xlu1 %v461_v17 }
  0xff   :  { %v327_v22 = vadd.f32 %v3389_v18, %v326_v21  ;;  %v2901_v23 = vpop.f32.mrb[18].mxu0 }
 0x100   :  { %v338_v26 = vadd.f32 %v2901_v23, %v3389_v18  ;;  %v329_v28 = vpop.f32.mrb[19].mxu0  ;;  %465 = vadd.xlane.f32.xlu0 %v464_v19  ;;  %v3474_v30 = vmax.f32 %v335_v20, 0.0 }
 0x101   :  { %v3476_v32 = vmax.f32 %v327_v22, 0.0  ;;  %v330_v33 = vadd.f32 %v3389_v18, %v329_v28 }
 0x102   :  { %5025 = vst [vmem:[#allocation5_spill] sm:$0xff] %v3474_v30  ;;  %468 = vadd.xlane.f32.xlu1 %v467_v25  ;;  %v3479_v34 = vmax.f32 %v338_v26, 0.0  ;;  %v476_v39 = vsel %vm421_vm1, %v3474_v30, 0.0 }
 0x103   :  { %5026 = vst [vmem:[#allocation6_spill] sm:$0xff] %v3476_v32  ;;  %v3481_v35 = vmax.f32 %v330_v33, 0.0  ;;  %v470_v36 = vsel %vm421_vm1, %v3476_v32, 0.0 }
 0x104   :  { %5027 = vst [vmem:[#allocation7_spill] sm:$0xff] %v3479_v34  ;;  %471 = vadd.xlane.f32.xlu0 %v470_v36  ;;  %v479_v48 = vsel %vm421_vm1, %v3479_v34, 0.0 }
 0x105   :  { %5028 = vst [vmem:[#allocation8_spill] sm:$0xff] %v3481_v35  ;;  %v2904_v37 = vpop.f32.mrb[20].mxu0  ;;  %v473_v38 = vsel %vm421_vm1, %v3481_v35, 0.0 }
 0x106   :  { %v351_v40 = vadd.f32 %v2904_v37, %v3389_v18  ;;  %v342_v41 = vpop.f32.mrb[21].mxu0  ;;  %474 = vadd.xlane.f32.xlu1 %v473_v38 }
 0x107   :  { %v343_v44 = vadd.f32 %v3389_v18, %v342_v41  ;;  %v2905_v47 = vpop.f32.mrb[22].mxu0 }
 0x108   :  { %v354_v49 = vadd.f32 %v2905_v47, %v3389_v18  ;;  %v345_v50 = vpop.f32.mrb[23].mxu0  ;;  %477 = vadd.xlane.f32.xlu0 %v476_v39  ;;  %v3494_v51 = vmax.f32 %v351_v40, 0.0 }
 0x109   :  { %v3496_v52 = vmax.f32 %v343_v44, 0.0  ;;  %v346_v53 = vadd.f32 %v3389_v18, %v345_v50 }
 0x10a   :  { %5029 = vst [vmem:[#allocation9_spill] sm:$0xff] %v3494_v51  ;;  %480 = vadd.xlane.f32.xlu1 %v479_v48  ;;  %v3499_v54 = vmax.f32 %v354_v49, 0.0  ;;  %v488_v63 = vsel %vm421_vm1, %v3494_v51, 0.0 }
 0x10b   :  { %5030 = vst [vmem:[#allocation10_spill] sm:$0xff] %v3496_v52  ;;  %v3501_v55 = vmax.f32 %v346_v53, 0.0  ;;  %v482_v56 = vsel %vm421_vm1, %v3496_v52, 0.0 }
 0x10c   :  { %5031 = vst [vmem:[#allocation11_spill] sm:$0xff] %v3499_v54  ;;  %483 = vadd.xlane.f32.xlu0 %v482_v56  ;;  %v491_v4 = vsel %vm421_vm1, %v3499_v54, 0.0 }
 0x10d   :  { %5032 = vst [vmem:[#allocation12_spill] sm:$0xff] %v3501_v55  ;;  %v2908_v57 = vpop.f32.mrb[24].mxu0  ;;  %v485_v60 = vsel %vm421_vm1, %v3501_v55, 0.0 }
 0x10e   :  { %v367_v0 = vadd.f32 %v2908_v57, %v3389_v18  ;;  %v358_v1 = vpop.f32.mrb[25].mxu0  ;;  %486 = vadd.xlane.f32.xlu1 %v485_v60 }
 0x10f   :  { %v359_v2 = vadd.f32 %v3389_v18, %v358_v1  ;;  %v2909_v3 = vpop.f32.mrb[26].mxu0 }
 0x110   :  { %v370_v5 = vadd.f32 %v2909_v3, %v3389_v18  ;;  %v361_v6 = vpop.f32.mrb[27].mxu0  ;;  %489 = vadd.xlane.f32.xlu0 %v488_v63  ;;  %v3514_v7 = vmax.f32 %v367_v0, 0.0 }
 0x111   :  { %v3516_v8 = vmax.f32 %v359_v2, 0.0  ;;  %v362_v9 = vadd.f32 %v3389_v18, %v361_v6 }
 0x112   :  { %5033 = vst [vmem:[#allocation13_spill] sm:$0xff] %v3514_v7  ;;  %492 = vadd.xlane.f32.xlu1 %v491_v4  ;;  %v3519_v12 = vmax.f32 %v370_v5, 0.0  ;;  %v500_v20 = vsel %vm421_vm1, %v3514_v7, 0.0 }
 0x113   :  { %5034 = vst [vmem:[#allocation14_spill] sm:$0xff] %v3516_v8  ;;  %v3521_v15 = vmax.f32 %v362_v9, 0.0  ;;  %v494_v16 = vsel %vm421_vm1, %v3516_v8, 0.0 }
 0x114   :  { %5035 = vst [vmem:[#allocation15_spill] sm:$0xff] %v3519_v12  ;;  %495 = vadd.xlane.f32.xlu0 %v494_v16  ;;  %v503_v26 = vsel %vm421_vm1, %v3519_v12, 0.0 }
 0x115   :  { %5036 = vst [vmem:[#allocation16_spill] sm:$0xff] %v3521_v15  ;;  %v2912_v17 = vpop.f32.mrb[28].mxu0  ;;  %v497_v19 = vsel %vm421_vm1, %v3521_v15, 0.0 }
 0x116   :  { %v383_v21 = vadd.f32 %v2912_v17, %v3389_v18  ;;  %v374_v22 = vpop.f32.mrb[29].mxu0  ;;  %498 = vadd.xlane.f32.xlu1 %v497_v19 }
 0x117   :  { %v375_v23 = vadd.f32 %v3389_v18, %v374_v22  ;;  %v2913_v25 = vpop.f32.mrb[30].mxu0 }
 0x118   :  { %v386_v28 = vadd.f32 %v2913_v25, %v3389_v18  ;;  %v377_v33 = vpop.f32.mrb[31].mxu0  ;;  %501 = vadd.xlane.f32.xlu0 %v500_v20  ;;  %v3534_v36 = vmax.f32 %v383_v21, 0.0 }
 0x119   :  { %v3536_v37 = vmax.f32 %v375_v23, 0.0  ;;  %v378_v38 = vadd.f32 %v3389_v18, %v377_v33 }
 0x11a   :  { %5037 = vst [vmem:[#allocation17_spill] sm:$0xff] %v3534_v36  ;;  %504 = vadd.xlane.f32.xlu1 %v503_v26  ;;  %v3539_v39 = vmax.f32 %v386_v28, 0.0  ;;  %v512_v47 = vsel %vm421_vm1, %v3534_v36, 0.0 }
 0x11b   :  { %5038 = vst [vmem:[#allocation18_spill] sm:$0xff] %v3536_v37  ;;  %v3541_v40 = vmax.f32 %v378_v38, 0.0  ;;  %v506_v41 = vsel %vm421_vm1, %v3536_v37, 0.0 }
 0x11c   :  { %5039 = vst [vmem:[#allocation19_spill] sm:$0xff] %v3539_v39  ;;  %507 = vadd.xlane.f32.xlu0 %v506_v41  ;;  %v515_v48 = vsel %vm421_vm1, %v3539_v39, 0.0 }
 0x11d   :  { %5040 = vst [vmem:[#allocation20_spill] sm:$0xff] %v3541_v40  ;;  %v509_v44 = vsel %vm421_vm1, %v3541_v40, 0.0 }
 0x11e   :  { %510 = vadd.xlane.f32.xlu1 %v509_v44 }
 0x120   :  { %513 = vadd.xlane.f32.xlu0 %v512_v47 }
 0x122   :  { %516 = vadd.xlane.f32.xlu1 %v515_v48 }
 0x170   :  { %v430_v18 = vpop.xlane.xlu1 %429 }
 0x171   :  { %v521_v49 = vmul.f32 0.015625, %v430_v18  ;;  %v424_v50 = vpop.xlane.xlu0 %423 }
 0x172   :  { %v519_v53 = vmul.f32 0.015625, %v424_v50 }
 0x173   :  { %v3552_v56 = vsub.f32 %v3393_v24, %v521_v49 }
 0x174   :  { %v3555_v57 = vsub.f32 %v3396_v27, %v519_v53  ;;  %v433_v60 = vpop.xlane.xlu1 %432 }
 0x175   :  { %v522_v63 = vmul.f32 0.015625, %v433_v60  ;;  %v427_v0 = vpop.xlane.xlu0 %426  ;;  %v585_v6 = vmul.f32 %v3552_v56, %v3552_v56 }
 0x176   :  { %v520_v1 = vmul.f32 0.015625, %v427_v0  ;;  %v583_v2 = vmul.f32 %v3555_v57, %v3555_v57 }
 0x177   :  { %v3560_v3 = vsub.f32 %v3399_v29, %v522_v63  ;;  %v621_v23 = vsel %vm421_vm1, %v585_v6, 0.0 }
 0x178   :  { %v3563_v4 = vsub.f32 %v3403_v31, %v520_v1  ;;  %v615_v5 = vsel %vm421_vm1, %v583_v2, 0.0 }
 0x179   :  { %616 = vadd.xlane.f32.xlu0 %v615_v5  ;;  %v436_v9 = vpop.xlane.xlu0 %435  ;;  %v586_v20 = vmul.f32 %v3560_v3, %v3560_v3 }
 0x17a   :  { %v523_v16 = vmul.f32 0.015625, %v436_v9  ;;  %v584_v17 = vmul.f32 %v3563_v4, %v3563_v4 }
 0x17b   :  { %v439_v19 = vpop.xlane.xlu1 %438  ;;  %v624_v44 = vsel %vm421_vm1, %v586_v20, 0.0 }
 0x17c   :  { %v3573_v21 = vsub.f32 %v3416_v43, %v523_v16  ;;  %v524_v22 = vmul.f32 0.015625, %v439_v19  ;;  %v618_v25 = vsel %vm421_vm1, %v584_v17, 0.0 }
 0x17d   :  { %622 = vadd.xlane.f32.xlu0 %v621_v23  ;;  %619 = vadd.xlane.f32.xlu1 %v618_v25  ;;  %v442_v26 = vpop.xlane.xlu0 %441 }
 0x17e   :  { %v3578_v28 = vsub.f32 %v3421_v46, %v524_v22  ;;  %v525_v33 = vmul.f32 0.015625, %v442_v26  ;;  %v587_v38 = vmul.f32 %v3573_v21, %v3573_v21 }
 0x17f   :  { %v445_v41 = vpop.xlane.xlu1 %444 }
 0x180   :  { %v3584_v47 = vsub.f32 %v3414_v42, %v525_v33  ;;  %v526_v48 = vmul.f32 0.015625, %v445_v41  ;;  %v627_v18 = vsel %vm421_vm1, %v587_v38, 0.0  ;;  %v588_v49 = vmul.f32 %v3578_v28, %v3578_v28 }
 0x181   :  { %625 = vadd.xlane.f32.xlu1 %v624_v44  ;;  %628 = vadd.xlane.f32.xlu0 %v627_v18  ;;  %v448_v50 = vpop.xlane.xlu0 %447 }
 0x182   :  { %v3590_v53 = vsub.f32 %v3419_v45, %v526_v48  ;;  %v527_v60 = vmul.f32 0.015625, %v448_v50  ;;  %v589_v63 = vmul.f32 %v3584_v47, %v3584_v47  ;;  %v630_v1 = vsel %vm421_vm1, %v588_v49, 0.0 }
 0x183   :  { %v451_v0 = vpop.xlane.xlu1 %450 }
 0x184   :  { %v3596_v2 = vsub.f32 %v3436_v59, %v527_v60  ;;  %v528_v5 = vmul.f32 0.015625, %v451_v0  ;;  %v633_v6 = vsel %vm421_vm1, %v589_v63, 0.0  ;;  %v590_v9 = vmul.f32 %v3590_v53, %v3590_v53 }
 0x185   :  { %631 = vadd.xlane.f32.xlu1 %v630_v1  ;;  %634 = vadd.xlane.f32.xlu0 %v633_v6  ;;  %v454_v16 = vpop.xlane.xlu0 %453 }
 0x186   :  { %v3602_v17 = vsub.f32 %v3441_v62, %v528_v5  ;;  %v529_v19 = vmul.f32 0.015625, %v454_v16  ;;  %v591_v20 = vmul.f32 %v3596_v2, %v3596_v2  ;;  %v636_v23 = vsel %vm421_vm1, %v590_v9, 0.0 }
 0x187   :  { %v457_v22 = vpop.xlane.xlu1 %456 }
 0x188   :  { %v3608_v25 = vsub.f32 %v3434_v58, %v529_v19  ;;  %v530_v26 = vmul.f32 0.015625, %v457_v22  ;;  %v639_v33 = vsel %vm421_vm1, %v591_v20, 0.0  ;;  %v592_v38 = vmul.f32 %v3602_v17, %v3602_v17 }
 0x189   :  { %637 = vadd.xlane.f32.xlu1 %v636_v23  ;;  %640 = vadd.xlane.f32.xlu0 %v639_v33  ;;  %v460_v41 = vpop.xlane.xlu0 %459 }
 0x18a   :  { %v3614_v44 = vsub.f32 %v3439_v61, %v530_v26  ;;  %v531_v48 = vmul.f32 0.015625, %v460_v41  ;;  %v593_v18 = vmul.f32 %v3608_v25, %v3608_v25  ;;  %v642_v50 = vsel %vm421_vm1, %v592_v38, 0.0  ;;  %v3052_v41 = vld [vmem:[%s4970_s3] sm:$0xff]  }
 0x18b   :  { %v463_v49 = vpop.xlane.xlu1 %462  ;;  %2914 = vmatprep.subr.bf16.mxu1 %v3052_v41 }
 0x18c   :  { %v3620_v60 = vsub.f32 %v3456_v11, %v531_v48  ;;  %v532_v63 = vmul.f32 0.015625, %v463_v49  ;;  %v645_v0 = vsel %vm421_vm1, %v593_v18, 0.0  ;;  %v594_v1 = vmul.f32 %v3614_v44, %v3614_v44  ;;  %2915 = vmatpush3.bf16.msra.mxu1 %v3052_v41 }
 0x18d   :  { %643 = vadd.xlane.f32.xlu1 %v642_v50  ;;  %646 = vadd.xlane.f32.xlu0 %v645_v0  ;;  %v466_v5 = vpop.xlane.xlu0 %465 }
 0x18e   :  { %v3626_v6 = vsub.f32 %v3461_v14, %v532_v63  ;;  %v533_v9 = vmul.f32 0.015625, %v466_v5  ;;  %v595_v16 = vmul.f32 %v3620_v60, %v3620_v60  ;;  %v648_v20 = vsel %vm421_vm1, %v594_v1, 0.0 }
 0x18f   :  { %v469_v19 = vpop.xlane.xlu1 %468 }
 0x190   :  { %v3632_v22 = vsub.f32 %v3454_v10, %v533_v9  ;;  %v534_v23 = vmul.f32 0.015625, %v469_v19  ;;  %v651_v26 = vsel %vm421_vm1, %v595_v16, 0.0  ;;  %v596_v33 = vmul.f32 %v3626_v6, %v3626_v6  ;;  %v3053_v19 = vld [vmem:[%s4970_s3 + $0x8] sm:$0xff]  }
 0x191   :  { %649 = vadd.xlane.f32.xlu1 %v648_v20  ;;  %652 = vadd.xlane.f32.xlu0 %v651_v26  ;;  %v472_v38 = vpop.xlane.xlu0 %471 }
 0x192   :  { %v3641_v48 = vsub.f32 %v3459_v13, %v534_v23  ;;  %v535_v18 = vmul.f32 0.015625, %v472_v38  ;;  %v654_v49 = vsel %vm421_vm1, %v596_v33, 0.0  ;;  %v597_v50 = vmul.f32 %v3632_v22, %v3632_v22  ;;  %2916 = vmatprep.subr.bf16.mxu1 %v3053_v19 }
 0x193   :  { %v475_v63 = vpop.xlane.xlu1 %474  ;;  %2917 = vmatpush3.bf16.msra.mxu1 %v3053_v19 }
 0x194   :  { %v3647_v0 = vsub.f32 %v3476_v32, %v535_v18  ;;  %v536_v1 = vmul.f32 0.015625, %v475_v63  ;;  %v657_v5 = vsel %vm421_vm1, %v597_v50, 0.0  ;;  %v598_v9 = vmul.f32 %v3641_v48, %v3641_v48 }
 0x195   :  { %655 = vadd.xlane.f32.xlu1 %v654_v49  ;;  %658 = vadd.xlane.f32.xlu0 %v657_v5  ;;  %v478_v16 = vpop.xlane.xlu0 %477 }
 0x196   :  { %v3656_v20 = vsub.f32 %v3481_v35, %v536_v1  ;;  %v537_v23 = vmul.f32 0.015625, %v478_v16  ;;  %v599_v26 = vmul.f32 %v3647_v0, %v3647_v0  ;;  %v660_v38 = vsel %vm421_vm1, %v598_v9, 0.0  ;;  %v3054_v1 = vld [vmem:[%s4970_s3 + $0x10] sm:$0xff]  }
 0x197   :  { %v481_v33 = vpop.xlane.xlu1 %480  ;;  %2918 = vmatprep.subr.bf16.mxu1 %v3054_v1 }
 0x198   :  { %v3662_v41 = vsub.f32 %v3474_v30, %v537_v23  ;;  %v538_v18 = vmul.f32 0.015625, %v481_v33  ;;  %v663_v49 = vsel %vm421_vm1, %v599_v26, 0.0  ;;  %v600_v50 = vmul.f32 %v3656_v20, %v3656_v20  ;;  %2919 = vmatpush3.bf16.msra.mxu1 %v3054_v1 }
 0x199   :  { %661 = vadd.xlane.f32.xlu1 %v660_v38  ;;  %664 = vadd.xlane.f32.xlu0 %v663_v49  ;;  %v484_v63 = vpop.xlane.xlu0 %483 }
 0x19a   :  { %v3671_v5 = vsub.f32 %v3479_v34, %v538_v18  ;;  %v539_v9 = vmul.f32 0.015625, %v484_v63  ;;  %v601_v16 = vmul.f32 %v3662_v41, %v3662_v41  ;;  %v666_v26 = vsel %vm421_vm1, %v600_v50, 0.0  ;;  %v3055_v63 = vld [vmem:[%s4970_s3 + $0x18] sm:$0xff]  }
 0x19b   :  { %v487_v23 = vpop.xlane.xlu1 %486  ;;  %2920 = vmatprep.subr.bf16.mxu1 %v3055_v63 }
 0x19c   :  { %v3677_v19 = vsub.f32 %v3496_v52, %v539_v9  ;;  %v540_v33 = vmul.f32 0.015625, %v487_v23  ;;  %v669_v38 = vsel %vm421_vm1, %v601_v16, 0.0  ;;  %v602_v49 = vmul.f32 %v3671_v5, %v3671_v5  ;;  %2921 = vmatpush3.bf16.msra.mxu1 %v3055_v63 }
 0x19d   :  { %667 = vadd.xlane.f32.xlu1 %v666_v26  ;;  %670 = vadd.xlane.f32.xlu0 %v669_v38  ;;  %v490_v18 = vpop.xlane.xlu0 %489 }
 0x19e   :  { %v3686_v50 = vsub.f32 %v3501_v55, %v540_v33  ;;  %v541_v35 = vmul.f32 0.015625, %v490_v18  ;;  %v603_v9 = vmul.f32 %v3677_v19, %v3677_v19  ;;  %v672_v16 = vsel %vm421_vm1, %v602_v49, 0.0 }
 0x19f   :  { %v493_v23 = vpop.xlane.xlu1 %492 }
 0x1a0   :  { %v3692_v1 = vsub.f32 %v3494_v51, %v541_v35  ;;  %v542_v26 = vmul.f32 0.015625, %v493_v23  ;;  %v675_v38 = vsel %vm421_vm1, %v603_v9, 0.0  ;;  %v604_v52 = vmul.f32 %v3686_v50, %v3686_v50 }
 0x1a1   :  { %673 = vadd.xlane.f32.xlu1 %v672_v16  ;;  %676 = vadd.xlane.f32.xlu0 %v675_v38  ;;  %v496_v33 = vpop.xlane.xlu0 %495 }
 0x1a2   :  { %v3698_v18 = vsub.f32 %v3499_v54, %v542_v26  ;;  %v543_v55 = vmul.f32 0.015625, %v496_v33  ;;  %v605_v49 = vmul.f32 %v3692_v1, %v3692_v1  ;;  %v678_v35 = vsel %vm421_vm1, %v604_v52, 0.0 }
 0x1a3   :  { %v499_v32 = vpop.xlane.xlu1 %498 }
 0x1a4   :  { %v3704_v23 = vsub.f32 %v3516_v8, %v543_v55  ;;  %v544_v9 = vmul.f32 0.015625, %v499_v32  ;;  %v681_v51 = vsel %vm421_vm1, %v605_v49, 0.0  ;;  %v606_v63 = vmul.f32 %v3698_v18, %v3698_v18 }
 0x1a5   :  { %679 = vadd.xlane.f32.xlu1 %v678_v35  ;;  %682 = vadd.xlane.f32.xlu0 %v681_v51  ;;  %v502_v16 = vpop.xlane.xlu0 %501 }
 0x1a6   :  { %v3710_v26 = vsub.f32 %v3521_v15, %v544_v9  ;;  %v545_v38 = vmul.f32 0.015625, %v502_v16  ;;  %v607_v33 = vmul.f32 %v3704_v23, %v3704_v23  ;;  %v684_v55 = vsel %vm421_vm1, %v606_v63, 0.0 }
 0x1a7   :  { %v505_v52 = vpop.xlane.xlu1 %504 }
 0x1a8   :  { %v3716_v32 = vsub.f32 %v3514_v7, %v545_v38  ;;  %v546_v49 = vmul.f32 0.015625, %v505_v52  ;;  %v687_v8 = vsel %vm421_vm1, %v607_v33, 0.0  ;;  %v608_v51 = vmul.f32 %v3710_v26, %v3710_v26 }
 0x1a9   :  { %685 = vadd.xlane.f32.xlu1 %v684_v55  ;;  %688 = vadd.xlane.f32.xlu0 %v687_v8  ;;  %v508_v35 = vpop.xlane.xlu0 %507 }
 0x1aa   :  { %v3722_v9 = vsub.f32 %v3519_v12, %v546_v49  ;;  %v547_v16 = vmul.f32 0.015625, %v508_v35  ;;  %v609_v15 = vmul.f32 %v3716_v32, %v3716_v32  ;;  %v690_v38 = vsel %vm421_vm1, %v608_v51, 0.0 }
 0x1ab   :  { %v511_v63 = vpop.xlane.xlu1 %510 }
 0x1ac   :  { %v3728_v52 = vsub.f32 %v3536_v37, %v547_v16  ;;  %v548_v33 = vmul.f32 0.015625, %v511_v63  ;;  %v693_v7 = vsel %vm421_vm1, %v609_v15, 0.0  ;;  %v610_v8 = vmul.f32 %v3722_v9, %v3722_v9 }
 0x1ad   :  { %691 = vadd.xlane.f32.xlu1 %v690_v38  ;;  %694 = vadd.xlane.f32.xlu0 %v693_v7  ;;  %v514_v55 = vpop.xlane.xlu0 %513 }
 0x1ae   :  { %v3734_v49 = vsub.f32 %v3541_v40, %v548_v33  ;;  %v549_v35 = vmul.f32 0.015625, %v514_v55  ;;  %v611_v12 = vmul.f32 %v3728_v52, %v3728_v52  ;;  %v696_v16 = vsel %vm421_vm1, %v610_v8, 0.0 }
 0x1af   :  { %v517_v51 = vpop.xlane.xlu1 %516 }
 0x1b0   :  { %v3740_v63 = vsub.f32 %v3534_v36, %v549_v35  ;;  %v550_v15 = vmul.f32 0.015625, %v517_v51  ;;  %v699_v37 = vsel %vm421_vm1, %v611_v12, 0.0  ;;  %v612_v7 = vmul.f32 %v3734_v49, %v3734_v49 }
 0x1b1   :  { %697 = vadd.xlane.f32.xlu1 %v696_v16  ;;  %700 = vadd.xlane.f32.xlu0 %v699_v37 }
 0x1b2   :  { %v3746_v38 = vsub.f32 %v3539_v39, %v550_v15  ;;  %v613_v33 = vmul.f32 %v3740_v63, %v3740_v63  ;;  %v702_v55 = vsel %vm421_vm1, %v612_v7, 0.0 }
 0x1b4   :  { %v705_v8 = vsel %vm421_vm1, %v613_v33, 0.0  ;;  %v614_v35 = vmul.f32 %v3746_v38, %v3746_v38 }
 0x1b5   :  { %703 = vadd.xlane.f32.xlu1 %v702_v55  ;;  %706 = vadd.xlane.f32.xlu0 %v705_v8 }
 0x1b6   :  { %v708_v12 = vsel %vm421_vm1, %v614_v35, 0.0 }
 0x1b9   :  { %709 = vadd.xlane.f32.xlu1 %v708_v12 }
 0x206   :  { %v617_v51 = vpop.xlane.xlu0 %616 }
 0x207   :  { %v711_v37 = vmul.f32 0.015625, %v617_v51 }
 0x209   :  { %v743_v16 = vadd.f32 1e-05, %v711_v37 }
 0x20a   :  { %v620_v15 = vpop.xlane.xlu1 %619  ;;  %v623_v40 = vpop.xlane.xlu0 %622 }
 0x20b   :  { %v712_v39 = vmul.f32 0.015625, %v620_v15  ;;  %v713_v36 = vmul.f32 0.015625, %v623_v40  ;;  %3064 = vrsqrt.f32 %v743_v16 }
 0x20d   :  { %v744_v54 = vadd.f32 1e-05, %v712_v39  ;;  %v745_v7 = vadd.f32 1e-05, %v713_v36 }
 0x20e   :  { %v626_v34 = vpop.xlane.xlu1 %625  ;;  %v629_v33 = vpop.xlane.xlu0 %628 }
 0x20f   :  { %3066 = vrsqrt.f32 %v744_v54  ;;  %v714_v30 = vmul.f32 0.015625, %v626_v34  ;;  %v715_v14 = vmul.f32 0.015625, %v629_v33 }
 0x210   :  { %3068 = vrsqrt.f32 %v745_v7 }
 0x211   :  { %v746_v55 = vadd.f32 1e-05, %v714_v30  ;;  %v747_v8 = vadd.f32 1e-05, %v715_v14 }
 0x212   :  { %v632_v35 = vpop.xlane.xlu1 %631  ;;  %v635_v12 = vpop.xlane.xlu0 %634 }
 0x213   :  { %3070 = vrsqrt.f32 %v746_v55  ;;  %v716_v51 = vmul.f32 0.015625, %v632_v35  ;;  %v717_v37 = vmul.f32 0.015625, %v635_v12 }
 0x214   :  { %3072 = vrsqrt.f32 %v747_v8 }
 0x215   :  { %v748_v11 = vadd.f32 1e-05, %v716_v51  ;;  %v749_v15 = vadd.f32 1e-05, %v717_v37  ;;  %v3065_v39 = vpop.eup %3064 }
 0x216   :  { %v638_v40 = vpop.xlane.xlu1 %637  ;;  %v641_v16 = vpop.xlane.xlu0 %640  ;;  %v807_v33 = vmul.f32 %v3065_v39, %v3555_v57 }
 0x217   :  { %3074 = vrsqrt.f32 %v748_v11  ;;  %v718_v36 = vmul.f32 0.015625, %v638_v40  ;;  %v719_v13 = vmul.f32 0.015625, %v641_v16 }
 0x218   :  { %3076 = vrsqrt.f32 %v749_v15 }
 0x219   :  { %v3067_v54 = vpop.eup %3066  ;;  %v750_v34 = vadd.f32 1e-05, %v718_v36  ;;  %v751_v7 = vadd.f32 1e-05, %v719_v13 }
 0x21a   :  { %v644_v30 = vpop.xlane.xlu1 %643  ;;  %v647_v14 = vpop.xlane.xlu0 %646  ;;  %v808_v55 = vmul.f32 %v3067_v54, %v3563_v4 }
 0x21b   :  { %v3069_v35 = vpop.eup %3068  ;;  %3078 = vrsqrt.f32 %v750_v34  ;;  %v720_v8 = vmul.f32 0.015625, %v644_v30  ;;  %v721_v12 = vmul.f32 0.015625, %v647_v14 }
 0x21c   :  { %v839_v51 = vpack.c.bf16 %v808_v55, %v807_v33  ;;  %3080 = vrsqrt.f32 %v751_v7  ;;  %v809_v13 = vmul.f32 %v3069_v35, %v3552_v56 }
 0x21d   :  { %v3071_v37 = vpop.eup %3070  ;;  %v752_v11 = vadd.f32 1e-05, %v720_v8  ;;  %v753_v40 = vadd.f32 1e-05, %v721_v12 }
 0x21e   :  { %v650_v16 = vpop.xlane.xlu1 %649  ;;  %2922 = vmatprep.mubr.msk.bf16.mxu1 %vm421_vm1, %v839_v51  ;;  %v653_v15 = vpop.xlane.xlu0 %652  ;;  %v810_v36 = vmul.f32 %v3071_v37, %v3560_v3 }
 0x21f   :  { %v3073_v57 = vpop.eup %3072  ;;  %3082 = vrsqrt.f32 %v752_v11  ;;  %v722_v4 = vmul.f32 0.015625, %v650_v16  ;;  %v723_v39 = vmul.f32 0.015625, %v653_v15 }
 0x220   :  { %v840_v54 = vpack.c.bf16 %v810_v36, %v809_v13  ;;  %3084 = vrsqrt.f32 %v753_v40  ;;  %v811_v55 = vmul.f32 %v3073_v57, %v3573_v21 }
 0x221   :  { %v3075_v34 = vpop.eup %3074  ;;  %v754_v30 = vadd.f32 1e-05, %v722_v4  ;;  %v755_v14 = vadd.f32 1e-05, %v723_v39 }
 0x222   :  { %v656_v7 = vpop.xlane.xlu1 %655  ;;  %2923 = vmatmul.mubr.msk.bf16.vlgmr.msra.gmra.mrb[0].mxu1 %vm421_vm1, %v840_v54  ;;  %v659_v33 = vpop.xlane.xlu0 %658  ;;  %v812_v8 = vmul.f32 %v3075_v34, %v3578_v28 }
 0x223   :  { %v3077_v56 = vpop.eup %3076  ;;  %3086 = vrsqrt.f32 %v754_v30  ;;  %v724_v3 = vmul.f32 0.015625, %v656_v7  ;;  %v725_v35 = vmul.f32 0.015625, %v659_v33 }
 0x224   :  { %v841_v12 = vpack.c.bf16 %v812_v8, %v811_v55  ;;  %3088 = vrsqrt.f32 %v755_v14  ;;  %v813_v15 = vmul.f32 %v3077_v56, %v3584_v47 }
 0x225   :  { %v3079_v51 = vpop.eup %3078  ;;  %v756_v37 = vadd.f32 1e-05, %v724_v3  ;;  %v757_v11 = vadd.f32 1e-05, %v725_v35 }
 0x226   :  { %v662_v40 = vpop.xlane.xlu1 %661  ;;  %2926 = vmatprep.mubr.msk.bf16.mxu1 %vm421_vm1, %v841_v12  ;;  %v665_v16 = vpop.xlane.xlu0 %664  ;;  %v814_v13 = vmul.f32 %v3079_v51, %v3590_v53 }
 0x227   :  { %v3081_v21 = vpop.eup %3080  ;;  %3090 = vrsqrt.f32 %v756_v37  ;;  %v726_v28 = vmul.f32 0.015625, %v662_v40  ;;  %v727_v36 = vmul.f32 0.015625, %v665_v16 }
 0x228   :  { %v842_v57 = vpack.c.bf16 %v814_v13, %v813_v15  ;;  %3092 = vrsqrt.f32 %v757_v11  ;;  %v815_v14 = vmul.f32 %v3081_v21, %v3596_v2 }
 0x229   :  { %v3083_v4 = vpop.eup %3082  ;;  %v758_v39 = vadd.f32 1e-05, %v726_v28  ;;  %v759_v54 = vadd.f32 1e-05, %v727_v36 }
 0x22a   :  { %v668_v34 = vpop.xlane.xlu1 %667  ;;  %2927 = vmatmul.mubr.msk.bf16.gmra.mrb[4].mxu1 %vm421_vm1, %v842_v57  ;;  %v671_v30 = vpop.xlane.xlu0 %670  ;;  %v816_v7 = vmul.f32 %v3083_v4, %v3602_v17 }
 0x22b   :  { %v3085_v47 = vpop.eup %3084  ;;  %3094 = vrsqrt.f32 %v758_v39  ;;  %v728_v53 = vmul.f32 0.015625, %v668_v34  ;;  %v729_v33 = vmul.f32 0.015625, %v671_v30 }
 0x22c   :  { %v843_v55 = vpack.c.bf16 %v816_v7, %v815_v14  ;;  %3096 = vrsqrt.f32 %v759_v54  ;;  %v817_v51 = vmul.f32 %v3085_v47, %v3608_v25 }
 0x22d   :  { %v3087_v8 = vpop.eup %3086  ;;  %v760_v56 = vadd.f32 1e-05, %v728_v53  ;;  %v761_v3 = vadd.f32 1e-05, %v729_v33 }
 0x22e   :  { %v674_v35 = vpop.xlane.xlu1 %673  ;;  %2930 = vmatprep.mubr.msk.bf16.mxu1 %vm421_vm1, %v843_v55  ;;  %v677_v12 = vpop.xlane.xlu0 %676  ;;  %v818_v37 = vmul.f32 %v3087_v8, %v3614_v44 }
 0x22f   :  { %v3089_v2 = vpop.eup %3088  ;;  %3098 = vrsqrt.f32 %v760_v56  ;;  %v730_v17 = vmul.f32 0.015625, %v674_v35  ;;  %v731_v11 = vmul.f32 0.015625, %v677_v12 }
 0x230   :  { %v844_v40 = vpack.c.bf16 %v818_v37, %v817_v51  ;;  %3100 = vrsqrt.f32 %v761_v3  ;;  %v819_v36 = vmul.f32 %v3089_v2, %v3620_v60 }
 0x231   :  { %v3091_v16 = vpop.eup %3090  ;;  %v762_v15 = vadd.f32 1e-05, %v730_v17  ;;  %v763_v13 = vadd.f32 1e-05, %v731_v11 }
 0x232   :  { %v680_v21 = vpop.xlane.xlu1 %679  ;;  %2931 = vmatmul.mubr.msk.bf16.gmra.mrb[8].mxu1 %vm421_vm1, %v844_v40  ;;  %v683_v28 = vpop.xlane.xlu0 %682  ;;  %v820_v57 = vmul.f32 %v3091_v16, %v3626_v6 }
 0x233   :  { %v3093_v25 = vpop.eup %3092  ;;  %3102 = vrsqrt.f32 %v762_v15  ;;  %v732_v44 = vmul.f32 0.015625, %v680_v21  ;;  %v733_v4 = vmul.f32 0.015625, %v683_v28 }
 0x234   :  { %v845_v39 = vpack.c.bf16 %v820_v57, %v819_v36  ;;  %3104 = vrsqrt.f32 %v763_v13  ;;  %v821_v47 = vmul.f32 %v3093_v25, %v3632_v22 }
 0x235   :  { %v3095_v54 = vpop.eup %3094  ;;  %v764_v34 = vadd.f32 1e-05, %v732_v44  ;;  %v765_v30 = vadd.f32 1e-05, %v733_v4 }
 0x236   :  { %v686_v14 = vpop.xlane.xlu1 %685  ;;  %2934 = vmatprep.mubr.msk.bf16.mxu1 %vm421_vm1, %v845_v39  ;;  %v689_v7 = vpop.xlane.xlu0 %688  ;;  %v822_v53 = vmul.f32 %v3095_v54, %v3641_v48 }
 0x237   :  { %v3097_v60 = vpop.eup %3096  ;;  %3106 = vrsqrt.f32 %v764_v34  ;;  %v734_v6 = vmul.f32 0.015625, %v686_v14  ;;  %v735_v33 = vmul.f32 0.015625, %v689_v7 }
 0x238   :  { %v846_v55 = vpack.c.bf16 %v822_v53, %v821_v47  ;;  %3108 = vrsqrt.f32 %v765_v30  ;;  %v823_v51 = vmul.f32 %v3097_v60, %v3647_v0 }
 0x239   :  { %v3099_v8 = vpop.eup %3098  ;;  %v766_v56 = vadd.f32 1e-05, %v734_v6  ;;  %v767_v3 = vadd.f32 1e-05, %v735_v33 }
 0x23a   :  { %v692_v35 = vpop.xlane.xlu1 %691  ;;  %2935 = vmatmul.mubr.msk.bf16.gmra.mrb[12].mxu1 %vm421_vm1, %v846_v55  ;;  %v695_v12 = vpop.xlane.xlu0 %694  ;;  %v824_v37 = vmul.f32 %v3099_v8, %v3656_v20 }
 0x23b   :  { %v3101_v22 = vpop.eup %3100  ;;  %3110 = vrsqrt.f32 %v766_v56  ;;  %v736_v48 = vmul.f32 0.015625, %v692_v35  ;;  %v737_v2 = vmul.f32 0.015625, %v695_v12 }
 0x23c   :  { %v847_v17 = vpack.c.bf16 %v824_v37, %v823_v51  ;;  %3112 = vrsqrt.f32 %v767_v3  ;;  %v825_v21 = vmul.f32 %v3101_v22, %v3662_v41 }
 0x23d   :  { %v3103_v11 = vpop.eup %3102  ;;  %v768_v40 = vadd.f32 1e-05, %v736_v48  ;;  %v769_v16 = vadd.f32 1e-05, %v737_v2 }
 0x23e   :  { %v698_v15 = vpop.xlane.xlu1 %697  ;;  %2938 = vmatprep.mubr.msk.bf16.mxu1 %vm421_vm1, %v847_v17  ;;  %v701_v13 = vpop.xlane.xlu0 %700  ;;  %v826_v28 = vmul.f32 %v3103_v11, %v3671_v5 }
 0x23f   :  { %v3105_v0 = vpop.eup %3104  ;;  %3114 = vrsqrt.f32 %v768_v40  ;;  %v738_v20 = vmul.f32 0.015625, %v698_v15  ;;  %v739_v36 = vmul.f32 0.015625, %v701_v13 }
 0x240   :  { %v848_v57 = vpack.c.bf16 %v826_v28, %v825_v21  ;;  %3116 = vrsqrt.f32 %v769_v16  ;;  %v827_v34 = vmul.f32 %v3105_v0, %v3677_v19 }
 0x241   :  { %v3107_v25 = vpop.eup %3106  ;;  %v770_v44 = vadd.f32 1e-05, %v738_v20  ;;  %v771_v4 = vadd.f32 1e-05, %v739_v36 }
 0x242   :  { %v704_v39 = vpop.xlane.xlu1 %703  ;;  %2939 = vmatmul.mubr.msk.bf16.gmra.mrb[16].mxu1 %vm421_vm1, %v848_v57  ;;  %v707_v54 = vpop.xlane.xlu0 %706  ;;  %v828_v30 = vmul.f32 %v3107_v25, %v3686_v50 }
 0x243   :  { %v3109_v41 = vpop.eup %3108  ;;  %3118 = vrsqrt.f32 %v770_v44  ;;  %v740_v5 = vmul.f32 0.015625, %v704_v39  ;;  %v741_v14 = vmul.f32 0.015625, %v707_v54 }
 0x244   :  { %v849_v7 = vpack.c.bf16 %v828_v30, %v827_v34  ;;  %3120 = vrsqrt.f32 %v771_v4  ;;  %v829_v33 = vmul.f32 %v3109_v41, %v3692_v1 }
 0x245   :  { %v3111_v47 = vpop.eup %3110  ;;  %v772_v53 = vadd.f32 1e-05, %v740_v5  ;;  %v773_v60 = vadd.f32 1e-05, %v741_v14 }
 0x246   :  { %v710_v6 = vpop.xlane.xlu1 %709  ;;  %2942 = vmatprep.mubr.msk.bf16.mxu1 %vm421_vm1, %v849_v7  ;;  %v830_v55 = vmul.f32 %v3111_v47, %v3698_v18  ;;  %v3113_v8 = vpop.eup %3112 }
 0x247   :  { %3122 = vrsqrt.f32 %v772_v53  ;;  %v742_v19 = vmul.f32 0.015625, %v710_v6  ;;  %v831_v35 = vmul.f32 %v3113_v8, %v3704_v23 }
 0x248   :  { %v850_v50 = vpack.c.bf16 %v830_v55, %v829_v33  ;;  %3124 = vrsqrt.f32 %v773_v60 }
 0x249   :  { %v3115_v56 = vpop.eup %3114  ;;  %v774_v3 = vadd.f32 1e-05, %v742_v19 }
 0x24a   :  { %2943 = vmatmul.mubr.msk.bf16.gmra.mrb[20].mxu1 %vm421_vm1, %v850_v50  ;;  %v832_v12 = vmul.f32 %v3115_v56, %v3710_v26  ;;  %v3117_v51 = vpop.eup %3116 }
 0x24b   :  { %3126 = vrsqrt.f32 %v774_v3  ;;  %v833_v1 = vmul.f32 %v3117_v51, %v3716_v32 }
 0x24c   :  { %v851_v37 = vpack.c.bf16 %v832_v12, %v831_v35 }
 0x24d   :  { %v3119_v22 = vpop.eup %3118 }
 0x24e   :  { %2946 = vmatprep.mubr.msk.bf16.mxu1 %vm421_vm1, %v851_v37  ;;  %v834_v18 = vmul.f32 %v3119_v22, %v3722_v9  ;;  %v3121_v48 = vpop.eup %3120  ;;  %v3806_v9 = vld [vmem:[%s4971_s4] ss:$0 sm:$0xff] }
 0x24f   :  { %v835_v11 = vmul.f32 %v3121_v48, %v3728_v52 }
 0x250   :  { %v852_v2 = vpack.c.bf16 %v834_v18, %v833_v1 }
 0x251   :  { %v3123_v17 = vpop.eup %3122 }
 0x252   :  { %2947 = vmatmul.mubr.msk.bf16.gmra.mrb[24].mxu1 %vm421_vm1, %v852_v2  ;;  %v836_v23 = vmul.f32 %v3123_v17, %v3734_v49  ;;  %v3125_v26 = vpop.eup %3124 }
 0x253   :  { %v837_v15 = vmul.f32 %v3125_v26, %v3740_v63 }
 0x254   :  { %v853_v40 = vpack.c.bf16 %v836_v23, %v835_v11 }
 0x255   :  { %v3127_v16 = vpop.eup %3126 }
 0x256   :  { %2950 = vmatprep.mubr.msk.bf16.mxu1 %vm421_vm1, %v853_v40  ;;  %v838_v32 = vmul.f32 %v3127_v16, %v3746_v38 }
 0x258   :  { %v854_v13 = vpack.c.bf16 %v838_v32, %v837_v15 }
 0x25a   :  { %2951 = vmatmul.mubr.msk.bf16.gmra.mrb[28].mxu1 %vm421_vm1, %v854_v13 }
 0x2f5   :  { %v2924_v52 = vpop.f32.mrb[0].mxu1 }
 0x2f6   :  { %v975_v21 = vpop.f32.mrb[1].mxu1  ;;  %v3809_v49 = vadd.f32 %v2924_v52, %v3806_v9 }
 0x2f7   :  { %v3812_v28 = vadd.f32 %v3806_v9, %v975_v21  ;;  %v2925_v0 = vpop.f32.mrb[2].mxu1 }
 0x2f8   :  { %v978_v63 = vpop.f32.mrb[3].mxu1  ;;  %v3816_v20 = vadd.f32 %v2925_v0, %v3806_v9  ;;  %v1104_v57 = vmax.f32 %v3809_v49, 0.0 }
 0x2f9   :  { %v1102_v38 = vmax.f32 %v3812_v28, 0.0  ;;  %v3819_v36 = vadd.f32 %v3806_v9, %v978_v63 }
 0x2fa   :  { %v1105_v4 = vmax.f32 %v3816_v20, 0.0  ;;  %v1140_v14 = vsel %vm421_vm1, %v1104_v57, 0.0 }
 0x2fb   :  { %v1103_v25 = vmax.f32 %v3819_v36, 0.0  ;;  %v1134_v44 = vsel %vm421_vm1, %v1102_v38, 0.0 }
 0x2fc   :  { %1135 = vadd.xlane.f32.xlu0 %v1134_v44  ;;  %v1143_v6 = vsel %vm421_vm1, %v1105_v4, 0.0 }
 0x2fd   :  { %v2928_v39 = vpop.f32.mrb[4].mxu1  ;;  %v1137_v54 = vsel %vm421_vm1, %v1103_v25, 0.0 }
 0x2fe   :  { %1138 = vadd.xlane.f32.xlu1 %v1137_v54  ;;  %v991_v34 = vpop.f32.mrb[5].mxu1  ;;  %v3831_v30 = vadd.f32 %v2928_v39, %v3806_v9 }
 0x2ff   :  { %v3834_v41 = vadd.f32 %v3806_v9, %v991_v34  ;;  %v2929_v5 = vpop.f32.mrb[6].mxu1 }
 0x300   :  { %1141 = vadd.xlane.f32.xlu0 %v1140_v14  ;;  %v994_v7 = vpop.f32.mrb[7].mxu1  ;;  %v3841_v53 = vadd.f32 %v2929_v5, %v3806_v9  ;;  %v1108_v33 = vmax.f32 %v3831_v30, 0.0 }
 0x301   :  { %v1106_v47 = vmax.f32 %v3834_v41, 0.0  ;;  %v3844_v60 = vadd.f32 %v3806_v9, %v994_v7 }
 0x302   :  { %1144 = vadd.xlane.f32.xlu1 %v1143_v6  ;;  %v1109_v19 = vmax.f32 %v3841_v53, 0.0  ;;  %v1152_v37 = vsel %vm421_vm1, %v1108_v33, 0.0 }
 0x303   :  { %v1107_v55 = vmax.f32 %v3844_v60, 0.0  ;;  %v1146_v8 = vsel %vm421_vm1, %v1106_v47, 0.0 }
 0x304   :  { %1147 = vadd.xlane.f32.xlu0 %v1146_v8  ;;  %v1155_v2 = vsel %vm421_vm1, %v1109_v19, 0.0 }
 0x305   :  { %v2932_v50 = vpop.f32.mrb[8].mxu1  ;;  %v1149_v56 = vsel %vm421_vm1, %v1107_v55, 0.0 }
 0x306   :  { %1150 = vadd.xlane.f32.xlu1 %v1149_v56  ;;  %v1007_v3 = vpop.f32.mrb[9].mxu1  ;;  %v3859_v35 = vadd.f32 %v2932_v50, %v3806_v9 }
 0x307   :  { %v3862_v12 = vadd.f32 %v3806_v9, %v1007_v3  ;;  %v2933_v51 = vpop.f32.mrb[10].mxu1 }
 0x308   :  { %1153 = vadd.xlane.f32.xlu0 %v1152_v37  ;;  %v1010_v22 = vpop.f32.mrb[11].mxu1  ;;  %v3869_v18 = vadd.f32 %v2933_v51, %v3806_v9  ;;  %v5012_v17 = vmax.f32 %v3859_v35, 0.0 }
 0x309   :  { %v5021_v1 = vmax.f32 %v3862_v12, 0.0  ;;  %v3872_v48 = vadd.f32 %v3806_v9, %v1010_v22 }
 0x30a   :  { %1156 = vadd.xlane.f32.xlu1 %v1155_v2  ;;  %v5010_v26 = vmax.f32 %v3869_v18, 0.0  ;;  %v1164_v21 = vsel %vm421_vm1, %v5012_v17, 0.0 }
 0x30b   :  { %v5013_v11 = vmax.f32 %v3872_v48, 0.0  ;;  %v1158_v23 = vsel %vm421_vm1, %v5021_v1, 0.0 }
 0x30c   :  { %1159 = vadd.xlane.f32.xlu0 %v1158_v23  ;;  %v1167_v54 = vsel %vm421_vm1, %v5010_v26, 0.0 }
 0x30d   :  { %v2936_v40 = vpop.f32.mrb[12].mxu1  ;;  %v1161_v16 = vsel %vm421_vm1, %v5013_v11, 0.0 }
 0x30e   :  { %1162 = vadd.xlane.f32.xlu1 %v1161_v16  ;;  %v1023_v15 = vpop.f32.mrb[13].mxu1  ;;  %v3887_v32 = vadd.f32 %v2936_v40, %v3806_v9 }
 0x30f   :  { %v3890_v13 = vadd.f32 %v3806_v9, %v1023_v15  ;;  %v2937_v52 = vpop.f32.mrb[14].mxu1 }
 0x310   :  { %1165 = vadd.xlane.f32.xlu0 %v1164_v21  ;;  %v1026_v0 = vpop.f32.mrb[15].mxu1  ;;  %v3897_v44 = vadd.f32 %v2937_v52, %v3806_v9  ;;  %v5004_v34 = vmax.f32 %v3887_v32, 0.0 }
 0x311   :  { %v5008_v63 = vmax.f32 %v3890_v13, 0.0  ;;  %v3900_v39 = vadd.f32 %v3806_v9, %v1026_v0 }
 0x312   :  { %1168 = vadd.xlane.f32.xlu1 %v1167_v54  ;;  %v5002_v7 = vmax.f32 %v3897_v44, 0.0  ;;  %v1176_v37 = vsel %vm421_vm1, %v5004_v34, 0.0 }
 0x313   :  { %v5005_v5 = vmax.f32 %v3900_v39, 0.0  ;;  %v1170_v14 = vsel %vm421_vm1, %v5008_v63, 0.0 }
 0x314   :  { %1171 = vadd.xlane.f32.xlu0 %v1170_v14  ;;  %v1179_v16 = vsel %vm421_vm1, %v5002_v7, 0.0 }
 0x315   :  { %v2940_v6 = vpop.f32.mrb[16].mxu1  ;;  %v1173_v8 = vsel %vm421_vm1, %v5005_v5, 0.0 }
 0x316   :  { %1174 = vadd.xlane.f32.xlu1 %v1173_v8  ;;  %v1039_v50 = vpop.f32.mrb[17].mxu1  ;;  %v3915_v56 = vadd.f32 %v2940_v6, %v3806_v9 }
 0x317   :  { %v3918_v3 = vadd.f32 %v3806_v9, %v1039_v50  ;;  %v2941_v51 = vpop.f32.mrb[18].mxu1 }
 0x318   :  { %1177 = vadd.xlane.f32.xlu0 %v1176_v37  ;;  %v1042_v22 = vpop.f32.mrb[19].mxu1  ;;  %v3925_v23 = vadd.f32 %v2941_v51, %v3806_v9  ;;  %v4999_v15 = vmax.f32 %v3915_v56, 0.0 }
 0x319   :  { %v5000_v2 = vmax.f32 %v3918_v3, 0.0  ;;  %v3928_v40 = vadd.f32 %v3806_v9, %v1042_v22 }
 0x31a   :  { %1180 = vadd.xlane.f32.xlu1 %v1179_v16  ;;  %v5001_v0 = vmax.f32 %v3925_v23, 0.0  ;;  %v1188_v37 = vsel %vm421_vm1, %v4999_v15, 0.0 }
 0x31b   :  { %v4998_v52 = vmax.f32 %v3928_v40, 0.0  ;;  %v1182_v21 = vsel %vm421_vm1, %v5000_v2, 0.0 }
 0x31c   :  { %1183 = vadd.xlane.f32.xlu0 %v1182_v21 }
 0x31d   :  { %v2944_v54 = vpop.f32.mrb[20].mxu1  ;;  %v1185_v14 = vsel %vm421_vm1, %v4998_v52, 0.0 }
 0x31e   :  { %1186 = vadd.xlane.f32.xlu1 %v1185_v14  ;;  %v1055_v6 = vpop.f32.mrb[21].mxu1  ;;  %v3943_v8 = vadd.f32 %v2944_v54, %v3806_v9  ;;  %v1191_v54 = vsel %vm421_vm1, %v5001_v0, 0.0 }
 0x31f   :  { %v3946_v50 = vadd.f32 %v3806_v9, %v1055_v6  ;;  %v2945_v51 = vpop.f32.mrb[22].mxu1 }
 0x320   :  { %1189 = vadd.xlane.f32.xlu0 %v1188_v37  ;;  %v1058_v22 = vpop.f32.mrb[23].mxu1  ;;  %v3953_v21 = vadd.f32 %v2945_v51, %v3806_v9  ;;  %v5007_v6 = vmax.f32 %v3943_v8, 0.0 }
 0x321   :  { %v5003_v16 = vmax.f32 %v3946_v50, 0.0  ;;  %v3956_v14 = vadd.f32 %v3806_v9, %v1058_v22 }
 0x322   :  { %1192 = vadd.xlane.f32.xlu1 %v1191_v54  ;;  %v5009_v51 = vmax.f32 %v3953_v21, 0.0 }
 0x323   :  { %v5006_v52 = vmax.f32 %v3956_v14, 0.0  ;;  %v1194_v37 = vsel %vm421_vm1, %v5003_v16, 0.0 }
 0x324   :  { %1195 = vadd.xlane.f32.xlu0 %v1194_v37  ;;  %v1200_v37 = vsel %vm421_vm1, %v5007_v6, 0.0 }
 0x325   :  { %v2948_v15 = vpop.f32.mrb[24].mxu1  ;;  %v1197_v22 = vsel %vm421_vm1, %v5006_v52, 0.0 }
 0x326   :  { %1198 = vadd.xlane.f32.xlu1 %v1197_v22  ;;  %v1071_v2 = vpop.f32.mrb[25].mxu1  ;;  %v3971_v54 = vadd.f32 %v2948_v15, %v3806_v9 }
 0x327   :  { %v3974_v0 = vadd.f32 %v3806_v9, %v1071_v2  ;;  %v2949_v7 = vpop.f32.mrb[26].mxu1  ;;  %v1203_v2 = vsel %vm421_vm1, %v5009_v51, 0.0 }
 0x328   :  { %1201 = vadd.xlane.f32.xlu0 %v1200_v37  ;;  %v1074_v16 = vpop.f32.mrb[27].mxu1  ;;  %v3981_v5 = vadd.f32 %v2949_v7, %v3806_v9  ;;  %v5020_v15 = vmax.f32 %v3971_v54, 0.0 }
 0x329   :  { %v5011_v34 = vmax.f32 %v3974_v0, 0.0  ;;  %v3984_v22 = vadd.f32 %v3806_v9, %v1074_v16 }
 0x32a   :  { %1204 = vadd.xlane.f32.xlu1 %v1203_v2  ;;  %v5019_v7 = vmax.f32 %v3981_v5, 0.0 }
 0x32b   :  { %v5014_v52 = vmax.f32 %v3984_v22, 0.0  ;;  %v1206_v37 = vsel %vm421_vm1, %v5011_v34, 0.0 }
 0x32c   :  { %1207 = vadd.xlane.f32.xlu0 %v1206_v37  ;;  %v1212_v37 = vsel %vm421_vm1, %v5020_v15, 0.0 }
 0x32d   :  { %v2952_v6 = vpop.f32.mrb[28].mxu1  ;;  %v1209_v16 = vsel %vm421_vm1, %v5014_v52, 0.0 }
 0x32e   :  { %1210 = vadd.xlane.f32.xlu1 %v1209_v16  ;;  %v1087_v63 = vpop.f32.mrb[29].mxu1  ;;  %v3999_v2 = vadd.f32 %v2952_v6, %v3806_v9 }
 0x32f   :  { %v4002_v51 = vadd.f32 %v3806_v9, %v1087_v63  ;;  %v2953_v26 = vpop.f32.mrb[30].mxu1  ;;  %v1215_v63 = vsel %vm421_vm1, %v5019_v7, 0.0 }
 0x330   :  { %1213 = vadd.xlane.f32.xlu0 %v1212_v37  ;;  %v1090_v34 = vpop.f32.mrb[31].mxu1  ;;  %v4009_v11 = vadd.f32 %v2953_v26, %v3806_v9  ;;  %v5017_v6 = vmax.f32 %v3999_v2, 0.0 }
 0x331   :  { %v5015_v17 = vmax.f32 %v4002_v51, 0.0  ;;  %v4012_v16 = vadd.f32 %v3806_v9, %v1090_v34 }
 0x332   :  { %1216 = vadd.xlane.f32.xlu1 %v1215_v63  ;;  %v5016_v26 = vmax.f32 %v4009_v11, 0.0  ;;  %v1224_v34 = vsel %vm421_vm1, %v5017_v6, 0.0 }
 0x333   :  { %v5018_v52 = vmax.f32 %v4012_v16, 0.0  ;;  %v1218_v37 = vsel %vm421_vm1, %v5015_v17, 0.0  ;;  %v3057_v17 = vld [vmem:[%s4972_s5 + $0x8] sm:$0xff]  }
 0x334   :  { %1219 = vadd.xlane.f32.xlu0 %v1218_v37  ;;  %v1227_v63 = vsel %vm421_vm1, %v5016_v26, 0.0  ;;  %v3056_v37 = vld [vmem:[%s4972_s5] sm:$0xff]  }
 0x335   :  { %v1221_v9 = vsel %vm421_vm1, %v5018_v52, 0.0  ;;  %2954 = vmatprep.subr.bf16.mxu0 %v3056_v37 }
 0x336   :  { %1222 = vadd.xlane.f32.xlu1 %v1221_v9  ;;  %2955 = vmatpush3.bf16.msra.mxu0 %v3056_v37  ;;  %v3058_v9 = vld [vmem:[%s4972_s5 + $0x10] sm:$0xff]  }
 0x337   :  { %2956 = vmatprep.subr.bf16.mxu0 %v3057_v17 }
 0x338   :  { %1225 = vadd.xlane.f32.xlu0 %v1224_v34 }
 0x33a   :  { %1228 = vadd.xlane.f32.xlu1 %v1227_v63  ;;  %2957 = vmatpush3.bf16.msra.mxu0 %v3057_v17 }
 0x33b   :  { %2958 = vmatprep.subr.bf16.mxu0 %v3058_v9 }
 0x33e   :  { %2959 = vmatpush3.bf16.msra.mxu0 %v3058_v9 }
 0x389   :  { %v1136_v34 = vpop.xlane.xlu0 %1135 }
 0x38a   :  { %v1230_v63 = vmul.f32 0.015625, %v1136_v34 }
 0x38b   :  { %v1139_v26 = vpop.xlane.xlu1 %1138 }
 0x38c   :  { %v4043_v6 = vsub.f32 %v1102_v38, %v1230_v63  ;;  %v1231_v52 = vmul.f32 0.015625, %v1139_v26 }
 0x38d   :  { %v1142_v7 = vpop.xlane.xlu0 %1141 }
 0x38e   :  { %v4047_v37 = vsub.f32 %v1103_v25, %v1231_v52  ;;  %v1232_v15 = vmul.f32 0.015625, %v1142_v7  ;;  %v1294_v1 = vmul.f32 %v4043_v6, %v4043_v6 }
 0x38f   :  { %v1145_v17 = vpop.xlane.xlu1 %1144 }
 0x390   :  { %v4053_v9 = vsub.f32 %v1104_v57, %v1232_v15  ;;  %v1233_v34 = vmul.f32 0.015625, %v1145_v17  ;;  %v1326_v28 = vsel %vm421_vm1, %v1294_v1, 0.0  ;;  %v1295_v38 = vmul.f32 %v4047_v37, %v4047_v37 }
 0x391   :  { %1327 = vadd.xlane.f32.xlu0 %v1326_v28  ;;  %v1148_v26 = vpop.xlane.xlu0 %1147 }
 0x392   :  { %v4060_v36 = vsub.f32 %v1105_v4, %v1233_v34  ;;  %v1234_v25 = vmul.f32 0.015625, %v1148_v26  ;;  %v1329_v52 = vsel %vm421_vm1, %v1295_v38, 0.0  ;;  %v1296_v49 = vmul.f32 %v4053_v9, %v4053_v9 }
 0x393   :  { %v1151_v57 = vpop.xlane.xlu1 %1150  ;;  %1330 = vadd.xlane.f32.xlu1 %v1329_v52 }
 0x394   :  { %v4067_v1 = vsub.f32 %v1106_v47, %v1234_v25  ;;  %v1235_v15 = vmul.f32 0.015625, %v1151_v57  ;;  %v1332_v7 = vsel %vm421_vm1, %v1296_v49, 0.0  ;;  %v1297_v20 = vmul.f32 %v4060_v36, %v4060_v36 }
 0x395   :  { %1333 = vadd.xlane.f32.xlu0 %v1332_v7  ;;  %v1154_v4 = vpop.xlane.xlu0 %1153  ;;  %v5041_v57 = vmax.f32 %v3862_v12, 0.0 }
 0x396   :  { %v4074_v63 = vsub.f32 %v1107_v55, %v1235_v15  ;;  %v1236_v17 = vmul.f32 0.015625, %v1154_v4  ;;  %v1335_v34 = vsel %vm421_vm1, %v1297_v20, 0.0  ;;  %v1298_v41 = vmul.f32 %v4067_v1, %v4067_v1 }
 0x397   :  { %v1157_v47 = vpop.xlane.xlu1 %1156  ;;  %1336 = vadd.xlane.f32.xlu1 %v1335_v34  ;;  %v5042_v4 = vmax.f32 %v3872_v48, 0.0 }
 0x398   :  { %v4081_v28 = vsub.f32 %v1108_v33, %v1236_v17  ;;  %v1237_v38 = vmul.f32 0.015625, %v1157_v47  ;;  %v1338_v26 = vsel %vm421_vm1, %v1298_v41, 0.0  ;;  %v1299_v60 = vmul.f32 %v4074_v63, %v4074_v63 }
 0x399   :  { %1339 = vadd.xlane.f32.xlu0 %v1338_v26  ;;  %v1160_v55 = vpop.xlane.xlu0 %1159 }
 0x39a   :  { %v4088_v25 = vsub.f32 %v1109_v19, %v1237_v38  ;;  %v1238_v52 = vmul.f32 0.015625, %v1160_v55  ;;  %v1341_v49 = vsel %vm421_vm1, %v1299_v60, 0.0  ;;  %v1300_v30 = vmul.f32 %v4081_v28, %v4081_v28 }
 0x39b   :  { %v1163_v33 = vpop.xlane.xlu1 %1162  ;;  %1342 = vadd.xlane.f32.xlu1 %v1341_v49  ;;  %v5043_v38 = vmax.f32 %v3859_v35, 0.0  ;;  %v5044_v49 = vmax.f32 %v3869_v18, 0.0 }
 0x39c   :  { %v4095_v15 = vsub.f32 %v5041_v57, %v1238_v52  ;;  %v1239_v7 = vmul.f32 0.015625, %v1163_v33  ;;  %v1344_v20 = vsel %vm421_vm1, %v1300_v30, 0.0  ;;  %v1301_v53 = vmul.f32 %v4088_v25, %v4088_v25 }
 0x39d   :  { %1345 = vadd.xlane.f32.xlu0 %v1344_v20  ;;  %v1166_v19 = vpop.xlane.xlu0 %1165  ;;  %v5045_v20 = vmax.f32 %v3890_v13, 0.0 }
 0x39e   :  { %v4102_v17 = vsub.f32 %v5042_v4, %v1239_v7  ;;  %v1240_v34 = vmul.f32 0.015625, %v1166_v19  ;;  %v1347_v41 = vsel %vm421_vm1, %v1301_v53, 0.0  ;;  %v1302_v12 = vmul.f32 %v4095_v15, %v4095_v15 }
 0x39f   :  { %v1169_v47 = vpop.xlane.xlu1 %1168  ;;  %1348 = vadd.xlane.f32.xlu1 %v1347_v41  ;;  %v5046_v41 = vmax.f32 %v3900_v39, 0.0 }
 0x3a0   :  { %v4109_v26 = vsub.f32 %v5043_v38, %v1240_v34  ;;  %v1241_v60 = vmul.f32 0.015625, %v1169_v47  ;;  %v1350_v55 = vsel %vm421_vm1, %v1302_v12, 0.0  ;;  %v1303_v48 = vmul.f32 %v4102_v17, %v4102_v17 }
 0x3a1   :  { %1351 = vadd.xlane.f32.xlu0 %v1350_v55  ;;  %v1172_v52 = vpop.xlane.xlu0 %1171  ;;  %v5047_v55 = vmax.f32 %v3887_v32, 0.0 }
 0x3a2   :  { %v4116_v30 = vsub.f32 %v5044_v49, %v1241_v60  ;;  %v1242_v33 = vmul.f32 0.015625, %v1172_v52  ;;  %v1353_v57 = vsel %vm421_vm1, %v1303_v48, 0.0  ;;  %v1304_v35 = vmul.f32 %v4109_v26, %v4109_v26 }
 0x3a3   :  { %v1175_v7 = vpop.xlane.xlu1 %1174  ;;  %1354 = vadd.xlane.f32.xlu1 %v1353_v57  ;;  %v5048_v57 = vmax.f32 %v3897_v44, 0.0 }
 0x3a4   :  { %v4123_v53 = vsub.f32 %v5045_v20, %v1242_v33  ;;  %v1243_v19 = vmul.f32 0.015625, %v1175_v7  ;;  %v1356_v4 = vsel %vm421_vm1, %v1304_v35, 0.0  ;;  %v1305_v18 = vmul.f32 %v4116_v30, %v4116_v30 }
 0x3a5   :  { %1357 = vadd.xlane.f32.xlu0 %v1356_v4  ;;  %v1178_v34 = vpop.xlane.xlu0 %1177  ;;  %v5049_v4 = vmax.f32 %v3918_v3, 0.0 }
 0x3a6   :  { %v4130_v12 = vsub.f32 %v5046_v41, %v1243_v19  ;;  %v1244_v47 = vmul.f32 0.015625, %v1178_v34  ;;  %v1359_v38 = vsel %vm421_vm1, %v1305_v18, 0.0  ;;  %v1306_v13 = vmul.f32 %v4123_v53, %v4123_v53 }
 0x3a7   :  { %v1181_v60 = vpop.xlane.xlu1 %1180  ;;  %1360 = vadd.xlane.f32.xlu1 %v1359_v38  ;;  %v5050_v38 = vmax.f32 %v3928_v40, 0.0 }
 0x3a8   :  { %v4137_v48 = vsub.f32 %v5047_v55, %v1244_v47  ;;  %v1245_v52 = vmul.f32 0.015625, %v1181_v60  ;;  %v1362_v49 = vsel %vm421_vm1, %v1306_v13, 0.0  ;;  %v1307_v39 = vmul.f32 %v4130_v12, %v4130_v12 }
 0x3a9   :  { %1363 = vadd.xlane.f32.xlu0 %v1362_v49  ;;  %v1184_v33 = vpop.xlane.xlu0 %1183  ;;  %v5051_v49 = vmax.f32 %v3915_v56, 0.0 }
 0x3aa   :  { %v4144_v35 = vsub.f32 %v5048_v57, %v1245_v52  ;;  %v1246_v7 = vmul.f32 0.015625, %v1184_v33  ;;  %v1365_v20 = vsel %vm421_vm1, %v1307_v39, 0.0  ;;  %v1308_v32 = vmul.f32 %v4137_v48, %v4137_v48 }
 0x3ab   :  { %v1187_v19 = vpop.xlane.xlu1 %1186  ;;  %1366 = vadd.xlane.f32.xlu1 %v1365_v20  ;;  %v5052_v20 = vmax.f32 %v3925_v23, 0.0 }
 0x3ac   :  { %v4151_v18 = vsub.f32 %v5049_v4, %v1246_v7  ;;  %v1247_v34 = vmul.f32 0.015625, %v1187_v19  ;;  %v1368_v41 = vsel %vm421_vm1, %v1308_v32, 0.0  ;;  %v1309_v44 = vmul.f32 %v4144_v35, %v4144_v35 }
 0x3ad   :  { %1369 = vadd.xlane.f32.xlu0 %v1368_v41  ;;  %v1190_v47 = vpop.xlane.xlu0 %1189  ;;  %v3059_v41 = vld [vmem:[%s4972_s5 + $0x18] sm:$0xff]  }
 0x3ae   :  { %v4158_v13 = vsub.f32 %v5050_v38, %v1247_v34  ;;  %v1248_v60 = vmul.f32 0.015625, %v1190_v47  ;;  %v1371_v55 = vsel %vm421_vm1, %v1309_v44, 0.0  ;;  %v1310_v3 = vmul.f32 %v4151_v18, %v4151_v18  ;;  %2960 = vmatprep.subr.bf16.mxu0 %v3059_v41 }
 0x3af   :  { %v1193_v52 = vpop.xlane.xlu1 %1192  ;;  %1372 = vadd.xlane.f32.xlu1 %v1371_v55  ;;  %v5053_v44 = vmax.f32 %v3946_v50, 0.0  ;;  %2961 = vmatpush3.bf16.msra.mxu0 %v3059_v41 }
 0x3b0   :  { %v4165_v39 = vsub.f32 %v5051_v49, %v1248_v60  ;;  %v1249_v33 = vmul.f32 0.015625, %v1193_v52  ;;  %v1374_v57 = vsel %vm421_vm1, %v1310_v3, 0.0  ;;  %v1311_v40 = vmul.f32 %v4158_v13, %v4158_v13 }
 0x3b1   :  { %1375 = vadd.xlane.f32.xlu0 %v1374_v57  ;;  %v1196_v7 = vpop.xlane.xlu0 %1195  ;;  %v5054_v3 = vmax.f32 %v3956_v14, 0.0 }
 0x3b2   :  { %v4172_v32 = vsub.f32 %v5052_v20, %v1249_v33  ;;  %v1250_v19 = vmul.f32 0.015625, %v1196_v7  ;;  %v1377_v4 = vsel %vm421_vm1, %v1311_v40, 0.0  ;;  %v1312_v56 = vmul.f32 %v4165_v39, %v4165_v39 }
 0x3b3   :  { %v1199_v34 = vpop.xlane.xlu1 %1198  ;;  %1378 = vadd.xlane.f32.xlu1 %v1377_v4  ;;  %v5055_v40 = vmax.f32 %v3943_v8, 0.0 }
 0x3b4   :  { %v4182_v47 = vsub.f32 %v5053_v44, %v1250_v19  ;;  %v1251_v38 = vmul.f32 0.015625, %v1199_v34  ;;  %v1380_v23 = vsel %vm421_vm1, %v1312_v56, 0.0  ;;  %v1313_v60 = vmul.f32 %v4172_v32, %v4172_v32 }
 0x3b5   :  { %1381 = vadd.xlane.f32.xlu0 %v1380_v23  ;;  %v1202_v55 = vpop.xlane.xlu0 %1201  ;;  %v5056_v56 = vmax.f32 %v3953_v21, 0.0  ;;  %v5057_v23 = vmax.f32 %v3974_v0, 0.0 }
 0x3b6   :  { %v4189_v52 = vsub.f32 %v5054_v3, %v1251_v38  ;;  %v1252_v49 = vmul.f32 0.015625, %v1202_v55  ;;  %v1383_v33 = vsel %vm421_vm1, %v1313_v60, 0.0  ;;  %v1314_v50 = vmul.f32 %v4182_v47, %v4182_v47 }
 0x3b7   :  { %v1205_v57 = vpop.xlane.xlu1 %1204  ;;  %1384 = vadd.xlane.f32.xlu1 %v1383_v33  ;;  %v5058_v33 = vmax.f32 %v3984_v22, 0.0 }
 0x3b8   :  { %v4196_v7 = vsub.f32 %v5055_v40, %v1252_v49  ;;  %v1253_v20 = vmul.f32 0.015625, %v1205_v57  ;;  %v1386_v19 = vsel %vm421_vm1, %v1314_v50, 0.0  ;;  %v1315_v14 = vmul.f32 %v4189_v52, %v4189_v52 }
 0x3b9   :  { %1387 = vadd.xlane.f32.xlu0 %v1386_v19  ;;  %v1208_v4 = vpop.xlane.xlu0 %1207  ;;  %v5059_v19 = vmax.f32 %v3971_v54, 0.0 }
 0x3ba   :  { %v4203_v34 = vsub.f32 %v5056_v56, %v1253_v20  ;;  %v1254_v44 = vmul.f32 0.015625, %v1208_v4  ;;  %v1389_v41 = vsel %vm421_vm1, %v1315_v14, 0.0  ;;  %v1316_v8 = vmul.f32 %v4196_v7, %v4196_v7 }
 0x3bb   :  { %v1211_v38 = vpop.xlane.xlu1 %1210  ;;  %1390 = vadd.xlane.f32.xlu1 %v1389_v41  ;;  %v5060_v41 = vmax.f32 %v3981_v5, 0.0 }
 0x3bc   :  { %v4210_v60 = vsub.f32 %v5057_v23, %v1254_v44  ;;  %v1255_v55 = vmul.f32 0.015625, %v1211_v38  ;;  %v1392_v3 = vsel %vm421_vm1, %v1316_v8, 0.0  ;;  %v1317_v21 = vmul.f32 %v4203_v34, %v4203_v34 }
 0x3bd   :  { %1393 = vadd.xlane.f32.xlu0 %v1392_v3  ;;  %v1214_v49 = vpop.xlane.xlu0 %1213  ;;  %v5061_v3 = vmax.f32 %v4002_v51, 0.0 }
 0x3be   :  { %v4217_v50 = vsub.f32 %v5058_v33, %v1255_v55  ;;  %v1256_v57 = vmul.f32 0.015625, %v1214_v49  ;;  %v1395_v40 = vsel %vm421_vm1, %v1317_v21, 0.0  ;;  %v1318_v0 = vmul.f32 %v4210_v60, %v4210_v60 }
 0x3bf   :  { %v1217_v20 = vpop.xlane.xlu1 %1216  ;;  %1396 = vadd.xlane.f32.xlu1 %v1395_v40  ;;  %v5062_v40 = vmax.f32 %v4012_v16, 0.0 }
 0x3c0   :  { %v4224_v14 = vsub.f32 %v5059_v19, %v1256_v57  ;;  %v1257_v4 = vmul.f32 0.015625, %v1217_v20  ;;  %v1398_v56 = vsel %vm421_vm1, %v1318_v0, 0.0  ;;  %v1319_v22 = vmul.f32 %v4217_v50, %v4217_v50 }
 0x3c1   :  { %1399 = vadd.xlane.f32.xlu0 %v1398_v56  ;;  %v1220_v44 = vpop.xlane.xlu0 %1219  ;;  %v5063_v56 = vmax.f32 %v3999_v2, 0.0 }
 0x3c2   :  { %v4231_v8 = vsub.f32 %v5060_v41, %v1257_v4  ;;  %v1258_v38 = vmul.f32 0.015625, %v1220_v44  ;;  %v1401_v23 = vsel %vm421_vm1, %v1319_v22, 0.0  ;;  %v1320_v54 = vmul.f32 %v4224_v14, %v4224_v14 }
 0x3c3   :  { %1402 = vadd.xlane.f32.xlu1 %v1401_v23  ;;  %v1223_v55 = vpop.xlane.xlu1 %1222 }
 0x3c4   :  { %v4238_v21 = vsub.f32 %v5061_v3, %v1258_v38  ;;  %v1259_v49 = vmul.f32 0.015625, %v1223_v55  ;;  %v1404_v33 = vsel %vm421_vm1, %v1320_v54, 0.0  ;;  %v1321_v5 = vmul.f32 %v4231_v8, %v4231_v8 }
 0x3c5   :  { %1405 = vadd.xlane.f32.xlu0 %v1404_v33  ;;  %v1226_v57 = vpop.xlane.xlu0 %1225  ;;  %v5064_v38 = vmax.f32 %v4009_v11, 0.0  ;;  %v3060_v11 = vld [vmem:[%s4973_s7] sm:$0xff]   ;;  %v3061_v33 = vld [vmem:[%s4973_s7 + $0x8] sm:$0xff]  }
 0x3c6   :  { %v4245_v0 = vsub.f32 %v5062_v40, %v1259_v49  ;;  %v1260_v20 = vmul.f32 0.015625, %v1226_v57  ;;  %v1407_v19 = vsel %vm421_vm1, %v1321_v5, 0.0  ;;  %v1322_v51 = vmul.f32 %v4238_v21, %v4238_v21  ;;  %2994 = vmatprep.subr.bf16.mxu1 %v3060_v11  ;;  %v3062_v5 = vld [vmem:[%s4973_s7 + $0x10] sm:$0xff]   ;;  %v3063_v57 = vld [vmem:[%s4973_s7 + $0x18] sm:$0xff]  }
 0x3c7   :  { %1408 = vadd.xlane.f32.xlu1 %v1407_v19  ;;  %v1229_v4 = vpop.xlane.xlu1 %1228  ;;  %2995 = vmatpush3.bf16.msra.mxu1 %v3060_v11 }
 0x3c8   :  { %v4252_v22 = vsub.f32 %v5063_v56, %v1260_v20  ;;  %v1261_v44 = vmul.f32 0.015625, %v1229_v4  ;;  %v1410_v41 = vsel %vm421_vm1, %v1322_v51, 0.0  ;;  %v1323_v16 = vmul.f32 %v4245_v0, %v4245_v0  ;;  %2996 = vmatprep.subr.bf16.mxu1 %v3061_v33 }
 0x3c9   :  { %1411 = vadd.xlane.f32.xlu0 %v1410_v41 }
 0x3ca   :  { %v4259_v23 = vsub.f32 %v5064_v38, %v1261_v44  ;;  %v1413_v54 = vsel %vm421_vm1, %v1323_v16, 0.0  ;;  %v1324_v55 = vmul.f32 %v4252_v22, %v4252_v22 }
 0x3cb   :  { %1414 = vadd.xlane.f32.xlu1 %v1413_v54  ;;  %2997 = vmatpush3.bf16.msra.mxu1 %v3061_v33 }
 0x3cc   :  { %v1416_v2 = vsel %vm421_vm1, %v1324_v55, 0.0  ;;  %v1325_v3 = vmul.f32 %v4259_v23, %v4259_v23  ;;  %2998 = vmatprep.subr.bf16.mxu1 %v3062_v5 }
 0x3cd   :  { %1417 = vadd.xlane.f32.xlu0 %v1416_v2 }
 0x3ce   :  { %v1419_v49 = vsel %vm421_vm1, %v1325_v3, 0.0 }
 0x3cf   :  { %1420 = vadd.xlane.f32.xlu1 %v1419_v49  ;;  %2999 = vmatpush3.bf16.msra.mxu1 %v3062_v5 }
 0x3d0   :  { %3000 = vmatprep.subr.bf16.mxu1 %v3063_v57 }
 0x3d3   :  { %3001 = vmatpush3.bf16.msra.mxu1 %v3063_v57 }
 0x41e   :  { %v1328_v40 = vpop.xlane.xlu0 %1327 }
 0x41f   :  { %v1422_v20 = vmul.f32 0.015625, %v1328_v40 }
 0x420   :  { %v1331_v19 = vpop.xlane.xlu1 %1330 }
 0x421   :  { %v1454_v51 = vadd.f32 1e-05, %v1422_v20  ;;  %v1423_v4 = vmul.f32 0.015625, %v1331_v19 }
 0x422   :  { %v1334_v56 = vpop.xlane.xlu0 %1333 }
 0x423   :  { %3128 = vrsqrt.f32 %v1454_v51  ;;  %v1455_v44 = vadd.f32 1e-05, %v1423_v4  ;;  %v1424_v41 = vmul.f32 0.015625, %v1334_v56 }
 0x424   :  { %v1337_v16 = vpop.xlane.xlu1 %1336 }
 0x425   :  { %3130 = vrsqrt.f32 %v1455_v44  ;;  %v1456_v38 = vadd.f32 1e-05, %v1424_v41  ;;  %v1425_v54 = vmul.f32 0.015625, %v1337_v16 }
 0x426   :  { %v1340_v55 = vpop.xlane.xlu0 %1339 }
 0x427   :  { %3132 = vrsqrt.f32 %v1456_v38  ;;  %v1457_v2 = vadd.f32 1e-05, %v1425_v54  ;;  %v1426_v3 = vmul.f32 0.015625, %v1340_v55 }
 0x428   :  { %v1343_v49 = vpop.xlane.xlu1 %1342 }
 0x429   :  { %3134 = vrsqrt.f32 %v1457_v2  ;;  %v1458_v11 = vadd.f32 1e-05, %v1426_v3  ;;  %v1427_v33 = vmul.f32 0.015625, %v1343_v49 }
 0x42a   :  { %v1346_v5 = vpop.xlane.xlu0 %1345 }
 0x42b   :  { %3136 = vrsqrt.f32 %v1458_v11  ;;  %v1459_v57 = vadd.f32 1e-05, %v1427_v33  ;;  %v1428_v40 = vmul.f32 0.015625, %v1346_v5 }
 0x42c   :  { %v1349_v20 = vpop.xlane.xlu1 %1348 }
 0x42d   :  { %v3129_v19 = vpop.eup %3128  ;;  %3138 = vrsqrt.f32 %v1459_v57  ;;  %v1460_v51 = vadd.f32 1e-05, %v1428_v40  ;;  %v1429_v4 = vmul.f32 0.015625, %v1349_v20 }
 0x42e   :  { %v1352_v56 = vpop.xlane.xlu0 %1351  ;;  %v1518_v54 = vmul.f32 %v3129_v19, %v4043_v6 }
 0x42f   :  { %v3131_v44 = vpop.eup %3130  ;;  %3140 = vrsqrt.f32 %v1460_v51  ;;  %v1461_v41 = vadd.f32 1e-05, %v1429_v4  ;;  %v1430_v16 = vmul.f32 0.015625, %v1352_v56 }
 0x430   :  { %v1355_v38 = vpop.xlane.xlu1 %1354  ;;  %v1519_v55 = vmul.f32 %v3131_v44, %v4047_v37 }
 0x431   :  { %v3133_v2 = vpop.eup %3132  ;;  %3142 = vrsqrt.f32 %v1461_v41  ;;  %v1462_v3 = vadd.f32 1e-05, %v1430_v16  ;;  %v1431_v49 = vmul.f32 0.015625, %v1355_v38 }
 0x432   :  { %v1358_v11 = vpop.xlane.xlu0 %1357  ;;  %v1550_v33 = vpack.c.bf16 %v1519_v55, %v1518_v54  ;;  %v1520_v20 = vmul.f32 %v3133_v2, %v4053_v9 }
 0x433   :  { %v3135_v5 = vpop.eup %3134  ;;  %3144 = vrsqrt.f32 %v1462_v3  ;;  %v1463_v57 = vadd.f32 1e-05, %v1431_v49  ;;  %v1432_v40 = vmul.f32 0.015625, %v1358_v11 }
 0x434   :  { %v1521_v51 = vmul.f32 %v3135_v5, %v4060_v36  ;;  %v1361_v4 = vpop.xlane.xlu1 %1360  ;;  %2962 = vmatprep.mubr.msk.bf16.mxu0 %vm421_vm1, %v1550_v33 }
 0x435   :  { %v3137_v6 = vpop.eup %3136  ;;  %3146 = vrsqrt.f32 %v1463_v57  ;;  %v1464_v37 = vadd.f32 1e-05, %v1432_v40  ;;  %v1433_v19 = vmul.f32 0.015625, %v1361_v4 }
 0x436   :  { %v1551_v56 = vpack.c.bf16 %v1521_v51, %v1520_v20  ;;  %v1364_v44 = vpop.xlane.xlu0 %1363  ;;  %v1522_v9 = vmul.f32 %v3137_v6, %v4067_v1 }
 0x437   :  { %v3139_v41 = vpop.eup %3138  ;;  %3148 = vrsqrt.f32 %v1464_v37  ;;  %v1465_v16 = vadd.f32 1e-05, %v1433_v19  ;;  %v1434_v38 = vmul.f32 0.015625, %v1364_v44 }
 0x438   :  { %v1367_v54 = vpop.xlane.xlu1 %1366  ;;  %2963 = vmatmul.mubr.msk.bf16.vlgmr.msra.gmra.mrb[32].mxu0 %vm421_vm1, %v1551_v56  ;;  %v1523_v36 = vmul.f32 %v3139_v41, %v4074_v63 }
 0x439   :  { %v3141_v55 = vpop.eup %3140  ;;  %3150 = vrsqrt.f32 %v1465_v16  ;;  %v1466_v2 = vadd.f32 1e-05, %v1434_v38  ;;  %v1435_v3 = vmul.f32 0.015625, %v1367_v54 }
 0x43a   :  { %v1370_v49 = vpop.xlane.xlu0 %1369  ;;  %v1552_v11 = vpack.c.bf16 %v1523_v36, %v1522_v9  ;;  %v1524_v20 = vmul.f32 %v3141_v55, %v4081_v28 }
 0x43b   :  { %v3143_v33 = vpop.eup %3142  ;;  %3152 = vrsqrt.f32 %v1466_v2  ;;  %v1467_v5 = vadd.f32 1e-05, %v1435_v3  ;;  %v1436_v57 = vmul.f32 0.015625, %v1370_v49 }
 0x43c   :  { %v1373_v40 = vpop.xlane.xlu1 %1372  ;;  %2966 = vmatprep.mubr.msk.bf16.mxu0 %vm421_vm1, %v1552_v11  ;;  %v1525_v51 = vmul.f32 %v3143_v33, %v4088_v25 }
 0x43d   :  { %v3145_v1 = vpop.eup %3144  ;;  %3154 = vrsqrt.f32 %v1467_v5  ;;  %v1468_v63 = vadd.f32 1e-05, %v1436_v57  ;;  %v1437_v4 = vmul.f32 0.015625, %v1373_v40 }
 0x43e   :  { %v1376_v6 = vpop.xlane.xlu0 %1375  ;;  %v1553_v37 = vpack.c.bf16 %v1525_v51, %v1524_v20  ;;  %v1526_v16 = vmul.f32 %v3145_v1, %v4095_v15 }
 0x43f   :  { %v3147_v19 = vpop.eup %3146  ;;  %3156 = vrsqrt.f32 %v1468_v63  ;;  %v1469_v56 = vadd.f32 1e-05, %v1437_v4  ;;  %v1438_v44 = vmul.f32 0.015625, %v1376_v6 }
 0x440   :  { %v1379_v41 = vpop.xlane.xlu1 %1378  ;;  %2967 = vmatmul.mubr.msk.bf16.gmra.mrb[36].mxu0 %vm421_vm1, %v1553_v37  ;;  %v1527_v38 = vmul.f32 %v3147_v19, %v4102_v17 }
 0x441   :  { %v3149_v28 = vpop.eup %3148  ;;  %3158 = vrsqrt.f32 %v1469_v56  ;;  %v1470_v25 = vadd.f32 1e-05, %v1438_v44  ;;  %v1439_v54 = vmul.f32 0.015625, %v1379_v41 }
 0x442   :  { %v1382_v9 = vpop.xlane.xlu0 %1381  ;;  %v1554_v36 = vpack.c.bf16 %v1527_v38, %v1526_v16  ;;  %v1528_v11 = vmul.f32 %v3149_v28, %v4109_v26 }
 0x443   :  { %v3151_v55 = vpop.eup %3150  ;;  %3160 = vrsqrt.f32 %v1470_v25  ;;  %v1471_v2 = vadd.f32 1e-05, %v1439_v54  ;;  %v1440_v3 = vmul.f32 0.015625, %v1382_v9 }
 0x444   :  { %v1385_v49 = vpop.xlane.xlu1 %1384  ;;  %2970 = vmatprep.mubr.msk.bf16.mxu0 %vm421_vm1, %v1554_v36  ;;  %v1529_v33 = vmul.f32 %v3151_v55, %v4116_v30 }
 0x445   :  { %v3153_v15 = vpop.eup %3152  ;;  %3162 = vrsqrt.f32 %v1471_v2  ;;  %v1472_v17 = vadd.f32 1e-05, %v1440_v3  ;;  %v1441_v5 = vmul.f32 0.015625, %v1385_v49 }
 0x446   :  { %v1388_v57 = vpop.xlane.xlu0 %1387  ;;  %v1555_v40 = vpack.c.bf16 %v1529_v33, %v1528_v11  ;;  %v1530_v4 = vmul.f32 %v3153_v15, %v4123_v53 }
 0x447   :  { %v3155_v20 = vpop.eup %3154  ;;  %3164 = vrsqrt.f32 %v1472_v17  ;;  %v1473_v51 = vadd.f32 1e-05, %v1441_v5  ;;  %v1442_v1 = vmul.f32 0.015625, %v1388_v57 }
 0x448   :  { %v1391_v63 = vpop.xlane.xlu1 %1390  ;;  %2971 = vmatmul.mubr.msk.bf16.gmra.mrb[40].mxu0 %vm421_vm1, %v1555_v40  ;;  %v1531_v6 = vmul.f32 %v3155_v20, %v4130_v12 }
 0x449   :  { %v3157_v26 = vpop.eup %3156  ;;  %3166 = vrsqrt.f32 %v1473_v51  ;;  %v1474_v30 = vadd.f32 1e-05, %v1442_v1  ;;  %v1443_v37 = vmul.f32 0.015625, %v1391_v63 }
 0x44a   :  { %v1394_v19 = vpop.xlane.xlu0 %1393  ;;  %v1556_v56 = vpack.c.bf16 %v1531_v6, %v1530_v4  ;;  %v1532_v28 = vmul.f32 %v3157_v26, %v4137_v48 }
 0x44b   :  { %v3159_v44 = vpop.eup %3158  ;;  %3168 = vrsqrt.f32 %v1474_v30  ;;  %v1475_v41 = vadd.f32 1e-05, %v1443_v37  ;;  %v1444_v16 = vmul.f32 0.015625, %v1394_v19 }
 0x44c   :  { %v1397_v38 = vpop.xlane.xlu1 %1396  ;;  %2974 = vmatprep.mubr.msk.bf16.mxu0 %vm421_vm1, %v1556_v56  ;;  %v1533_v25 = vmul.f32 %v3159_v44, %v4144_v35 }
 0x44d   :  { %v3161_v53 = vpop.eup %3160  ;;  %3170 = vrsqrt.f32 %v1475_v41  ;;  %v1476_v12 = vadd.f32 1e-05, %v1444_v16  ;;  %v1445_v54 = vmul.f32 0.015625, %v1397_v38 }
 0x44e   :  { %v1400_v9 = vpop.xlane.xlu0 %1399  ;;  %v1557_v36 = vpack.c.bf16 %v1533_v25, %v1532_v28  ;;  %v1534_v11 = vmul.f32 %v3161_v53, %v4151_v18 }
 0x44f   :  { %v3163_v55 = vpop.eup %3162  ;;  %3172 = vrsqrt.f32 %v1476_v12  ;;  %v1477_v2 = vadd.f32 1e-05, %v1445_v54  ;;  %v1446_v3 = vmul.f32 0.015625, %v1400_v9 }
 0x450   :  { %v1403_v49 = vpop.xlane.xlu1 %1402  ;;  %2975 = vmatmul.mubr.msk.bf16.gmra.mrb[44].mxu0 %vm421_vm1, %v1557_v36  ;;  %v1535_v33 = vmul.f32 %v3163_v55, %v4158_v13 }
 0x451   :  { %v3165_v48 = vpop.eup %3164  ;;  %3174 = vrsqrt.f32 %v1477_v2  ;;  %v1478_v35 = vadd.f32 1e-05, %v1446_v3  ;;  %v1447_v15 = vmul.f32 0.015625, %v1403_v49 }
 0x452   :  { %v1406_v17 = vpop.xlane.xlu0 %1405  ;;  %v1558_v5 = vpack.c.bf16 %v1535_v33, %v1534_v11  ;;  %v1536_v1 = vmul.f32 %v3165_v48, %v4165_v39 }
 0x453   :  { %v3167_v57 = vpop.eup %3166  ;;  %3176 = vrsqrt.f32 %v1478_v35  ;;  %v1479_v40 = vadd.f32 1e-05, %v1447_v15  ;;  %v1448_v20 = vmul.f32 0.015625, %v1406_v17 }
 0x454   :  { %v1409_v51 = vpop.xlane.xlu1 %1408  ;;  %2978 = vmatprep.mubr.msk.bf16.mxu0 %vm421_vm1, %v1558_v5  ;;  %v1537_v63 = vmul.f32 %v3167_v57, %v4172_v32 }
 0x455   :  { %v3169_v18 = vpop.eup %3168  ;;  %3178 = vrsqrt.f32 %v1479_v40  ;;  %v1480_v13 = vadd.f32 1e-05, %v1448_v20  ;;  %v1449_v4 = vmul.f32 0.015625, %v1409_v51 }
 0x456   :  { %v1412_v6 = vpop.xlane.xlu0 %1411  ;;  %v1559_v26 = vpack.c.bf16 %v1537_v63, %v1536_v1  ;;  %v1538_v44 = vmul.f32 %v3169_v18, %v4182_v47 }
 0x457   :  { %v3171_v30 = vpop.eup %3170  ;;  %3180 = vrsqrt.f32 %v1480_v13  ;;  %v1481_v37 = vadd.f32 1e-05, %v1449_v4  ;;  %v1450_v19 = vmul.f32 0.015625, %v1412_v6 }
 0x458   :  { %v1415_v56 = vpop.xlane.xlu1 %1414  ;;  %2979 = vmatmul.mubr.msk.bf16.gmra.mrb[48].mxu0 %vm421_vm1, %v1559_v26  ;;  %v1539_v41 = vmul.f32 %v3171_v30, %v4189_v52 }
 0x459   :  { %v3173_v39 = vpop.eup %3172  ;;  %3182 = vrsqrt.f32 %v1481_v37  ;;  %v1482_v32 = vadd.f32 1e-05, %v1450_v19  ;;  %v1451_v16 = vmul.f32 0.015625, %v1415_v56 }
 0x45a   :  { %v1418_v38 = vpop.xlane.xlu0 %1417  ;;  %v1560_v28 = vpack.c.bf16 %v1539_v41, %v1538_v44  ;;  %v1540_v9 = vmul.f32 %v3173_v39, %v4196_v7 }
 0x45b   :  { %v3175_v25 = vpop.eup %3174  ;;  %3184 = vrsqrt.f32 %v1482_v32  ;;  %v1483_v53 = vadd.f32 1e-05, %v1451_v16  ;;  %v1452_v12 = vmul.f32 0.015625, %v1418_v38 }
 0x45c   :  { %v1421_v54 = vpop.xlane.xlu1 %1420  ;;  %2982 = vmatprep.mubr.msk.bf16.mxu0 %vm421_vm1, %v1560_v28  ;;  %v1541_v36 = vmul.f32 %v3175_v25, %v4203_v34 }
 0x45d   :  { %v3177_v47 = vpop.eup %3176  ;;  %3186 = vrsqrt.f32 %v1483_v53  ;;  %v1484_v52 = vadd.f32 1e-05, %v1452_v12  ;;  %v1453_v55 = vmul.f32 0.015625, %v1421_v54 }
 0x45e   :  { %v1561_v2 = vpack.c.bf16 %v1541_v36, %v1540_v9  ;;  %v1542_v11 = vmul.f32 %v3177_v47, %v4210_v60 }
 0x45f   :  { %v3179_v3 = vpop.eup %3178  ;;  %3188 = vrsqrt.f32 %v1484_v52  ;;  %v1485_v49 = vadd.f32 1e-05, %v1453_v55 }
 0x460   :  { %2983 = vmatmul.mubr.msk.bf16.gmra.mrb[52].mxu0 %vm421_vm1, %v1561_v2  ;;  %v1543_v33 = vmul.f32 %v3179_v3, %v4217_v50 }
 0x461   :  { %v3181_v48 = vpop.eup %3180  ;;  %3190 = vrsqrt.f32 %v1485_v49 }
 0x462   :  { %v1562_v35 = vpack.c.bf16 %v1543_v33, %v1542_v11  ;;  %v1544_v34 = vmul.f32 %v3181_v48, %v4224_v14 }
 0x463   :  { %v3183_v7 = vpop.eup %3182 }
 0x464   :  { %2986 = vmatprep.mubr.msk.bf16.mxu0 %vm421_vm1, %v1562_v35  ;;  %v1545_v15 = vmul.f32 %v3183_v7, %v4231_v8  ;;  %v4331_v8 = vld [vmem:[%s4974_s6] ss:$0 sm:$0xff] }
 0x465   :  { %v3185_v17 = vpop.eup %3184 }
 0x466   :  { %v1563_v5 = vpack.c.bf16 %v1545_v15, %v1544_v34  ;;  %v1546_v40 = vmul.f32 %v3185_v17, %v4238_v21 }
 0x467   :  { %v3187_v57 = vpop.eup %3186 }
 0x468   :  { %2987 = vmatmul.mubr.msk.bf16.gmra.mrb[56].mxu0 %vm421_vm1, %v1563_v5  ;;  %v1547_v60 = vmul.f32 %v3187_v57, %v4245_v0 }
 0x469   :  { %v3189_v50 = vpop.eup %3188 }
 0x46a   :  { %v1564_v20 = vpack.c.bf16 %v1547_v60, %v1546_v40  ;;  %v1548_v1 = vmul.f32 %v3189_v50, %v4252_v22 }
 0x46b   :  { %v3191_v51 = vpop.eup %3190 }
 0x46c   :  { %2990 = vmatprep.mubr.msk.bf16.mxu0 %vm421_vm1, %v1564_v20  ;;  %v1549_v14 = vmul.f32 %v3191_v51, %v4259_v23 }
 0x46e   :  { %v1565_v63 = vpack.c.bf16 %v1549_v14, %v1548_v1 }
 0x470   :  { %2991 = vmatmul.mubr.msk.bf16.gmra.mrb[60].mxu0 %vm421_vm1, %v1565_v63 }
 0x50b   :  { %v2964_v21 = vpop.f32.mrb[32].mxu0 }
 0x50c   :  { %v1695_v0 = vadd.f32 %v2964_v21, %v4331_v8  ;;  %v1686_v18 = vpop.f32.mrb[33].mxu0 }
 0x50d   :  { %v1687_v13 = vadd.f32 %v4331_v8, %v1686_v18  ;;  %v2965_v4 = vpop.f32.mrb[34].mxu0 }
 0x50e   :  { %v1815_v6 = vmax.f32 %v1695_v0, 0.0  ;;  %v1698_v22 = vadd.f32 %v2965_v4, %v4331_v8  ;;  %v1689_v26 = vpop.f32.mrb[35].mxu0 }
 0x50f   :  { %v1813_v23 = vmax.f32 %v1687_v13, 0.0  ;;  %v1690_v30 = vadd.f32 %v4331_v8, %v1689_v26  ;;  %v5066_v26 = vld [vmem:[#allocation2_spill] sm:$0xff] }
 0x510   :  { %v1816_v37 = vmax.f32 %v1698_v22, 0.0  ;;  %v1847_v56 = vadd.f32 %v1815_v6, %v3393_v24  ;;  %v5065_v6 = vld [vmem:[#allocation3_spill] sm:$0xff] }
 0x511   :  { %v1814_v19 = vmax.f32 %v1690_v30, 0.0  ;;  %v1845_v41 = vadd.f32 %v1813_v23, %v3396_v27  ;;  %v5067_v30 = vld [vmem:[#allocation4_spill] sm:$0xff] }
 0x512   :  { %v1848_v44 = vadd.f32 %v1816_v37, %v3399_v29 }
 0x513   :  { %v1846_v39 = vadd.f32 %v1814_v19, %v3403_v31  ;;  %v2968_v32 = vpop.f32.mrb[36].mxu0 }
 0x514   :  { %v1878_v16 = vpack.c.bf16 %v1848_v44, %v1847_v56  ;;  %v1711_v38 = vadd.f32 %v2968_v32, %v4331_v8  ;;  %v1702_v28 = vpop.f32.mrb[37].mxu0 }
 0x515   :  { %v1877_v25 = vpack.c.bf16 %v1846_v39, %v1845_v41  ;;  %v1703_v53 = vadd.f32 %v4331_v8, %v1702_v28  ;;  %v2969_v12 = vpop.f32.mrb[38].mxu0 }
 0x516   :  { %v1819_v54 = vmax.f32 %v1711_v38, 0.0  ;;  %v1714_v9 = vadd.f32 %v2969_v12, %v4331_v8  ;;  %v1705_v36 = vpop.f32.mrb[39].mxu0 }
 0x517   :  { %v1817_v24 = vmax.f32 %v1703_v53, 0.0  ;;  %v1706_v29 = vadd.f32 %v4331_v8, %v1705_v36  ;;  %3002 = vmatprep.mubr.msk.bf16.mxu1 %vm421_vm1, %v1877_v25 }
 0x518   :  { %v1820_v27 = vmax.f32 %v1714_v9, 0.0  ;;  %3003 = vmatmul.mubr.msk.bf16.vlgmr.msra.gmra.mrb[32].mxu1 %vm421_vm1, %v1878_v16  ;;  %v1851_v47 = vadd.f32 %v1819_v54, %v3414_v42  ;;  %v5068_v9 = vld [vmem:[#allocation5_spill] sm:$0xff] }
 0x519   :  { %v1818_v31 = vmax.f32 %v1706_v29, 0.0  ;;  %v1849_v55 = vadd.f32 %v1817_v24, %v3416_v43  ;;  %v5069_v24 = vld [vmem:[#allocation7_spill] sm:$0xff] }
 0x51a   :  { %v1852_v52 = vadd.f32 %v1820_v27, %v3419_v45  ;;  %v5070_v27 = vld [vmem:[#allocation6_spill] sm:$0xff] }
 0x51b   :  { %v1850_v2 = vadd.f32 %v1818_v31, %v3421_v46  ;;  %v2972_v3 = vpop.f32.mrb[40].mxu0 }
 0x51c   :  { %v1880_v49 = vpack.c.bf16 %v1852_v52, %v1851_v47  ;;  %v1727_v11 = vadd.f32 %v2972_v3, %v4331_v8  ;;  %v1718_v33 = vpop.f32.mrb[41].mxu0  ;;  %v5071_v47 = vld [vmem:[#allocation8_spill] sm:$0xff] }
 0x51d   :  { %v1879_v48 = vpack.c.bf16 %v1850_v2, %v1849_v55  ;;  %v1719_v35 = vadd.f32 %v4331_v8, %v1718_v33  ;;  %v2973_v7 = vpop.f32.mrb[42].mxu0 }
 0x51e   :  { %v1823_v34 = vmax.f32 %v1727_v11, 0.0  ;;  %v1730_v15 = vadd.f32 %v2973_v7, %v4331_v8  ;;  %v1721_v17 = vpop.f32.mrb[43].mxu0 }
 0x51f   :  { %v1821_v42 = vmax.f32 %v1719_v35, 0.0  ;;  %v1722_v45 = vadd.f32 %v4331_v8, %v1721_v17  ;;  %3006 = vmatprep.mubr.msk.bf16.mxu1 %vm421_vm1, %v1879_v48 }
 0x520   :  { %v1824_v43 = vmax.f32 %v1730_v15, 0.0  ;;  %3007 = vmatmul.mubr.msk.bf16.gmra.mrb[36].mxu1 %vm421_vm1, %v1880_v49  ;;  %v1855_v5 = vadd.f32 %v1823_v34, %v3434_v58 }
 0x521   :  { %v1822_v46 = vmax.f32 %v1722_v45, 0.0  ;;  %v1853_v40 = vadd.f32 %v1821_v42, %v3436_v59 }
 0x522   :  { %v1856_v57 = vadd.f32 %v1824_v43, %v3439_v61  ;;  %v5072_v43 = vld [vmem:[#allocation9_spill] sm:$0xff] }
 0x523   :  { %v1854_v60 = vadd.f32 %v1822_v46, %v3441_v62  ;;  %v2976_v50 = vpop.f32.mrb[44].mxu0 }
 0x524   :  { %v1882_v20 = vpack.c.bf16 %v1856_v57, %v1855_v5  ;;  %v1743_v51 = vadd.f32 %v2976_v50, %v4331_v8  ;;  %v1734_v1 = vpop.f32.mrb[45].mxu0  ;;  %v5073_v5 = vld [vmem:[#allocation11_spill] sm:$0xff]  ;;  %v5075_v50 = vld [vmem:[#allocation12_spill] sm:$0xff] }
 0x525   :  { %v1881_v14 = vpack.c.bf16 %v1854_v60, %v1853_v40  ;;  %v1735_v63 = vadd.f32 %v4331_v8, %v1734_v1  ;;  %v2977_v21 = vpop.f32.mrb[46].mxu0  ;;  %v5074_v40 = vld [vmem:[#allocation10_spill] sm:$0xff] }
 0x526   :  { %v1827_v0 = vmax.f32 %v1743_v51, 0.0  ;;  %v1746_v18 = vadd.f32 %v2977_v21, %v4331_v8  ;;  %v1737_v13 = vpop.f32.mrb[47].mxu0 }
 0x527   :  { %v1825_v58 = vmax.f32 %v1735_v63, 0.0  ;;  %v1738_v61 = vadd.f32 %v4331_v8, %v1737_v13  ;;  %3010 = vmatprep.mubr.msk.bf16.mxu1 %vm421_vm1, %v1881_v14 }
 0x528   :  { %v1828_v59 = vmax.f32 %v1746_v18, 0.0  ;;  %3011 = vmatmul.mubr.msk.bf16.gmra.mrb[40].mxu1 %vm421_vm1, %v1882_v20  ;;  %v1859_v4 = vadd.f32 %v1827_v0, %v3454_v10 }
 0x529   :  { %v1826_v62 = vmax.f32 %v1738_v61, 0.0  ;;  %v1857_v23 = vadd.f32 %v1825_v58, %v5066_v26 }
 0x52a   :  { %v1860_v22 = vadd.f32 %v1828_v59, %v5065_v6 }
 0x52b   :  { %v1858_v37 = vadd.f32 %v1826_v62, %v5067_v30  ;;  %v2980_v19 = vpop.f32.mrb[48].mxu0 }
 0x52c   :  { %v1884_v56 = vpack.c.bf16 %v1860_v22, %v1859_v4  ;;  %v1759_v44 = vadd.f32 %v2980_v19, %v4331_v8  ;;  %v1750_v41 = vpop.f32.mrb[49].mxu0  ;;  %v5076_v22 = vld [vmem:[#allocation13_spill] sm:$0xff] }
 0x52d   :  { %v1883_v39 = vpack.c.bf16 %v1858_v37, %v1857_v23  ;;  %v1751_v32 = vadd.f32 %v4331_v8, %v1750_v41  ;;  %v2981_v16 = vpop.f32.mrb[50].mxu0  ;;  %v5077_v23 = vld [vmem:[#allocation15_spill] sm:$0xff]  ;;  %v5078_v37 = vld [vmem:[#allocation14_spill] sm:$0xff] }
 0x52e   :  { %v1831_v38 = vmax.f32 %v1759_v44, 0.0  ;;  %v1762_v28 = vadd.f32 %v2981_v16, %v4331_v8  ;;  %v1753_v25 = vpop.f32.mrb[51].mxu0 }
 0x52f   :  { %v1829_v10 = vmax.f32 %v1751_v32, 0.0  ;;  %v1754_v53 = vadd.f32 %v4331_v8, %v1753_v25  ;;  %3014 = vmatprep.mubr.msk.bf16.mxu1 %vm421_vm1, %v1883_v39 }
 0x530   :  { %v1832_v12 = vmax.f32 %v1762_v28, 0.0  ;;  %3015 = vmatmul.mubr.msk.bf16.gmra.mrb[44].mxu1 %vm421_vm1, %v1884_v56  ;;  %v1863_v36 = vadd.f32 %v1831_v38, %v5068_v9  ;;  %v5079_v56 = vld [vmem:[#allocation16_spill] sm:$0xff] }
 0x531   :  { %v1830_v54 = vmax.f32 %v1754_v53, 0.0  ;;  %v1861_v31 = vadd.f32 %v1829_v10, %v5070_v27 }
 0x532   :  { %v1864_v29 = vadd.f32 %v1832_v12, %v5069_v24 }
 0x533   :  { %v1862_v52 = vadd.f32 %v1830_v54, %v5071_v47  ;;  %v2984_v55 = vpop.f32.mrb[52].mxu0 }
 0x534   :  { %v1886_v2 = vpack.c.bf16 %v1864_v29, %v1863_v36  ;;  %v1775_v3 = vadd.f32 %v2984_v55, %v4331_v8  ;;  %v1766_v49 = vpop.f32.mrb[53].mxu0  ;;  %v5080_v29 = vld [vmem:[#allocation17_spill] sm:$0xff] }
 0x535   :  { %v1885_v11 = vpack.c.bf16 %v1862_v52, %v1861_v31  ;;  %v1767_v33 = vadd.f32 %v4331_v8, %v1766_v49  ;;  %v2985_v48 = vpop.f32.mrb[54].mxu0  ;;  %v5081_v31 = vld [vmem:[#allocation19_spill] sm:$0xff]  ;;  %v5082_v52 = vld [vmem:[#allocation18_spill] sm:$0xff] }
 0x536   :  { %v1835_v35 = vmax.f32 %v1775_v3, 0.0  ;;  %v1778_v7 = vadd.f32 %v2985_v48, %v4331_v8  ;;  %v1769_v34 = vpop.f32.mrb[55].mxu0 }
 0x537   :  { %v1833_v15 = vmax.f32 %v1767_v33, 0.0  ;;  %v1770_v17 = vadd.f32 %v4331_v8, %v1769_v34  ;;  %3018 = vmatprep.mubr.msk.bf16.mxu1 %vm421_vm1, %v1885_v11 }
 0x538   :  { %v1836_v42 = vmax.f32 %v1778_v7, 0.0  ;;  %3019 = vmatmul.mubr.msk.bf16.gmra.mrb[48].mxu1 %vm421_vm1, %v1886_v2  ;;  %v1867_v46 = vadd.f32 %v1835_v35, %v5072_v43  ;;  %v5083_v2 = vld [vmem:[#allocation20_spill] sm:$0xff] }
 0x539   :  { %v1834_v45 = vmax.f32 %v1770_v17, 0.0  ;;  %v1865_v60 = vadd.f32 %v1833_v15, %v5074_v40 }
 0x53a   :  { %v1868_v57 = vadd.f32 %v1836_v42, %v5073_v5 }
 0x53b   :  { %v1866_v20 = vadd.f32 %v1834_v45, %v5075_v50  ;;  %v2988_v51 = vpop.f32.mrb[56].mxu0 }
 0x53c   :  { %v1888_v1 = vpack.c.bf16 %v1868_v57, %v1867_v46  ;;  %v1791_v14 = vadd.f32 %v2988_v51, %v4331_v8  ;;  %v1782_v63 = vpop.f32.mrb[57].mxu0 }
 0x53d   :  { %v1887_v21 = vpack.c.bf16 %v1866_v20, %v1865_v60  ;;  %v1783_v0 = vadd.f32 %v4331_v8, %v1782_v63  ;;  %v2989_v18 = vpop.f32.mrb[58].mxu0 }
 0x53e   :  { %v1839_v13 = vmax.f32 %v1791_v14, 0.0  ;;  %v1794_v58 = vadd.f32 %v2989_v18, %v4331_v8  ;;  %v1785_v61 = vpop.f32.mrb[59].mxu0 }
 0x53f   :  { %v1837_v59 = vmax.f32 %v1783_v0, 0.0  ;;  %v1786_v62 = vadd.f32 %v4331_v8, %v1785_v61  ;;  %3022 = vmatprep.mubr.msk.bf16.mxu1 %vm421_vm1, %v1887_v21 }
 0x540   :  { %v1840_v4 = vmax.f32 %v1794_v58, 0.0  ;;  %3023 = vmatmul.mubr.msk.bf16.gmra.mrb[52].mxu1 %vm421_vm1, %v1888_v1  ;;  %v1871_v26 = vadd.f32 %v1839_v13, %v5076_v22 }
 0x541   :  { %v1838_v6 = vmax.f32 %v1786_v62, 0.0  ;;  %v1869_v19 = vadd.f32 %v1837_v59, %v5078_v37 }
 0x542   :  { %v1872_v30 = vadd.f32 %v1840_v4, %v5077_v23 }
 0x543   :  { %v1870_v44 = vadd.f32 %v1838_v6, %v5079_v56  ;;  %v2992_v41 = vpop.f32.mrb[60].mxu0 }
 0x544   :  { %v1890_v39 = vpack.c.bf16 %v1872_v30, %v1871_v26  ;;  %v1807_v32 = vadd.f32 %v2992_v41, %v4331_v8  ;;  %v1798_v16 = vpop.f32.mrb[61].mxu0 }
 0x545   :  { %v1889_v38 = vpack.c.bf16 %v1870_v44, %v1869_v19  ;;  %v1799_v28 = vadd.f32 %v4331_v8, %v1798_v16  ;;  %v2993_v25 = vpop.f32.mrb[62].mxu0 }
 0x546   :  { %v1843_v10 = vmax.f32 %v1807_v32, 0.0  ;;  %v1810_v53 = vadd.f32 %v2993_v25, %v4331_v8  ;;  %v1801_v12 = vpop.f32.mrb[63].mxu0 }
 0x547   :  { %v1841_v54 = vmax.f32 %v1799_v28, 0.0  ;;  %v1802_v9 = vadd.f32 %v4331_v8, %v1801_v12  ;;  %3026 = vmatprep.mubr.msk.bf16.mxu1 %vm421_vm1, %v1889_v38  ;;  %v4416_v8 = vld [vmem:[%s4975_s8] ss:$0 sm:$0xff] }
 0x548   :  { %v1844_v36 = vmax.f32 %v1810_v53, 0.0  ;;  %3027 = vmatmul.mubr.msk.bf16.gmra.mrb[56].mxu1 %vm421_vm1, %v1890_v39  ;;  %v1875_v27 = vadd.f32 %v1843_v10, %v5080_v29 }
 0x549   :  { %v1842_v24 = vmax.f32 %v1802_v9, 0.0  ;;  %v1873_v55 = vadd.f32 %v1841_v54, %v5082_v52 }
 0x54a   :  { %v1876_v47 = vadd.f32 %v1844_v36, %v5081_v31 }
 0x54b   :  { %v1874_v3 = vadd.f32 %v1842_v24, %v5083_v2 }
 0x54c   :  { %v1892_v49 = vpack.c.bf16 %v1876_v47, %v1875_v27 }
 0x54d   :  { %v1891_v11 = vpack.c.bf16 %v1874_v3, %v1873_v55 }
 0x54f   :  { %3030 = vmatprep.mubr.msk.bf16.mxu1 %vm421_vm1, %v1891_v11 }
 0x550   :  { %3031 = vmatmul.mubr.msk.bf16.gmra.mrb[60].mxu1 %vm421_vm1, %v1892_v49 }
 0x5eb   :  { %v3004_v33 = vpop.f32.mrb[32].mxu1 }
 0x5ec   :  { %v4419_v48 = vadd.f32 %v3004_v33, %v4416_v8  ;;  %v2013_v35 = vpop.f32.mrb[33].mxu1 }
 0x5ed   :  { %v3005_v7 = vpop.f32.mrb[34].mxu1  ;;  %v4426_v17 = vadd.f32 %v4416_v8, %v2013_v35 }
 0x5ee   :  { %v4422_v34 = vadd.f32 %v3005_v7, %v4416_v8  ;;  %2144 = vadd.xlane.f32.xlu0 %v4419_v48  ;;  %v2016_v15 = vpop.f32.mrb[35].mxu1  ;;  %v2238_v46 = vmul.f32 %v4419_v48, %v4419_v48 }
 0x5ef   :  { %v4430_v42 = vadd.f32 %v4416_v8, %v2016_v15  ;;  %v2236_v60 = vmul.f32 %v4426_v17, %v4426_v17 }
 0x5f0   :  { %2146 = vadd.xlane.f32.xlu1 %v4422_v34  ;;  %v2239_v40 = vmul.f32 %v4422_v34, %v4422_v34 }
 0x5f1   :  { %v2237_v50 = vmul.f32 %v4430_v42, %v4430_v42 }
 0x5f2   :  { %2140 = vadd.xlane.f32.xlu0 %v4426_v17 }
 0x5f3   :  { %v3008_v45 = vpop.f32.mrb[36].mxu1 }
 0x5f4   :  { %2142 = vadd.xlane.f32.xlu1 %v4430_v42  ;;  %v2029_v43 = vpop.f32.mrb[37].mxu1  ;;  %v4443_v51 = vadd.f32 %v3008_v45, %v4416_v8 }
 0x5f5   :  { %v3009_v5 = vpop.f32.mrb[38].mxu1  ;;  %v4450_v0 = vadd.f32 %v4416_v8, %v2029_v43 }
 0x5f6   :  { %2272 = vadd.xlane.f32.xlu0 %v2238_v46  ;;  %v2032_v57 = vpop.f32.mrb[39].mxu1  ;;  %v4446_v63 = vadd.f32 %v3009_v5, %v4416_v8  ;;  %v2242_v61 = vmul.f32 %v4443_v51, %v4443_v51 }
 0x5f7   :  { %v4454_v18 = vadd.f32 %v4416_v8, %v2032_v57  ;;  %v2240_v6 = vmul.f32 %v4450_v0, %v4450_v0 }
 0x5f8   :  { %2274 = vadd.xlane.f32.xlu1 %v2239_v40  ;;  %v2243_v4 = vmul.f32 %v4446_v63, %v4446_v63 }
 0x5f9   :  { %v2241_v22 = vmul.f32 %v4454_v18, %v4454_v18 }
 0x5fa   :  { %2268 = vadd.xlane.f32.xlu0 %v2236_v60 }
 0x5fb   :  { %v3012_v20 = vpop.f32.mrb[40].mxu1 }
 0x5fc   :  { %2270 = vadd.xlane.f32.xlu1 %v2237_v50  ;;  %v2045_v1 = vpop.f32.mrb[41].mxu1  ;;  %v4467_v23 = vadd.f32 %v3012_v20, %v4416_v8 }
 0x5fd   :  { %v3013_v14 = vpop.f32.mrb[42].mxu1  ;;  %v4486_v16 = vadd.f32 %v4416_v8, %v2045_v1 }
 0x5fe   :  { %2152 = vadd.xlane.f32.xlu0 %v4443_v51  ;;  %v2048_v21 = vpop.f32.mrb[43].mxu1  ;;  %v4476_v44 = vadd.f32 %v3013_v14, %v4416_v8  ;;  %v2246_v53 = vmul.f32 %v4467_v23, %v4467_v23 }
 0x5ff   :  { %v4490_v38 = vadd.f32 %v4416_v8, %v2048_v21  ;;  %v2244_v27 = vmul.f32 %v4486_v16, %v4486_v16 }
 0x600   :  { %2154 = vadd.xlane.f32.xlu1 %v4446_v63  ;;  %v2247_v24 = vmul.f32 %v4476_v44, %v4476_v44 }
 0x601   :  { %v2245_v31 = vmul.f32 %v4490_v38, %v4490_v38 }
 0x602   :  { %2148 = vadd.xlane.f32.xlu0 %v4450_v0 }
 0x603   :  { %v3016_v13 = vpop.f32.mrb[44].mxu1 }
 0x604   :  { %2150 = vadd.xlane.f32.xlu1 %v4454_v18  ;;  %v2061_v58 = vpop.f32.mrb[45].mxu1  ;;  %v4515_v52 = vadd.f32 %v3016_v13, %v4416_v8 }
 0x605   :  { %v3017_v59 = vpop.f32.mrb[46].mxu1  ;;  %v4534_v15 = vadd.f32 %v4416_v8, %v2061_v58 }
 0x606   :  { %2280 = vadd.xlane.f32.xlu0 %v2242_v61  ;;  %v2064_v62 = vpop.f32.mrb[47].mxu1  ;;  %v4524_v11 = vadd.f32 %v3017_v59, %v4416_v8  ;;  %v2250_v57 = vmul.f32 %v4515_v52, %v4515_v52 }
 0x607   :  { %v4538_v45 = vadd.f32 %v4416_v8, %v2064_v62  ;;  %v2248_v21 = vmul.f32 %v4534_v15, %v4534_v15 }
 0x608   :  { %2282 = vadd.xlane.f32.xlu1 %v2243_v4  ;;  %v2251_v1 = vmul.f32 %v4524_v11, %v4524_v11 }
 0x609   :  { %v2249_v13 = vmul.f32 %v4538_v45, %v4538_v45 }
 0x60a   :  { %2276 = vadd.xlane.f32.xlu0 %v2240_v6 }
 0x60b   :  { %v3020_v26 = vpop.f32.mrb[48].mxu1 }
 0x60c   :  { %v4470_v30 = vadd.f32 %v3020_v26, %v4416_v8  ;;  %2278 = vadd.xlane.f32.xlu1 %v2241_v22  ;;  %v2077_v37 = vpop.f32.mrb[49].mxu1 }
 0x60d   :  { %v4473_v19 = vadd.f32 %v4416_v8, %v2077_v37  ;;  %v3021_v56 = vpop.f32.mrb[50].mxu1 }
 0x60e   :  { %v4479_v41 = vadd.f32 %v3021_v56, %v4416_v8  ;;  %2160 = vadd.xlane.f32.xlu0 %v4467_v23  ;;  %v2080_v39 = vpop.f32.mrb[51].mxu1 }
 0x60f   :  { %v4483_v32 = vadd.f32 %v4416_v8, %v2080_v39  ;;  %v2252_v61 = vmul.f32 %v4473_v19, %v4473_v19 }
 0x610   :  { %2162 = vadd.xlane.f32.xlu1 %v4476_v44  ;;  %v2255_v58 = vmul.f32 %v4479_v41, %v4479_v41 }
 0x611   :  { %v2253_v59 = vmul.f32 %v4483_v32, %v4483_v32 }
 0x612   :  { %2156 = vadd.xlane.f32.xlu0 %v4486_v16 }
 0x613   :  { %v3024_v28 = vpop.f32.mrb[52].mxu1 }
 0x614   :  { %v4494_v25 = vadd.f32 %v3024_v28, %v4416_v8  ;;  %2158 = vadd.xlane.f32.xlu1 %v4490_v38  ;;  %v2093_v10 = vpop.f32.mrb[53].mxu1 }
 0x615   :  { %v4500_v12 = vadd.f32 %v4416_v8, %v2093_v10  ;;  %v3025_v54 = vpop.f32.mrb[54].mxu1 }
 0x616   :  { %v4503_v9 = vadd.f32 %v3025_v54, %v4416_v8  ;;  %2288 = vadd.xlane.f32.xlu0 %v2246_v53  ;;  %v2096_v36 = vpop.f32.mrb[55].mxu1  ;;  %v2258_v62 = vmul.f32 %v4494_v25, %v4494_v25 }
 0x617   :  { %v4508_v29 = vadd.f32 %v4416_v8, %v2096_v36  ;;  %v2256_v6 = vmul.f32 %v4500_v12, %v4500_v12 }
 0x618   :  { %2290 = vadd.xlane.f32.xlu1 %v2247_v24  ;;  %v2259_v4 = vmul.f32 %v4503_v9, %v4503_v9 }
 0x619   :  { %v2257_v22 = vmul.f32 %v4508_v29, %v4508_v29 }
 0x61a   :  { %2284 = vadd.xlane.f32.xlu0 %v2244_v27 }
 0x61b   :  { %v3028_v47 = vpop.f32.mrb[56].mxu1 }
 0x61c   :  { %v4518_v55 = vadd.f32 %v3028_v47, %v4416_v8  ;;  %2286 = vadd.xlane.f32.xlu1 %v2245_v31  ;;  %v2109_v2 = vpop.f32.mrb[57].mxu1 }
 0x61d   :  { %v4521_v3 = vadd.f32 %v4416_v8, %v2109_v2  ;;  %v3029_v49 = vpop.f32.mrb[58].mxu1 }
 0x61e   :  { %v4527_v33 = vadd.f32 %v3029_v49, %v4416_v8  ;;  %2168 = vadd.xlane.f32.xlu0 %v4515_v52  ;;  %v2112_v35 = vpop.f32.mrb[59].mxu1  ;;  %v2262_v26 = vmul.f32 %v4518_v55, %v4518_v55 }
 0x61f   :  { %v4531_v7 = vadd.f32 %v4416_v8, %v2112_v35  ;;  %v2260_v56 = vmul.f32 %v4521_v3, %v4521_v3 }
 0x620   :  { %2170 = vadd.xlane.f32.xlu1 %v4524_v11  ;;  %v2263_v37 = vmul.f32 %v4527_v33, %v4527_v33 }
 0x621   :  { %v2261_v39 = vmul.f32 %v4531_v7, %v4531_v7 }
 0x622   :  { %2164 = vadd.xlane.f32.xlu0 %v4534_v15 }
 0x623   :  { %v3032_v43 = vpop.f32.mrb[60].mxu1 }
 0x624   :  { %v4542_v46 = vadd.f32 %v3032_v43, %v4416_v8  ;;  %2166 = vadd.xlane.f32.xlu1 %v4538_v45  ;;  %v2125_v5 = vpop.f32.mrb[61].mxu1 }
 0x625   :  { %v4548_v40 = vadd.f32 %v4416_v8, %v2125_v5  ;;  %v3033_v60 = vpop.f32.mrb[62].mxu1 }
 0x626   :  { %v4551_v50 = vadd.f32 %v3033_v60, %v4416_v8  ;;  %2296 = vadd.xlane.f32.xlu0 %v2250_v57  ;;  %v2128_v20 = vpop.f32.mrb[63].mxu1  ;;  %v2266_v53 = vmul.f32 %v4542_v46, %v4542_v46 }
 0x627   :  { %v4556_v14 = vadd.f32 %v4416_v8, %v2128_v20  ;;  %v2254_v8 = vmul.f32 %v4470_v30, %v4470_v30  ;;  %v2264_v28 = vmul.f32 %v4548_v40, %v4548_v40 }
 0x628   :  { %2298 = vadd.xlane.f32.xlu1 %v2251_v1  ;;  %v2267_v54 = vmul.f32 %v4551_v50, %v4551_v50 }
 0x629   :  { %v2265_v10 = vmul.f32 %v4556_v14, %v4556_v14 }
 0x62a   :  { %2292 = vadd.xlane.f32.xlu0 %v2248_v21 }
 0x62c   :  { %2294 = vadd.xlane.f32.xlu1 %v2249_v13 }
 0x62e   :  { %2176 = vadd.xlane.f32.xlu0 %v4470_v30 }
 0x630   :  { %2178 = vadd.xlane.f32.xlu1 %v4479_v41 }
 0x632   :  { %2172 = vadd.xlane.f32.xlu0 %v4473_v19 }
 0x634   :  { %2174 = vadd.xlane.f32.xlu1 %v4483_v32 }
 0x636   :  { %2304 = vadd.xlane.f32.xlu0 %v2254_v8 }
 0x638   :  { %2306 = vadd.xlane.f32.xlu1 %v2255_v58 }
 0x63a   :  { %2300 = vadd.xlane.f32.xlu0 %v2252_v61 }
 0x63c   :  { %2302 = vadd.xlane.f32.xlu1 %v2253_v59 }
 0x63e   :  { %2184 = vadd.xlane.f32.xlu0 %v4494_v25 }
 0x640   :  { %2186 = vadd.xlane.f32.xlu1 %v4503_v9 }
 0x642   :  { %2180 = vadd.xlane.f32.xlu0 %v4500_v12 }
 0x644   :  { %2182 = vadd.xlane.f32.xlu1 %v4508_v29 }
 0x646   :  { %2312 = vadd.xlane.f32.xlu0 %v2258_v62 }
 0x648   :  { %2314 = vadd.xlane.f32.xlu1 %v2259_v4 }
 0x64a   :  { %2308 = vadd.xlane.f32.xlu0 %v2256_v6 }
 0x64c   :  { %2310 = vadd.xlane.f32.xlu1 %v2257_v22 }
 0x64e   :  { %2192 = vadd.xlane.f32.xlu0 %v4518_v55 }
 0x650   :  { %2194 = vadd.xlane.f32.xlu1 %v4527_v33 }
 0x652   :  { %2188 = vadd.xlane.f32.xlu0 %v4521_v3 }
 0x654   :  { %2190 = vadd.xlane.f32.xlu1 %v4531_v7 }
 0x656   :  { %2320 = vadd.xlane.f32.xlu0 %v2262_v26 }
 0x658   :  { %2322 = vadd.xlane.f32.xlu1 %v2263_v37 }
 0x65a   :  { %2316 = vadd.xlane.f32.xlu0 %v2260_v56 }
 0x65c   :  { %2318 = vadd.xlane.f32.xlu1 %v2261_v39 }
 0x65e   :  { %2200 = vadd.xlane.f32.xlu0 %v4542_v46 }
 0x660   :  { %2202 = vadd.xlane.f32.xlu1 %v4551_v50 }
 0x662   :  { %2196 = vadd.xlane.f32.xlu0 %v4548_v40 }
 0x664   :  { %2198 = vadd.xlane.f32.xlu1 %v4556_v14 }
 0x666   :  { %2324 = vadd.xlane.f32.xlu0 %v2264_v28 }
 0x668   :  { %2326 = vadd.xlane.f32.xlu1 %v2265_v10 }
 0x66a   :  { %2328 = vadd.xlane.f32.xlu0 %v2266_v53 }
 0x66c   :  { %2330 = vadd.xlane.f32.xlu1 %v2267_v54 }
 0x67b   :  { %v2145_v36 = vpop.xlane.xlu0 %2144 }
 0x67c   :  { %v2206_v31 = vmul.f32 0.0625, %v2145_v36 }
 0x67d   :  { %v2147_v24 = vpop.xlane.xlu1 %2146 }
 0x67e   :  { %v4610_v2 = vmul.f32 0.0625, %v2147_v24  ;;  %v2366_v35 = vmul.f32 %v2206_v31, %v2206_v31 }
 0x67f   :  { %v2141_v27 = vpop.xlane.xlu0 %2140 }
 0x680   :  { %v4612_v43 = vmul.f32 0.0625, %v2141_v27  ;;  %v2367_v20 = vmul.f32 %v4610_v2, %v4610_v2 }
 0x681   :  { %v2143_v47 = vpop.xlane.xlu1 %2142 }
 0x682   :  { %v4614_v57 = vmul.f32 0.0625, %v2143_v47  ;;  %v2364_v8 = vmul.f32 %v4612_v43, %v4612_v43 }
 0x683   :  { %v2273_v49 = vpop.xlane.xlu0 %2272 }
 0x684   :  { %v2334_v5 = vmul.f32 0.0625, %v2273_v49  ;;  %v2365_v62 = vmul.f32 %v4614_v57, %v4614_v57 }
 0x685   :  { %v2275_v60 = vpop.xlane.xlu1 %2274 }
 0x686   :  { %v2398_v1 = vsub.f32 %v2334_v5, %v2366_v35  ;;  %v2335_v21 = vmul.f32 0.0625, %v2275_v60 }
 0x687   :  { %v2269_v13 = vpop.xlane.xlu0 %2268 }
 0x688   :  { %v2430_v58 = vmax.f32 %v2398_v1, 0.0  ;;  %v2399_v61 = vsub.f32 %v2335_v21, %v2367_v20  ;;  %v2332_v59 = vmul.f32 0.0625, %v2269_v13  ;;  %v2462_v21 = vsub.f32 %v4419_v48, %v2206_v31  ;;  %v4645_v31 = vld [vmem:[%s4977_s10] ss:$0 sm:$0xff] }
 0x689   :  { %v2271_v4 = vpop.xlane.xlu1 %2270 }
 0x68a   :  { %v2494_v6 = vadd.f32 1e-05, %v2430_v58  ;;  %v2431_v22 = vmax.f32 %v2399_v61, 0.0  ;;  %v2396_v26 = vsub.f32 %v2332_v59, %v2364_v8  ;;  %v2333_v37 = vmul.f32 0.0625, %v2271_v4  ;;  %v4636_v61 = vld [vmem:[%s4976_s9] ss:$0 sm:$0xff] }
 0x68b   :  { %v2153_v56 = vpop.xlane.xlu0 %2152 }
 0x68c   :  { %3192 = vrsqrt.f32 %v2494_v6  ;;  %v2495_v39 = vadd.f32 1e-05, %v2431_v22  ;;  %v2428_v28 = vmax.f32 %v2396_v26, 0.0  ;;  %v2397_v10 = vsub.f32 %v2333_v37, %v2365_v62 }
 0x68d   :  { %v2155_v53 = vpop.xlane.xlu1 %2154  ;;  %v4622_v47 = vmul.f32 0.0625, %v2153_v56  ;;  %v2463_v6 = vsub.f32 %v4422_v34, %v4610_v2 }
 0x68e   :  { %3194 = vrsqrt.f32 %v2495_v39  ;;  %v2492_v54 = vadd.f32 1e-05, %v2428_v28  ;;  %v2429_v36 = vmax.f32 %v2397_v10, 0.0  ;;  %v4624_v35 = vmul.f32 0.0625, %v2155_v53 }
 0x68f   :  { %v2149_v24 = vpop.xlane.xlu0 %2148  ;;  %v2370_v60 = vmul.f32 %v4622_v47, %v4622_v47  ;;  %v2460_v10 = vsub.f32 %v4426_v17, %v4612_v43 }
 0x690   :  { %3196 = vrsqrt.f32 %v2492_v54  ;;  %v2493_v27 = vadd.f32 1e-05, %v2429_v36  ;;  %v4628_v20 = vmul.f32 0.0625, %v2149_v24  ;;  %v2371_v59 = vmul.f32 %v4624_v35, %v4624_v35 }
 0x691   :  { %v2151_v49 = vpop.xlane.xlu1 %2150 }
 0x692   :  { %3198 = vrsqrt.f32 %v2493_v27  ;;  %v4631_v13 = vmul.f32 0.0625, %v2151_v49  ;;  %v2368_v37 = vmul.f32 %v4628_v20, %v4628_v20 }
 0x693   :  { %v2281_v5 = vpop.xlane.xlu0 %2280 }
 0x694   :  { %v2338_v1 = vmul.f32 0.0625, %v2281_v5  ;;  %v2369_v2 = vmul.f32 %v4631_v13, %v4631_v13 }
 0x695   :  { %v2283_v8 = vpop.xlane.xlu1 %2282 }
 0x696   :  { %v3193_v58 = vpop.eup %3192  ;;  %v2402_v62 = vsub.f32 %v2338_v1, %v2370_v60  ;;  %v2339_v4 = vmul.f32 0.0625, %v2283_v8  ;;  %v2461_v60 = vsub.f32 %v4430_v42, %v4614_v57 }
 0x697   :  { %v2558_v22 = vmul.f32 %v3193_v58, %v2462_v21  ;;  %v2277_v26 = vpop.xlane.xlu0 %2276 }
 0x698   :  { %v3195_v48 = vpop.eup %3194  ;;  %v2434_v56 = vmax.f32 %v2402_v62, 0.0  ;;  %v2403_v39 = vsub.f32 %v2339_v4, %v2371_v59  ;;  %v2336_v28 = vmul.f32 0.0625, %v2277_v26 }
 0x699   :  { %v2596_v53 = vmul.f32 %v4636_v61, %v2558_v22  ;;  %v2559_v34 = vmul.f32 %v3195_v48, %v2463_v6  ;;  %v2279_v54 = vpop.xlane.xlu1 %2278 }
 0x69a   :  { %v3197_v36 = vpop.eup %3196  ;;  %v2498_v24 = vadd.f32 1e-05, %v2434_v56  ;;  %v2435_v27 = vmax.f32 %v2403_v39, 0.0  ;;  %v2400_v49 = vsub.f32 %v2336_v28, %v2368_v37  ;;  %v2337_v5 = vmul.f32 0.0625, %v2279_v54 }
 0x69b   :  { %v2634_v1 = vadd.f32 %v4645_v31, %v2596_v53  ;;  %v2597_v21 = vmul.f32 %v4636_v61, %v2559_v34  ;;  %v2556_v17 = vmul.f32 %v3197_v36, %v2460_v10  ;;  %v2161_v43 = vpop.xlane.xlu0 %2160 }
 0x69c   :  { %v3199_v8 = vpop.eup %3198  ;;  %3200 = vrsqrt.f32 %v2498_v24  ;;  %v2499_v58 = vadd.f32 1e-05, %v2435_v27  ;;  %v2432_v59 = vmax.f32 %v2400_v49, 0.0  ;;  %v2401_v62 = vsub.f32 %v2337_v5, %v2369_v2 }
 0x69d   :  { %2666 = vst [vmem:[%s4978_s11 + $0x10] sm:$0xff] %v2634_v1  ;;  %v2635_v4 = vadd.f32 %v4645_v31, %v2597_v21  ;;  %v2594_v6 = vmul.f32 %v4636_v61, %v2556_v17  ;;  %v2557_v42 = vmul.f32 %v3199_v8, %v2461_v60  ;;  %v2163_v57 = vpop.xlane.xlu1 %2162  ;;  %v4668_v28 = vmul.f32 0.0625, %v2161_v43 }
 0x69e   :  { %3202 = vrsqrt.f32 %v2499_v58  ;;  %v2496_v22 = vadd.f32 1e-05, %v2432_v59  ;;  %v2433_v26 = vmax.f32 %v2401_v62, 0.0  ;;  %v4674_v34 = vmul.f32 0.0625, %v2163_v57 }
 0x69f   :  { %2667 = vst [vmem:[%s4978_s11 + $0x18] sm:$0xff] %v2635_v4  ;;  %v2632_v48 = vadd.f32 %v4645_v31, %v2594_v6  ;;  %v2595_v37 = vmul.f32 %v4636_v61, %v2557_v42  ;;  %v2157_v56 = vpop.xlane.xlu0 %2156  ;;  %v2374_v54 = vmul.f32 %v4668_v28, %v4668_v28  ;;  %v2466_v27 = vsub.f32 %v4443_v51, %v4622_v47 }
 0x6a0   :  { %3204 = vrsqrt.f32 %v2496_v22  ;;  %v2497_v39 = vadd.f32 1e-05, %v2433_v26  ;;  %v4681_v36 = vmul.f32 0.0625, %v2157_v56  ;;  %v2375_v1 = vmul.f32 %v4674_v34, %v4674_v34 }
 0x6a1   :  { %2664 = vst [vmem:[%s4978_s11] sm:$0xff] %v2632_v48  ;;  %v2633_v10 = vadd.f32 %v4645_v31, %v2595_v37  ;;  %v2159_v53 = vpop.xlane.xlu1 %2158  ;;  %v2467_v43 = vsub.f32 %v4446_v63, %v4624_v35  ;;  %v2464_v6 = vsub.f32 %v4450_v0, %v4628_v20 }
 0x6a2   :  { %3206 = vrsqrt.f32 %v2497_v39  ;;  %v4685_v49 = vmul.f32 0.0625, %v2159_v53  ;;  %v2372_v62 = vmul.f32 %v4681_v36, %v4681_v36  ;;  %v2465_v39 = vsub.f32 %v4454_v18, %v4631_v13 }
 0x6a3   :  { %2665 = vst [vmem:[%s4978_s11 + $0x8] sm:$0xff] %v2633_v10  ;;  %v2289_v2 = vpop.xlane.xlu0 %2288 }
 0x6a4   :  { %v2342_v24 = vmul.f32 0.0625, %v2289_v2  ;;  %v2373_v22 = vmul.f32 %v4685_v49, %v4685_v49 }
 0x6a5   :  { %v2291_v5 = vpop.xlane.xlu1 %2290 }
 0x6a6   :  { %v3201_v60 = vpop.eup %3200  ;;  %v2406_v21 = vsub.f32 %v2342_v24, %v2374_v54  ;;  %v2343_v17 = vmul.f32 0.0625, %v2291_v5 }
 0x6a7   :  { %v2562_v8 = vmul.f32 %v3201_v60, %v2466_v27  ;;  %v2285_v58 = vpop.xlane.xlu0 %2284 }
 0x6a8   :  { %v3203_v59 = vpop.eup %3202  ;;  %v2438_v4 = vmax.f32 %v2406_v21, 0.0  ;;  %v2407_v51 = vsub.f32 %v2343_v17, %v2375_v1  ;;  %v2340_v47 = vmul.f32 0.0625, %v2285_v58 }
 0x6a9   :  { %v2600_v42 = vmul.f32 %v4636_v61, %v2562_v8  ;;  %v2563_v57 = vmul.f32 %v3203_v59, %v2467_v43  ;;  %v2287_v26 = vpop.xlane.xlu1 %2286 }
 0x6aa   :  { %v3205_v63 = vpop.eup %3204  ;;  %v2502_v35 = vadd.f32 1e-05, %v2438_v4  ;;  %v2439_v48 = vmax.f32 %v2407_v51, 0.0  ;;  %v2404_v37 = vsub.f32 %v2340_v47, %v2372_v62  ;;  %v2341_v56 = vmul.f32 0.0625, %v2287_v26 }
 0x6ab   :  { %v2638_v10 = vadd.f32 %v4645_v31, %v2600_v42  ;;  %v2601_v53 = vmul.f32 %v4636_v61, %v2563_v57  ;;  %v2560_v0 = vmul.f32 %v3205_v63, %v2464_v6  ;;  %v2169_v20 = vpop.xlane.xlu0 %2168 }
 0x6ac   :  { %v3207_v2 = vpop.eup %3206  ;;  %3208 = vrsqrt.f32 %v2502_v35  ;;  %v2503_v54 = vadd.f32 1e-05, %v2439_v48  ;;  %v2436_v24 = vmax.f32 %v2404_v37, 0.0  ;;  %v2405_v27 = vsub.f32 %v2341_v56, %v2373_v22 }
 0x6ad   :  { %2670 = vst [vmem:[%s4978_s11 + $0x30] sm:$0xff] %v2638_v10  ;;  %v2639_v5 = vadd.f32 %v4645_v31, %v2601_v53  ;;  %v2598_v60 = vmul.f32 %v4636_v61, %v2560_v0  ;;  %v2561_v18 = vmul.f32 %v3207_v2, %v2465_v39  ;;  %v2171_v13 = vpop.xlane.xlu1 %2170  ;;  %v4712_v59 = vmul.f32 0.0625, %v2169_v20 }
 0x6ae   :  { %3210 = vrsqrt.f32 %v2503_v54  ;;  %v2500_v1 = vadd.f32 1e-05, %v2436_v24  ;;  %v2437_v21 = vmax.f32 %v2405_v27, 0.0  ;;  %v4718_v51 = vmul.f32 0.0625, %v2171_v13 }
 0x6af   :  { %2671 = vst [vmem:[%s4978_s11 + $0x38] sm:$0xff] %v2639_v5  ;;  %v2636_v17 = vadd.f32 %v4645_v31, %v2598_v60  ;;  %v2599_v43 = vmul.f32 %v4636_v61, %v2561_v18  ;;  %v2165_v8 = vpop.xlane.xlu0 %2164  ;;  %v2378_v6 = vmul.f32 %v4712_v59, %v4712_v59  ;;  %v2470_v22 = vsub.f32 %v4467_v23, %v4668_v28 }
 0x6b0   :  { %3212 = vrsqrt.f32 %v2500_v1  ;;  %v2501_v58 = vadd.f32 1e-05, %v2437_v21  ;;  %v4725_v42 = vmul.f32 0.0625, %v2165_v8  ;;  %v2379_v48 = vmul.f32 %v4718_v51, %v4718_v51 }
 0x6b1   :  { %2668 = vst [vmem:[%s4978_s11 + $0x20] sm:$0xff] %v2636_v17  ;;  %v2637_v62 = vadd.f32 %v4645_v31, %v2599_v43  ;;  %v2167_v4 = vpop.xlane.xlu1 %2166  ;;  %v2471_v39 = vsub.f32 %v4476_v44, %v4674_v34  ;;  %v2468_v54 = vsub.f32 %v4486_v16, %v4681_v36  ;;  %v2469_v21 = vsub.f32 %v4490_v38, %v4685_v49 }
 0x6b2   :  { %3214 = vrsqrt.f32 %v2501_v58  ;;  %v4729_v26 = vmul.f32 0.0625, %v2167_v4  ;;  %v2376_v20 = vmul.f32 %v4725_v42, %v4725_v42 }
 0x6b3   :  { %2669 = vst [vmem:[%s4978_s11 + $0x28] sm:$0xff] %v2637_v62  ;;  %v2297_v47 = vpop.xlane.xlu0 %2296 }
 0x6b4   :  { %v2346_v57 = vmul.f32 0.0625, %v2297_v47  ;;  %v2377_v5 = vmul.f32 %v4729_v26, %v4729_v26 }
 0x6b5   :  { %v2299_v63 = vpop.xlane.xlu1 %2298 }
 0x6b6   :  { %v3209_v35 = vpop.eup %3208  ;;  %v2410_v37 = vsub.f32 %v2346_v57, %v2378_v6  ;;  %v2347_v56 = vmul.f32 0.0625, %v2299_v63 }
 0x6b7   :  { %v2566_v10 = vmul.f32 %v3209_v35, %v2470_v22  ;;  %v2293_v53 = vpop.xlane.xlu0 %2292 }
 0x6b8   :  { %v3211_v0 = vpop.eup %3210  ;;  %v2442_v2 = vmax.f32 %v2410_v37, 0.0  ;;  %v2411_v23 = vsub.f32 %v2347_v56, %v2379_v48  ;;  %v2344_v28 = vmul.f32 0.0625, %v2293_v53 }
 0x6b9   :  { %v2604_v24 = vmul.f32 %v4636_v61, %v2566_v10  ;;  %v2567_v27 = vmul.f32 %v3211_v0, %v2471_v39  ;;  %v2295_v60 = vpop.xlane.xlu1 %2294 }
 0x6ba   :  { %v3213_v44 = vpop.eup %3212  ;;  %v2506_v34 = vadd.f32 1e-05, %v2442_v2  ;;  %v2443_v18 = vmax.f32 %v2411_v23, 0.0  ;;  %v2408_v13 = vsub.f32 %v2344_v28, %v2376_v20  ;;  %v2345_v1 = vmul.f32 0.0625, %v2295_v60 }
 0x6bb   :  { %v2642_v17 = vadd.f32 %v4645_v31, %v2604_v24  ;;  %v2605_v43 = vmul.f32 %v4636_v61, %v2567_v27  ;;  %v2564_v16 = vmul.f32 %v3213_v44, %v2468_v54  ;;  %v2177_v36 = vpop.xlane.xlu0 %2176  ;;  %v2474_v28 = vsub.f32 %v4515_v52, %v4712_v59 }
 0x6bc   :  { %v3215_v8 = vpop.eup %3214  ;;  %3216 = vrsqrt.f32 %v2506_v34  ;;  %v2507_v58 = vadd.f32 1e-05, %v2443_v18  ;;  %v2440_v62 = vmax.f32 %v2408_v13, 0.0  ;;  %v2409_v4 = vsub.f32 %v2345_v1, %v2377_v5 }
 0x6bd   :  { %2674 = vst [vmem:[%s4978_s11 + $0x50] sm:$0xff] %v2642_v17  ;;  %v2643_v47 = vadd.f32 %v4645_v31, %v2605_v43  ;;  %v2602_v6 = vmul.f32 %v4636_v61, %v2564_v16  ;;  %v2565_v38 = vmul.f32 %v3215_v8, %v2469_v21  ;;  %v2179_v49 = vpop.xlane.xlu1 %2178  ;;  %v4756_v56 = vmul.f32 0.0625, %v2177_v36 }
 0x6be   :  { %3218 = vrsqrt.f32 %v2507_v58  ;;  %v2504_v57 = vadd.f32 1e-05, %v2440_v62  ;;  %v2441_v22 = vmax.f32 %v2409_v4, 0.0  ;;  %v4762_v53 = vmul.f32 0.0625, %v2179_v49 }
 0x6bf   :  { %2675 = vst [vmem:[%s4978_s11 + $0x58] sm:$0xff] %v2643_v47  ;;  %v2640_v63 = vadd.f32 %v4645_v31, %v2602_v6  ;;  %v2603_v35 = vmul.f32 %v4636_v61, %v2565_v38  ;;  %v2173_v48 = vpop.xlane.xlu0 %2172  ;;  %v2382_v20 = vmul.f32 %v4756_v56, %v4756_v56  ;;  %v2475_v34 = vsub.f32 %v4524_v11, %v4718_v51 }
 0x6c0   :  { %3220 = vrsqrt.f32 %v2504_v57  ;;  %v2505_v37 = vadd.f32 1e-05, %v2441_v22  ;;  %v4769_v2 = vmul.f32 0.0625, %v2173_v48  ;;  %v2383_v5 = vmul.f32 %v4762_v53, %v4762_v53 }
 0x6c1   :  { %2672 = vst [vmem:[%s4978_s11 + $0x40] sm:$0xff] %v2640_v63  ;;  %v2641_v39 = vadd.f32 %v4645_v31, %v2603_v35  ;;  %v2175_v10 = vpop.xlane.xlu1 %2174  ;;  %v2472_v43 = vsub.f32 %v4534_v15, %v4725_v42  ;;  %v2473_v6 = vsub.f32 %v4538_v45, %v4729_v26 }
 0x6c2   :  { %3222 = vrsqrt.f32 %v2505_v37  ;;  %v4773_v54 = vmul.f32 0.0625, %v2175_v10  ;;  %v2380_v21 = vmul.f32 %v4769_v2, %v4769_v2 }
 0x6c3   :  { %2673 = vst [vmem:[%s4978_s11 + $0x48] sm:$0xff] %v2641_v39  ;;  %v2305_v0 = vpop.xlane.xlu0 %2304 }
 0x6c4   :  { %v2350_v23 = vmul.f32 0.0625, %v2305_v0  ;;  %v2381_v8 = vmul.f32 %v4773_v54, %v4773_v54 }
 0x6c5   :  { %v2307_v24 = vpop.xlane.xlu1 %2306 }
 0x6c6   :  { %v3217_v27 = vpop.eup %3216  ;;  %v2414_v60 = vsub.f32 %v2350_v23, %v2382_v20  ;;  %v2351_v44 = vmul.f32 0.0625, %v2307_v24 }
 0x6c7   :  { %v2570_v18 = vmul.f32 %v3217_v27, %v2474_v28  ;;  %v2301_v13 = vpop.xlane.xlu0 %2300 }
 0x6c8   :  { %v3219_v1 = vpop.eup %3218  ;;  %v2446_v17 = vmax.f32 %v2414_v60, 0.0  ;;  %v2415_v52 = vsub.f32 %v2351_v44, %v2383_v5  ;;  %v2348_v59 = vmul.f32 0.0625, %v2301_v13 }
 0x6c9   :  { %v2608_v16 = vmul.f32 %v4636_v61, %v2570_v18  ;;  %v2571_v36 = vmul.f32 %v3219_v1, %v2475_v34  ;;  %v2303_v58 = vpop.xlane.xlu1 %2302  ;;  %v2478_v1 = vsub.f32 %v4470_v30, %v4756_v56 }
 0x6ca   :  { %v3221_v11 = vpop.eup %3220  ;;  %v2510_v51 = vadd.f32 1e-05, %v2446_v17  ;;  %v2447_v62 = vmax.f32 %v2415_v52, 0.0  ;;  %v2412_v4 = vsub.f32 %v2348_v59, %v2380_v21  ;;  %v2349_v47 = vmul.f32 0.0625, %v2303_v58 }
 0x6cb   :  { %v2646_v38 = vadd.f32 %v4645_v31, %v2608_v16  ;;  %v2609_v49 = vmul.f32 %v4636_v61, %v2571_v36  ;;  %v2568_v15 = vmul.f32 %v3221_v11, %v2472_v43  ;;  %v2185_v42 = vpop.xlane.xlu0 %2184  ;;  %v2479_v36 = vsub.f32 %v4479_v41, %v4762_v53 }
 0x6cc   :  { %v3223_v57 = vpop.eup %3222  ;;  %3224 = vrsqrt.f32 %v2510_v51  ;;  %v2511_v22 = vadd.f32 1e-05, %v2447_v62  ;;  %v2444_v63 = vmax.f32 %v2412_v4, 0.0  ;;  %v2413_v35 = vsub.f32 %v2349_v47, %v2381_v8 }
 0x6cd   :  { %2678 = vst [vmem:[%s4978_s11 + $0x70] sm:$0xff] %v2646_v38  ;;  %v2647_v48 = vadd.f32 %v4645_v31, %v2609_v49  ;;  %v2606_v37 = vmul.f32 %v4636_v61, %v2568_v15  ;;  %v2569_v45 = vmul.f32 %v3223_v57, %v2473_v6  ;;  %v2187_v26 = vpop.xlane.xlu1 %2186  ;;  %v4800_v24 = vmul.f32 0.0625, %v2185_v42 }
 0x6ce   :  { %3226 = vrsqrt.f32 %v2511_v22  ;;  %v2508_v39 = vadd.f32 1e-05, %v2444_v63  ;;  %v2445_v10 = vmax.f32 %v2413_v35, 0.0  ;;  %v4806_v60 = vmul.f32 0.0625, %v2187_v26 }
 0x6cf   :  { %2679 = vst [vmem:[%s4978_s11 + $0x78] sm:$0xff] %v2647_v48  ;;  %v2644_v0 = vadd.f32 %v4645_v31, %v2606_v37  ;;  %v2607_v20 = vmul.f32 %v4636_v61, %v2569_v45  ;;  %v2181_v23 = vpop.xlane.xlu0 %2180  ;;  %v2386_v34 = vmul.f32 %v4800_v24, %v4800_v24  ;;  %v2476_v4 = vsub.f32 %v4473_v19, %v4769_v2 }
 0x6d0   :  { %3228 = vrsqrt.f32 %v2508_v39  ;;  %v2509_v28 = vadd.f32 1e-05, %v2445_v10  ;;  %v4813_v18 = vmul.f32 0.0625, %v2181_v23  ;;  %v2387_v59 = vmul.f32 %v4806_v60, %v4806_v60 }
 0x6d1   :  { %2676 = vst [vmem:[%s4978_s11 + $0x60] sm:$0xff] %v2644_v0  ;;  %v2645_v27 = vadd.f32 %v4645_v31, %v2607_v20  ;;  %v2183_v5 = vpop.xlane.xlu1 %2182  ;;  %v2477_v22 = vsub.f32 %v4483_v32, %v4773_v54 }
 0x6d2   :  { %3230 = vrsqrt.f32 %v2509_v28  ;;  %v4817_v21 = vmul.f32 0.0625, %v2183_v5  ;;  %v2384_v51 = vmul.f32 %v4813_v18, %v4813_v18 }
 0x6d3   :  { %2677 = vst [vmem:[%s4978_s11 + $0x68] sm:$0xff] %v2645_v27  ;;  %v2313_v44 = vpop.xlane.xlu0 %2312 }
 0x6d4   :  { %v2354_v13 = vmul.f32 0.0625, %v2313_v44  ;;  %v2385_v38 = vmul.f32 %v4817_v21, %v4817_v21 }
 0x6d5   :  { %v2315_v17 = vpop.xlane.xlu1 %2314 }
 0x6d6   :  { %v3225_v52 = vpop.eup %3224  ;;  %v2418_v43 = vsub.f32 %v2354_v13, %v2386_v34  ;;  %v2355_v16 = vmul.f32 0.0625, %v2315_v17 }
 0x6d7   :  { %v2574_v8 = vmul.f32 %v3225_v52, %v2478_v1  ;;  %v2309_v58 = vpop.xlane.xlu0 %2308 }
 0x6d8   :  { %v3227_v11 = vpop.eup %3226  ;;  %v2450_v62 = vmax.f32 %v2418_v43, 0.0  ;;  %v2419_v30 = vsub.f32 %v2355_v16, %v2387_v59  ;;  %v2352_v56 = vmul.f32 0.0625, %v2309_v58  ;;  %v2482_v16 = vsub.f32 %v4494_v25, %v4800_v24 }
 0x6d9   :  { %v2612_v47 = vmul.f32 %v4636_v61, %v2574_v8  ;;  %v2575_v6 = vmul.f32 %v3227_v11, %v2479_v36  ;;  %v2311_v49 = vpop.xlane.xlu1 %2310 }
 0x6da   :  { %v3229_v41 = vpop.eup %3228  ;;  %v2514_v53 = vadd.f32 1e-05, %v2450_v62  ;;  %v2451_v15 = vmax.f32 %v2419_v30, 0.0  ;;  %v2416_v42 = vsub.f32 %v2352_v56, %v2384_v51  ;;  %v2353_v57 = vmul.f32 0.0625, %v2311_v49 }
 0x6db   :  { %v2650_v63 = vadd.f32 %v4645_v31, %v2612_v47  ;;  %v2613_v35 = vmul.f32 %v4636_v61, %v2575_v6  ;;  %v2572_v19 = vmul.f32 %v3229_v41, %v2476_v4  ;;  %v2193_v2 = vpop.xlane.xlu0 %2192  ;;  %v2483_v30 = vsub.f32 %v4503_v9, %v4806_v60 }
 0x6dc   :  { %v3231_v48 = vpop.eup %3230  ;;  %3232 = vrsqrt.f32 %v2514_v53  ;;  %v2515_v37 = vadd.f32 1e-05, %v2451_v15  ;;  %v2448_v45 = vmax.f32 %v2416_v42, 0.0  ;;  %v2417_v26 = vsub.f32 %v2353_v57, %v2385_v38 }
 0x6dd   :  { %2682 = vst [vmem:[%s4978_s11 + $0x90] sm:$0xff] %v2650_v63  ;;  %v2651_v39 = vadd.f32 %v4645_v31, %v2613_v35  ;;  %v2610_v10 = vmul.f32 %v4636_v61, %v2572_v19  ;;  %v2573_v32 = vmul.f32 %v3231_v48, %v2477_v22  ;;  %v2195_v54 = vpop.xlane.xlu1 %2194  ;;  %v4844_v44 = vmul.f32 0.0625, %v2193_v2 }
 0x6de   :  { %3234 = vrsqrt.f32 %v2515_v37  ;;  %v2512_v0 = vadd.f32 1e-05, %v2448_v45  ;;  %v2449_v20 = vmax.f32 %v2417_v26, 0.0  ;;  %v4850_v1 = vmul.f32 0.0625, %v2195_v54 }
 0x6df   :  { %2683 = vst [vmem:[%s4978_s11 + $0x98] sm:$0xff] %v2651_v39  ;;  %v2648_v23 = vadd.f32 %v4645_v31, %v2610_v10  ;;  %v2611_v28 = vmul.f32 %v4636_v61, %v2573_v32  ;;  %v2189_v27 = vpop.xlane.xlu0 %2188  ;;  %v2390_v52 = vmul.f32 %v4844_v44, %v4844_v44  ;;  %v2480_v49 = vsub.f32 %v4500_v12, %v4813_v18 }
 0x6e0   :  { %3236 = vrsqrt.f32 %v2512_v0  ;;  %v2513_v5 = vadd.f32 1e-05, %v2449_v20  ;;  %v4857_v59 = vmul.f32 0.0625, %v2189_v27  ;;  %v2391_v11 = vmul.f32 %v4850_v1, %v4850_v1 }
 0x6e1   :  { %2680 = vst [vmem:[%s4978_s11 + $0x80] sm:$0xff] %v2648_v23  ;;  %v2649_v34 = vadd.f32 %v4645_v31, %v2611_v28  ;;  %v2191_v13 = vpop.xlane.xlu1 %2190  ;;  %v2481_v35 = vsub.f32 %v4508_v29, %v4817_v21 }
 0x6e2   :  { %3238 = vrsqrt.f32 %v2513_v5  ;;  %v4861_v36 = vmul.f32 0.0625, %v2191_v13  ;;  %v2388_v6 = vmul.f32 %v4857_v59, %v4857_v59 }
 0x6e3   :  { %2681 = vst [vmem:[%s4978_s11 + $0x88] sm:$0xff] %v2649_v34  ;;  %v2321_v17 = vpop.xlane.xlu0 %2320 }
 0x6e4   :  { %v2358_v43 = vmul.f32 0.0625, %v2321_v17  ;;  %v2389_v15 = vmul.f32 %v4861_v36, %v4861_v36 }
 0x6e5   :  { %v2323_v8 = vpop.xlane.xlu1 %2322 }
 0x6e6   :  { %v3233_v58 = vpop.eup %3232  ;;  %v2422_v51 = vsub.f32 %v2358_v43, %v2390_v52  ;;  %v2359_v62 = vmul.f32 0.0625, %v2323_v8  ;;  %v2486_v8 = vsub.f32 %v4518_v55, %v4844_v44 }
 0x6e7   :  { %v2578_v56 = vmul.f32 %v3233_v58, %v2482_v16  ;;  %v2317_v4 = vpop.xlane.xlu0 %2316 }
 0x6e8   :  { %v3235_v47 = vpop.eup %3234  ;;  %v2454_v38 = vmax.f32 %v2422_v51, 0.0  ;;  %v2423_v25 = vsub.f32 %v2359_v62, %v2391_v11  ;;  %v2356_v24 = vmul.f32 0.0625, %v2317_v4  ;;  %v2487_v4 = vsub.f32 %v4527_v33, %v4850_v1 }
 0x6e9   :  { %v2616_v41 = vmul.f32 %v4636_v61, %v2578_v56  ;;  %v2579_v53 = vmul.f32 %v3235_v47, %v2483_v30  ;;  %v2319_v42 = vpop.xlane.xlu1 %2318 }
 0x6ea   :  { %v3237_v9 = vpop.eup %3236  ;;  %v2518_v60 = vadd.f32 1e-05, %v2454_v38  ;;  %v2455_v57 = vmax.f32 %v2423_v25, 0.0  ;;  %v2420_v22 = vsub.f32 %v2356_v24, %v2388_v6  ;;  %v2357_v63 = vmul.f32 0.0625, %v2319_v42 }
 0x6eb   :  { %v2654_v19 = vadd.f32 %v4645_v31, %v2616_v41  ;;  %v2617_v2 = vmul.f32 %v4636_v61, %v2579_v53  ;;  %v2576_v12 = vmul.f32 %v3237_v9, %v2480_v49  ;;  %v2201_v18 = vpop.xlane.xlu0 %2200  ;;  %v2484_v49 = vsub.f32 %v4521_v3, %v4857_v59 }
 0x6ec   :  { %v3239_v48 = vpop.eup %3238  ;;  %3240 = vrsqrt.f32 %v2518_v60  ;;  %v2519_v37 = vadd.f32 1e-05, %v2455_v57  ;;  %v2452_v45 = vmax.f32 %v2420_v22, 0.0  ;;  %v2421_v26 = vsub.f32 %v2357_v63, %v2389_v15 }
 0x6ed   :  { %2686 = vst [vmem:[%s4978_s11 + $0xb0] sm:$0xff] %v2654_v19  ;;  %v2655_v39 = vadd.f32 %v4645_v31, %v2617_v2  ;;  %v2614_v10 = vmul.f32 %v4636_v61, %v2576_v12  ;;  %v2577_v29 = vmul.f32 %v3239_v48, %v2481_v35  ;;  %v2203_v21 = vpop.xlane.xlu1 %2202  ;;  %v4899_v52 = vmul.f32 0.0625, %v2201_v18 }
 0x6ee   :  { %3242 = vrsqrt.f32 %v2519_v37  ;;  %v2516_v32 = vadd.f32 1e-05, %v2452_v45  ;;  %v2453_v54 = vmax.f32 %v2421_v26, 0.0  ;;  %v4905_v58 = vmul.f32 0.0625, %v2203_v21 }
 0x6ef   :  { %2687 = vst [vmem:[%s4978_s11 + $0xb8] sm:$0xff] %v2655_v39  ;;  %v2652_v0 = vadd.f32 %v4645_v31, %v2614_v10  ;;  %v2615_v20 = vmul.f32 %v4636_v61, %v2577_v29  ;;  %v2197_v23 = vpop.xlane.xlu0 %2196  ;;  %v2394_v25 = vmul.f32 %v4899_v52, %v4899_v52  ;;  %v2485_v22 = vsub.f32 %v4531_v7, %v4861_v36 }
 0x6f0   :  { %3244 = vrsqrt.f32 %v2516_v32  ;;  %v2517_v28 = vadd.f32 1e-05, %v2453_v54  ;;  %v4892_v5 = vmul.f32 0.0625, %v2197_v23  ;;  %v2395_v15 = vmul.f32 %v4905_v58, %v4905_v58 }
 0x6f1   :  { %2684 = vst [vmem:[%s4978_s11 + $0xa0] sm:$0xff] %v2652_v0  ;;  %v2653_v27 = vadd.f32 %v4645_v31, %v2615_v20  ;;  %v2199_v34 = vpop.xlane.xlu1 %2198  ;;  %v2490_v20 = vsub.f32 %v4542_v46, %v4899_v52 }
 0x6f2   :  { %3246 = vrsqrt.f32 %v2517_v28  ;;  %v4894_v13 = vmul.f32 0.0625, %v2199_v34  ;;  %v2392_v43 = vmul.f32 %v4892_v5, %v4892_v5  ;;  %v2488_v29 = vsub.f32 %v4548_v40, %v4892_v5 }
 0x6f3   :  { %2685 = vst [vmem:[%s4978_s11 + $0xa8] sm:$0xff] %v2653_v27  ;;  %v2325_v17 = vpop.xlane.xlu0 %2324  ;;  %v2491_v34 = vsub.f32 %v4551_v50, %v4905_v58 }
 0x6f4   :  { %v2360_v16 = vmul.f32 0.0625, %v2325_v17  ;;  %v2393_v62 = vmul.f32 %v4894_v13, %v4894_v13  ;;  %v2489_v32 = vsub.f32 %v4556_v14, %v4894_v13 }
 0x6f5   :  { %v2327_v11 = vpop.xlane.xlu1 %2326 }
 0x6f6   :  { %v3241_v51 = vpop.eup %3240  ;;  %v2424_v30 = vsub.f32 %v2360_v16, %v2392_v43  ;;  %v2361_v56 = vmul.f32 0.0625, %v2327_v11 }
 0x6f7   :  { %v2582_v47 = vmul.f32 %v3241_v51, %v2486_v8  ;;  %v2329_v6 = vpop.xlane.xlu0 %2328 }
 0x6f8   :  { %v3243_v38 = vpop.eup %3242  ;;  %v2456_v24 = vmax.f32 %v2424_v30, 0.0  ;;  %v2425_v55 = vsub.f32 %v2361_v56, %v2393_v62  ;;  %v2362_v44 = vmul.f32 0.0625, %v2329_v6 }
 0x6f9   :  { %v2620_v41 = vmul.f32 %v4636_v61, %v2582_v47  ;;  %v2583_v53 = vmul.f32 %v3243_v38, %v2487_v4  ;;  %v2331_v42 = vpop.xlane.xlu1 %2330 }
 0x6fa   :  { %v3245_v33 = vpop.eup %3244  ;;  %v2520_v1 = vadd.f32 1e-05, %v2456_v24  ;;  %v2457_v9 = vmax.f32 %v2425_v55, 0.0  ;;  %v2426_v60 = vsub.f32 %v2362_v44, %v2394_v25  ;;  %v2363_v57 = vmul.f32 0.0625, %v2331_v42 }
 0x6fb   :  { %v2658_v63 = vadd.f32 %v4645_v31, %v2620_v41  ;;  %v2621_v35 = vmul.f32 %v4636_v61, %v2583_v53  ;;  %v2580_v3 = vmul.f32 %v3245_v33, %v2484_v49 }
 0x6fc   :  { %v3247_v59 = vpop.eup %3246  ;;  %3248 = vrsqrt.f32 %v2520_v1  ;;  %v2521_v19 = vadd.f32 1e-05, %v2457_v9  ;;  %v2458_v2 = vmax.f32 %v2426_v60, 0.0  ;;  %v2427_v12 = vsub.f32 %v2363_v57, %v2395_v15 }
 0x6fd   :  { %2690 = vst [vmem:[%s4978_s11 + $0xd0] sm:$0xff] %v2658_v63  ;;  %v2659_v18 = vadd.f32 %v4645_v31, %v2621_v35  ;;  %v2618_v48 = vmul.f32 %v4636_v61, %v2580_v3  ;;  %v2581_v37 = vmul.f32 %v3247_v59, %v2485_v22 }
 0x6fe   :  { %3250 = vrsqrt.f32 %v2521_v19  ;;  %v2522_v7 = vadd.f32 1e-05, %v2458_v2  ;;  %v2459_v36 = vmax.f32 %v2427_v12, 0.0 }
 0x6ff   :  { %2691 = vst [vmem:[%s4978_s11 + $0xd8] sm:$0xff] %v2659_v18  ;;  %v2656_v45 = vadd.f32 %v4645_v31, %v2618_v48  ;;  %v2619_v26 = vmul.f32 %v4636_v61, %v2581_v37 }
 0x700   :  { %3252 = vrsqrt.f32 %v2522_v7  ;;  %v2523_v39 = vadd.f32 1e-05, %v2459_v36 }
 0x701   :  { %2688 = vst [vmem:[%s4978_s11 + $0xc0] sm:$0xff] %v2656_v45  ;;  %v2657_v10 = vadd.f32 %v4645_v31, %v2619_v26 }
 0x702   :  { %3254 = vrsqrt.f32 %v2523_v39 }
 0x703   :  { %2689 = vst [vmem:[%s4978_s11 + $0xc8] sm:$0xff] %v2657_v10 }
 0x706   :  { %v3249_v21 = vpop.eup %3248 }
 0x707   :  { %v2584_v54 = vmul.f32 %v3249_v21, %v2488_v29 }
 0x708   :  { %v3251_v0 = vpop.eup %3250 }
 0x709   :  { %v2622_v23 = vmul.f32 %v4636_v61, %v2584_v54  ;;  %v2585_v28 = vmul.f32 %v3251_v0, %v2489_v32 }
 0x70a   :  { %v3253_v27 = vpop.eup %3252 }
 0x70b   :  { %v2660_v17 = vadd.f32 %v4645_v31, %v2622_v23  ;;  %v2623_v40 = vmul.f32 %v4636_v61, %v2585_v28  ;;  %v2586_v5 = vmul.f32 %v3253_v27, %v2490_v20 }
 0x70c   :  { %v3255_v43 = vpop.eup %3254 }
 0x70d   :  { %2692 = vst [vmem:[%s4978_s11 + $0xe0] sm:$0xff] %v2660_v17  ;;  %v2661_v14 = vadd.f32 %v4645_v31, %v2623_v40  ;;  %v2624_v46 = vmul.f32 %v4636_v61, %v2586_v5  ;;  %v2587_v13 = vmul.f32 %v3255_v43, %v2491_v34 }
 0x70f   :  { %2693 = vst [vmem:[%s4978_s11 + $0xe8] sm:$0xff] %v2661_v14  ;;  %v2662_v50 = vadd.f32 %v4645_v31, %v2624_v46  ;;  %v2625_v52 = vmul.f32 %v4636_v61, %v2587_v13 }
 0x711   :  { %2694 = vst [vmem:[%s4978_s11 + $0xf0] sm:$0xff] %v2662_v50  ;;  %v2663_v16 = vadd.f32 %v4645_v31, %v2625_v52 }
 0x713   :  { %2695 = vst [vmem:[%s4978_s11 + $0xf8] sm:$0xff] %v2663_v16 }

</bundles_post_ra>
